<compile_context>
chip_gen: v5e
topology: v5e:2x2
jax: 0.10.0
libtpu: 0.0.40
codegen_flags: <defaults>
</compile_context>

<pallas_src>
import numpy as np
import jax
import jax.numpy as jnp
from jax import lax
from jax.experimental import pallas as pl
from jax.experimental.pallas import tpu as pltpu


def _round_up(x, m):
    return ((x + m - 1) // m) * m


# ----------------------------- FilterStack (static, NonTrainable) -----------------------------
def make_filter_stack(nr, nz, w, ap, rho, start=1, obj_dim=2, cutoff_factor=2):
    factor = 4.0 ** ap / rho
    rp0 = w * (np.arange(nr, dtype=np.float64) + start)
    zp0 = w * (np.arange(nz, dtype=np.float64) - (nz - 1) / 2.0)
    # torch.meshgrid(rp, zp) ('ij') then flatten(1)
    rp = np.repeat(rp0, nz)
    zp = np.tile(zp0, nr)
    rw = np.full_like(rp, w)
    zw = np.full_like(zp, w)
    cutoff = float(np.max(np.sqrt((np.abs(rp) + rw * cutoff_factor) ** 2 +
                                  (np.abs(zp) + zw * cutoff_factor) ** 2)))
    rwt = 4.0 * np.log(2.0) / rw ** 2
    zwt = 4.0 * np.log(2.0) / zw ** 2
    volume = np.sqrt(rwt * zwt / np.pi ** 2) * np.minimum(np.sqrt(rwt / np.pi), 1.0 / (2.0 * np.pi * rp))
    n = factor * volume ** (obj_dim / 3.0)
    return dict(rp=rp, zp=zp, rw=rwt, zw=zwt, n=n, cutoff=cutoff)


# ---------------------- segment bookkeeping (shared by wrapper and kernel) ----------------------
def _segment_order(nf, M):
    """One segment per (gaussian filter fg, |m|, cos/sin).  Order must match the kernel loop."""
    segs = []
    for fg in range(nf):
        for am in range(M + 1):
            segs.append((fg, am, "c"))
        for am in range(1, M + 1):
            segs.append((fg, am, "s"))
    return segs


def _build_fold(bk):
    # out_re[k] = sum_bi fold_re[bi,k]*y_re[bi] ;  out_im[k] = sum_bi fold_im[bi,k]*y_im[bi]
    KB, KBr = 2 * bk + 1, bk + 1
    fold_re = np.zeros((KB, KBr), np.float64)
    fold_im = np.zeros((KB, KBr), np.float64)
    fold_re[bk, 0] = 1.0
    fold_im[bk, 0] = 1.0
    for kk in range(1, KBr):
        fold_re[bk + kk, kk] = 1.0
        fold_re[bk - kk, kk] = 1.0
        fold_im[bk + kk, kk] = 1.0
        fold_im[bk - kk, kk] = -1.0
    return fold_re, fold_im


def _build_fused_weights(W_np, *, ak, bk, ac, bc, nf, seg_list, same_set):
    """Fold complex weight contraction + spectrum fold + re/im split into per-segment matrices.

    Kernel stage-1 (per segment) computes  P = (G_fg * trig_|m|) @ Dpack  with Dpack lanes
    ordered (a_k, re/im, a_c).  WBIG[seg] maps those lanes to the flat output columns
    (re/im, k>=0, b_c).  WSELF is the same map for the f=0 self/identity term.
    (Weight assembly is done eagerly in numpy — weights are concrete module parameters.)
    """
    KA, KB, KBr = 2 * ak + 1, 2 * bk + 1, bk + 1
    L = KA * 2 * ac
    Nout = 2 * KBr * bc
    seg_index = {key: s for s, key in enumerate(seg_list)}
    fold_re, fold_im = _build_fold(bk)
    WBIG = np.zeros((len(seg_list), L, Nout), np.float64)
    WSELF = np.zeros((L, Nout), np.float64)

    def lanes(ai, jj):
        s = ai * 2 * ac + jj * ac
        return slice(s, s + ac)

    def cols(jj, kk):
        s = (jj * KBr + kk) * bc
        return slice(s, s + bc)

    for bi in range(KB):
        bkv = bi - bk
        for ai in range(KA):
            akv = ai - ak
            m = bkv - akv
            am = abs(m)
            sgn = 1.0 if m >= 0 else -1.0
            for kk in range(KBr):
                fr = fold_re[bi, kk]
                fi = fold_im[bi, kk]
                if fr == 0.0 and fi == 0.0:
                    continue
                for fg in range(nf):
                    Wre = W_np[bi, :, ai, 1 + fg, :, 0]           # (ac, bc)
                    Wim = W_np[bi, :, ai, 1 + fg, :, 1]
                    sc = seg_index[(fg, am, "c")]
                    # y_re = PCre@Wre - sgn*PSim@Wre - PCim@Wim - sgn*PSre@Wim
                    # y_im = PCre@Wim - sgn*PSim@Wim + PCim@Wre + sgn*PSre@Wre
                    WBIG[sc, lanes(ai, 0), cols(0, kk)] += fr * Wre
                    WBIG[sc, lanes(ai, 1), cols(0, kk)] += fr * (-Wim)
                    WBIG[sc, lanes(ai, 0), cols(1, kk)] += fi * Wim
                    WBIG[sc, lanes(ai, 1), cols(1, kk)] += fi * Wre
                    if am > 0:
                        ss = seg_index[(fg, am, "s")]
                        WBIG[ss, lanes(ai, 1), cols(0, kk)] += fr * (-sgn) * Wre
                        WBIG[ss, lanes(ai, 0), cols(0, kk)] += fr * (-sgn) * Wim
                        WBIG[ss, lanes(ai, 1), cols(1, kk)] += fi * (-sgn) * Wim
                        WBIG[ss, lanes(ai, 0), cols(1, kk)] += fi * sgn * Wre
                if same_set:
                    Wre0 = W_np[bi, :, ai, 0, :, 0]
                    Wim0 = W_np[bi, :, ai, 0, :, 1]
                    WSELF[lanes(ai, 0), cols(0, kk)] += fr * Wre0
                    WSELF[lanes(ai, 1), cols(0, kk)] += fr * (-Wim0)
                    WSELF[lanes(ai, 0), cols(1, kk)] += fi * Wim0
                    WSELF[lanes(ai, 1), cols(1, kk)] += fi * Wre0
    return WBIG.astype(np.float32), WSELF.astype(np.float32)


# ----------------------------------- Pallas kernel (hot path) -----------------------------------
def make_pconv3d_kernel(*, M, nf, filt, seg_list, TB, Ncol, mxu_dtype):
    rp = [float(v) for v in filt["rp"]]
    zp = [float(v) for v in filt["zp"]]
    rw = [float(v) for v in filt["rw"]]
    zw = [float(v) for v in filt["zw"]]
    nn_ = [float(v) for v in filt["n"]]
    cut2 = float(filt["cutoff"]) ** 2

    def kernel(ptsb_ref, ptsa_ref, r_ref, dself_ref, wself_ref, bias_ref, out_ref):
        j = pl.program_id(1)
        nj = pl.num_programs(1)

        # init resident output accumulator with bias (bias only populates re, k==0 columns)
        @pl.when(j == 0)
        def _init():
            out_ref[...] = jnp.zeros(out_ref.shape, jnp.float32) + bias_ref[...]

        # pairwise cylindrical geometry: dr (in-plane distance), dz, theta = angle of dxy
        dx = ptsb_ref[:, 0:1] - ptsa_ref[0:1, :]            # (TB, TA)
        dy = ptsb_ref[:, 1:2] - ptsa_ref[1:2, :]
        dzv = ptsb_ref[:, 2:3] - ptsa_ref[2:3, :]
        dr2 = dx * dx + dy * dy
        nzm = dr2 > 0.0
        rinv = lax.rsqrt(jnp.where(nzm, dr2, 1.0))          # EUP rsqrt (no sqrt + divide)
        dr = dr2 * rinv
        c1 = jnp.where(nzm, dx * rinv, 1.0)                 # cos theta
        s1 = jnp.where(nzm, dy * rinv, 0.0)                 # sin theta

        # phase powers e^{i m theta}, m = 0..M, via Chebyshev recurrence (no atan2)
        cos_l = [jnp.ones_like(dr)]
        sin_l = [jnp.zeros_like(dr)]
        for _ in range(M):
            cp, sp = cos_l[-1], sin_l[-1]
            cos_l.append(cp * c1 - sp * s1)
            sin_l.append(sp * c1 + cp * s1)

        # Gaussian profiles (within cutoff); self/identity filter handled in the epilogue
        cutf = (dr2 + dzv * dzv) <= cut2
        G = []
        for fg in range(nf):
            g = nn_[fg] * jnp.exp(-(rw[fg] * (dr - rp[fg]) ** 2 + zw[fg] * (dzv - zp[fg]) ** 2))
            G.append(jnp.where(cutf, g, 0.0))

        # one wide GEMM per unique (filter, |m|, cos/sin) segment against precomputed RHS
        upd = jnp.zeros((TB, Ncol), jnp.float32)
        for s, (fg, am, trig) in enumerate(seg_list):
            t = cos_l[am] if trig == "c" else sin_l[am]
            lhs = (G[fg] * t).astype(mxu_dtype)
            upd = upd + jnp.dot(lhs, r_ref[s], preferred_element_type=jnp.float32)
        out_ref[...] += upd

        # epilogue: self/identity filter term (zero weights when point sets differ)
        @pl.when(j == nj - 1)
        def _fin():
            out_ref[...] += jnp.dot(dself_ref[...].astype(mxu_dtype), wself_ref[...],
                                    preferred_element_type=jnp.float32)

    return kernel


# ----------------------------------------- wrapper (glue) -----------------------------------------
def pconv3d_forward(data, point_stack, weights, bias, *, p, k, c, nr, nz, w, rho=300.0,
                    TB=128, TA=512, mxu_dtype=jnp.float32, vmem_limit_bytes=None):
    ap, bp = p
    ak, bk = k
    ac, bc = c
    same_set = (ap == bp)
    pts_a = jnp.asarray(point_stack[ap], jnp.float32)
    pts_b = jnp.asarray(point_stack[bp], jnp.float32)
    Na, Nb = pts_a.shape[0], pts_b.shape[0]

    KA, KB, KBr, M = 2 * ak + 1, 2 * bk + 1, bk + 1, ak + bk
    nf = nr * nz
    L = KA * 2 * ac
    Nout = 2 * KBr * bc
    Ncol = _round_up(Nout, 128)                              # lane-dense accumulator / output

    # tiling & zero padding (Na lane-aligned + tiled; Nb padded to the b tile)
    TB_eff = max(8, (min(TB, _round_up(Nb, 8)) // 8) * 8)
    Nb_pad = _round_up(Nb, TB_eff)
    Na_pad0 = _round_up(Na, 128)
    TA_eff = max(128, (min(TA, Na_pad0) // 128) * 128)
    Na_pad = _round_up(Na, TA_eff)

    # torch.view_as_real(data) / data[..., None]; expand to full spectrum, pack lanes (a_k, j, a_c)
    if jnp.iscomplexobj(data):
        d_re = jnp.real(data).astype(jnp.float32)            # (Na, ac, ak+1)
        d_im = jnp.imag(data).astype(jnp.float32)
    else:
        d_re = jnp.asarray(data, jnp.float32)
        d_im = jnp.zeros_like(d_re)
    pieces = []
    for ai in range(KA):
        akv = ai - ak
        idx = abs(akv)
        re = d_re[:, :, idx]
        im = d_im[:, :, idx]
        if akv < 0:
            im = -im
        pieces.append(jnp.stack([re, im], axis=1))            # (Na, 2, ac)
    dpack = jnp.stack(pieces, axis=1).reshape(Na, L)          # (Na, KA*2*ac)

    filt = make_filter_stack(nr, nz, w, ap, rho)
    seg_list = _segment_order(nf, M)
    Nseg = len(seg_list)

    # fuse weights: complex contraction + spectrum fold done once per call (identity w_trafo)
    W_np = np.asarray(weights).astype(np.float64).reshape(KB, ac, KA, 1 + nf, bc, 2)
    WBIG_np, WSELF_np = _build_fused_weights(W_np, ak=ak, bk=bk, ac=ac, bc=bc, nf=nf,
                                             seg_list=seg_list, same_set=same_set)
    WBIG = jnp.asarray(WBIG_np)                               # (Nseg, L, Nout)
    WSELF = jnp.asarray(WSELF_np)                             # (L, Nout)

    # R[seg, a, o] = sum_l dpack[a, l] * WBIG[seg, l, o]   (precomputed stage-1 RHS)
    dpack_a = jnp.pad(dpack, ((0, Na_pad - Na), (0, 0)))
    R = jnp.einsum("al,slo->sao", dpack_a, WBIG, precision=lax.Precision.HIGHEST)
    R = jnp.pad(R, ((0, 0), (0, 0), (0, Ncol - Nout))).astype(mxu_dtype)

    wself = jnp.pad(WSELF, ((0, 0), (0, Ncol - Nout))).astype(mxu_dtype)
    if same_set:
        dself = jnp.pad(dpack, ((0, Nb_pad - Na), (0, 0)))
    else:
        dself = jnp.zeros((Nb_pad, L), jnp.float32)
    dself = dself.astype(mxu_dtype)

    has_bias = bias is not None
    bias_row = jnp.zeros((1, Ncol), jnp.float32)
    if has_bias:
        bias_row = bias_row.at[0, 0:bc].set(jnp.asarray(bias, jnp.float32))

    pts_b_pad = jnp.pad(pts_b, ((0, Nb_pad - Nb), (0, 0)))
    pts_a_t = jnp.transpose(jnp.pad(pts_a, ((0, Na_pad - Na), (0, 0))), (1, 0))   # (3, Na_pad)

    kernel = make_pconv3d_kernel(M=M, nf=nf, filt=filt, seg_list=seg_list,
                                 TB=TB_eff, Ncol=Ncol, mxu_dtype=mxu_dtype)

    cp_kwargs = dict(dimension_semantics=("parallel", "arbitrary"))
    if vmem_limit_bytes is not None:
        cp_kwargs["vmem_limit_bytes"] = vmem_limit_bytes

    out_flat = pl.pallas_call(
        kernel,
        out_shape=jax.ShapeDtypeStruct((Nb_pad, Ncol), jnp.float32),
        grid=(Nb_pad // TB_eff, Na_pad // TA_eff),
        in_specs=[
            pl.BlockSpec((TB_eff, 3), lambda i, j: (i, 0)),               # pts_b   (b tile)
            pl.BlockSpec((3, TA_eff), lambda i, j: (0, j)),               # pts_a^T (a tile)
            pl.BlockSpec((Nseg, TA_eff, Ncol), lambda i, j: (0, j, 0)),   # fused RHS (a tile)
            pl.BlockSpec((TB_eff, L), lambda i, j: (i, 0)),               # data tile (self term)
            pl.BlockSpec((L, Ncol), lambda i, j: (0, 0)),                 # self-term weights
            pl.BlockSpec((1, Ncol), lambda i, j: (0, 0)),                 # bias row
        ],
        out_specs=pl.BlockSpec((TB_eff, Ncol), lambda i, j: (i, 0)),
        compiler_params=pltpu.CompilerParams(**cp_kwargs),
    )(pts_b_pad, pts_a_t, R, dself, wself, bias_row)

    # unpack lane-dense output -> (Nb, bc, bk+1) re/im, then fold to module's return type
    out = out_flat[:Nb, :Nout].reshape(Nb, 2, KBr, bc)
    out_re = jnp.transpose(out[:, 0], (0, 2, 1))
    out_im = jnp.transpose(out[:, 1], (0, 2, 1))
    if bk == 0:   # d_bj has length 1 -> real output (x[..., 0])
        result = out_re
    else:         # view_as_complex
        result = out_re + 1j * out_im
    return result, point_stack


# --------------------------------------------- main ---------------------------------------------
if __name__ == "__main__":
    key = jax.random.PRNGKey(0)
    ap, bp = 0, 0
    ak, bk = 1, 1
    ac, bc = 4, 4
    nr, nz, w = 2, 2, 0.5
    rho = 300.0
    Na = 64
    Ka = ak + 1  # real=True -> d_ak = arange(0, ak+1)

    k1, k2, k3, k4 = jax.random.split(key, 4)
    pts = jax.random.uniform(k1, (Na, 3), jnp.float32, 0.0, 2.0)
    point_stack = [pts]
    data = (jax.random.normal(k2, (Na, ac, Ka), jnp.float32)
            + 1j * jax.random.normal(k3, (Na, ac, Ka), jnp.float32)).astype(jnp.complex64)

    nf = nr * nz
    KB, KA, NFt = 2 * bk + 1, 2 * ak + 1, 1 + nf
    w_shape = (KB, ac, KA, NFt, bc, 2)                       # (b_k, a_c, a_k, w_f, b_c, j)
    std = float(np.sqrt(2.0 / (ac * KA * NFt)))              # nn.init.normal_(std=sqrt(2/prod(shape[1:4])))
    weights = std * jax.random.normal(k4, w_shape, jnp.float32)
    bias = jnp.zeros((bc,), jnp.float32)                     # module initializes bias to zeros

    out, _ = pconv3d_forward(data, point_stack, weights, bias,
                             p=(ap, bp), k=(ak, bk), c=(ac, bc),
                             nr=nr, nz=nz, w=w, rho=rho, TB=128, TA=512)
    jax.block_until_ready(out)
    assert out.shape == (Na, bc, bk + 1) and out.dtype == jnp.complex64
    print("KERNEL_OK")
</pallas_src>

<mosaic_0001>
module attributes {stable_mosaic.version = 11 : i64} {
  func.func @kernel(%arg0: i32, %arg1: i32, %arg2: memref<64x3xf32, #tpu.memory_space<vmem>>, %arg3: memref<3x128xf32, #tpu.memory_space<vmem>>, %arg4: memref<20x128x128xf32, #tpu.memory_space<vmem>>, %arg5: memref<64x24xf32, #tpu.memory_space<vmem>>, %arg6: memref<24x128xf32, #tpu.memory_space<vmem>>, %arg7: memref<1x128xf32, #tpu.memory_space<vmem>>, %arg8: memref<64x128xf32, #tpu.memory_space<vmem>>) attributes {dimension_semantics = [#tpu.dimension_semantics<parallel>, #tpu.dimension_semantics<arbitrary>], iteration_bounds = array<i64: 1, 1>, scalar_prefetch = 0 : i64, scratch_operands = 0 : i64, tpu.core_type = #tpu.core_type<tc>, window_params = [{transform_indices = @transform_0, window_bounds = array<i64: 64, 3>}, {transform_indices = @transform_1, window_bounds = array<i64: 3, 128>}, {transform_indices = @transform_2, window_bounds = array<i64: 20, 128, 128>}, {transform_indices = @transform_3, window_bounds = array<i64: 64, 24>}, {pipeline_mode = #tpu.pipeline_mode<synchronous>, transform_indices = @transform_4, window_bounds = array<i64: 24, 128>}, {pipeline_mode = #tpu.pipeline_mode<synchronous>, transform_indices = @transform_5, window_bounds = array<i64: 1, 128>}, {transform_indices = @transform_6, window_bounds = array<i64: 64, 128>}]} {
    %c0_i32 = arith.constant 0 : i32
    %0 = arith.cmpi eq, %arg1, %c0_i32 : i32
    %1 = arith.extui %0 : i1 to i32
    %c0_i32_0 = arith.constant 0 : i32
    %2 = arith.cmpi ne, %1, %c0_i32_0 : i32
    scf.if %2 {
      %cst_114 = arith.constant 0.000000e+00 : f32
      %230 = vector.broadcast %cst_114 : f32 to vector<64x128xf32>
      %c0_115 = arith.constant 0 : index
      %c0_116 = arith.constant 0 : index
      %231 = vector.load %arg7[%c0_115, %c0_116] : memref<1x128xf32, #tpu.memory_space<vmem>>, vector<1x128xf32>
      %232 = vector.broadcast %231 : vector<1x128xf32> to vector<64x128xf32>
      %233 = arith.addf %230, %232 : vector<64x128xf32>
      %c0_117 = arith.constant 0 : index
      %c0_118 = arith.constant 0 : index
      %234 = vector.load %arg8[%c0_117, %c0_118] : memref<64x128xf32, #tpu.memory_space<vmem>>, vector<64x128xf32>
      tpu.vector_store %arg8[%c0_117, %c0_118], %233 {strides = array<i32>} : memref<64x128xf32, #tpu.memory_space<vmem>>, vector<64x128xf32>,
    } else {
    }
    %c0 = arith.constant 0 : index
    %c0_1 = arith.constant 0 : index
    %3 = vector.load %arg2[%c0, %c0_1] : memref<64x3xf32, #tpu.memory_space<vmem>>, vector<64x1xf32>
    %c0_2 = arith.constant 0 : index
    %c0_3 = arith.constant 0 : index
    %4 = vector.load %arg3[%c0_2, %c0_3] : memref<3x128xf32, #tpu.memory_space<vmem>>, vector<1x128xf32>
    %5 = vector.broadcast %3 : vector<64x1xf32> to vector<64x128xf32>
    %6 = vector.broadcast %4 : vector<1x128xf32> to vector<64x128xf32>
    %7 = arith.subf %5, %6 : vector<64x128xf32>
    %c0_4 = arith.constant 0 : index
    %c1 = arith.constant 1 : index
    %8 = vector.load %arg2[%c0_4, %c1] : memref<64x3xf32, #tpu.memory_space<vmem>>, vector<64x1xf32>
    %c1_5 = arith.constant 1 : index
    %c0_6 = arith.constant 0 : index
    %9 = vector.load %arg3[%c1_5, %c0_6] : memref<3x128xf32, #tpu.memory_space<vmem>>, vector<1x128xf32>
    %10 = vector.broadcast %8 : vector<64x1xf32> to vector<64x128xf32>
    %11 = vector.broadcast %9 : vector<1x128xf32> to vector<64x128xf32>
    %12 = arith.subf %10, %11 : vector<64x128xf32>
    %c0_7 = arith.constant 0 : index
    %c2 = arith.constant 2 : index
    %13 = vector.load %arg2[%c0_7, %c2] : memref<64x3xf32, #tpu.memory_space<vmem>>, vector<64x1xf32>
    %c2_8 = arith.constant 2 : index
    %c0_9 = arith.constant 0 : index
    %14 = vector.load %arg3[%c2_8, %c0_9] : memref<3x128xf32, #tpu.memory_space<vmem>>, vector<1x128xf32>
    %15 = vector.broadcast %13 : vector<64x1xf32> to vector<64x128xf32>
    %16 = vector.broadcast %14 : vector<1x128xf32> to vector<64x128xf32>
    %17 = arith.subf %15, %16 : vector<64x128xf32>
    %18 = arith.mulf %7, %7 : vector<64x128xf32>
    %19 = arith.mulf %12, %12 : vector<64x128xf32>
    %20 = arith.addf %18, %19 : vector<64x128xf32>
    %cst = arith.constant 0.000000e+00 : f32
    %21 = vector.broadcast %cst : f32 to vector<64x128xf32>
    %22 = arith.cmpf ogt, %20, %21 : vector<64x128xf32>
    %cst_10 = arith.constant 1.000000e+00 : f32
    %23 = vector.broadcast %cst_10 : f32 to vector<64x128xf32>
    %24 = arith.select %22, %20, %23 : vector<64x128xi1>, vector<64x128xf32>
    %25 = math.rsqrt %24 : vector<64x128xf32>
    %26 = arith.mulf %20, %25 : vector<64x128xf32>
    %27 = arith.mulf %7, %25 : vector<64x128xf32>
    %cst_11 = arith.constant 1.000000e+00 : f32
    %28 = vector.broadcast %cst_11 : f32 to vector<64x128xf32>
    %29 = arith.select %22, %27, %28 : vector<64x128xi1>, vector<64x128xf32>
    %30 = arith.mulf %12, %25 : vector<64x128xf32>
    %cst_12 = arith.constant 0.000000e+00 : f32
    %31 = vector.broadcast %cst_12 : f32 to vector<64x128xf32>
    %32 = arith.select %22, %30, %31 : vector<64x128xi1>, vector<64x128xf32>
    %cst_13 = arith.constant 1.000000e+00 : f32
    %33 = vector.broadcast %cst_13 : f32 to vector<64x128xf32>
    %cst_14 = arith.constant 0.000000e+00 : f32
    %34 = vector.broadcast %cst_14 : f32 to vector<64x128xf32>
    %35 = arith.mulf %33, %29 : vector<64x128xf32>
    %36 = arith.mulf %34, %32 : vector<64x128xf32>
    %37 = arith.subf %35, %36 : vector<64x128xf32>
    %38 = arith.mulf %34, %29 : vector<64x128xf32>
    %39 = arith.mulf %33, %32 : vector<64x128xf32>
    %40 = arith.addf %38, %39 : vector<64x128xf32>
    %41 = arith.mulf %37, %29 : vector<64x128xf32>
    %42 = arith.mulf %40, %32 : vector<64x128xf32>
    %43 = arith.subf %41, %42 : vector<64x128xf32>
    %44 = arith.mulf %40, %29 : vector<64x128xf32>
    %45 = arith.mulf %37, %32 : vector<64x128xf32>
    %46 = arith.addf %44, %45 : vector<64x128xf32>
    %47 = arith.mulf %17, %17 : vector<64x128xf32>
    %48 = arith.addf %20, %47 : vector<64x128xf32>
    %cst_15 = arith.constant 5.562500e+00 : f32
    %49 = vector.broadcast %cst_15 : f32 to vector<64x128xf32>
    %50 = arith.cmpf ole, %48, %49 : vector<64x128xf32>
    %cst_16 = arith.constant 5.000000e-01 : f32
    %51 = vector.broadcast %cst_16 : f32 to vector<64x128xf32>
    %52 = arith.subf %26, %51 : vector<64x128xf32>
    %53 = arith.mulf %52, %52 : vector<64x128xf32>
    %cst_17 = arith.constant 11.0903549 : f32
    %54 = vector.broadcast %cst_17 : f32 to vector<64x128xf32>
    %55 = arith.mulf %54, %53 : vector<64x128xf32>
    %cst_18 = arith.constant -2.500000e-01 : f32
    %56 = vector.broadcast %cst_18 : f32 to vector<64x128xf32>
    %57 = arith.subf %17, %56 : vector<64x128xf32>
    %58 = arith.mulf %57, %57 : vector<64x128xf32>
    %cst_19 = arith.constant 11.0903549 : f32
    %59 = vector.broadcast %cst_19 : f32 to vector<64x128xf32>
    %60 = arith.mulf %59, %58 : vector<64x128xf32>
    %61 = arith.addf %55, %60 : vector<64x128xf32>
    %cst_20 = arith.constant 0.000000e+00 : f32
    %62 = vector.broadcast %cst_20 : f32 to vector<64x128xf32>
    %63 = arith.subf %62, %61 : vector<64x128xf32>
    %64 = math.exp %63 : vector<64x128xf32>
    %cst_21 = arith.constant 0.00360281975 : f32
    %65 = vector.broadcast %cst_21 : f32 to vector<64x128xf32>
    %66 = arith.mulf %65, %64 : vector<64x128xf32>
    %cst_22 = arith.constant 0.000000e+00 : f32
    %67 = vector.broadcast %cst_22 : f32 to vector<64x128xf32>
    %68 = arith.select %50, %66, %67 : vector<64x128xi1>, vector<64x128xf32>
    %cst_23 = arith.constant 5.000000e-01 : f32
    %69 = vector.broadcast %cst_23 : f32 to vector<64x128xf32>
    %70 = arith.subf %26, %69 : vector<64x128xf32>
    %71 = arith.mulf %70, %70 : vector<64x128xf32>
    %cst_24 = arith.constant 11.0903549 : f32
    %72 = vector.broadcast %cst_24 : f32 to vector<64x128xf32>
    %73 = arith.mulf %72, %71 : vector<64x128xf32>
    %cst_25 = arith.constant 2.500000e-01 : f32
    %74 = vector.broadcast %cst_25 : f32 to vector<64x128xf32>
    %75 = arith.subf %17, %74 : vector<64x128xf32>
    %76 = arith.mulf %75, %75 : vector<64x128xf32>
    %cst_26 = arith.constant 11.0903549 : f32
    %77 = vector.broadcast %cst_26 : f32 to vector<64x128xf32>
    %78 = arith.mulf %77, %76 : vector<64x128xf32>
    %79 = arith.addf %73, %78 : vector<64x128xf32>
    %cst_27 = arith.constant 0.000000e+00 : f32
    %80 = vector.broadcast %cst_27 : f32 to vector<64x128xf32>
    %81 = arith.subf %80, %79 : vector<64x128xf32>
    %82 = math.exp %81 : vector<64x128xf32>
    %cst_28 = arith.constant 0.00360281975 : f32
    %83 = vector.broadcast %cst_28 : f32 to vector<64x128xf32>
    %84 = arith.mulf %83, %82 : vector<64x128xf32>
    %cst_29 = arith.constant 0.000000e+00 : f32
    %85 = vector.broadcast %cst_29 : f32 to vector<64x128xf32>
    %86 = arith.select %50, %84, %85 : vector<64x128xi1>, vector<64x128xf32>
    %cst_30 = arith.constant 1.000000e+00 : f32
    %87 = vector.broadcast %cst_30 : f32 to vector<64x128xf32>
    %88 = arith.subf %26, %87 : vector<64x128xf32>
    %89 = arith.mulf %88, %88 : vector<64x128xf32>
    %cst_31 = arith.constant 11.0903549 : f32
    %90 = vector.broadcast %cst_31 : f32 to vector<64x128xf32>
    %91 = arith.mulf %90, %89 : vector<64x128xf32>
    %cst_32 = arith.constant -2.500000e-01 : f32
    %92 = vector.broadcast %cst_32 : f32 to vector<64x128xf32>
    %93 = arith.subf %17, %92 : vector<64x128xf32>
    %94 = arith.mulf %93, %93 : vector<64x128xf32>
    %cst_33 = arith.constant 11.0903549 : f32
    %95 = vector.broadcast %cst_33 : f32 to vector<64x128xf32>
    %96 = arith.mulf %95, %94 : vector<64x128xf32>
    %97 = arith.addf %91, %96 : vector<64x128xf32>
    %cst_34 = arith.constant 0.000000e+00 : f32
    %98 = vector.broadcast %cst_34 : f32 to vector<64x128xf32>
    %99 = arith.subf %98, %97 : vector<64x128xf32>
    %100 = math.exp %99 : vector<64x128xf32>
    %cst_35 = arith.constant 0.00226963428 : f32
    %101 = vector.broadcast %cst_35 : f32 to vector<64x128xf32>
    %102 = arith.mulf %101, %100 : vector<64x128xf32>
    %cst_36 = arith.constant 0.000000e+00 : f32
    %103 = vector.broadcast %cst_36 : f32 to vector<64x128xf32>
    %104 = arith.select %50, %102, %103 : vector<64x128xi1>, vector<64x128xf32>
    %cst_37 = arith.constant 1.000000e+00 : f32
    %105 = vector.broadcast %cst_37 : f32 to vector<64x128xf32>
    %106 = arith.subf %26, %105 : vector<64x128xf32>
    %107 = arith.mulf %106, %106 : vector<64x128xf32>
    %cst_38 = arith.constant 11.0903549 : f32
    %108 = vector.broadcast %cst_38 : f32 to vector<64x128xf32>
    %109 = arith.mulf %108, %107 : vector<64x128xf32>
    %cst_39 = arith.constant 2.500000e-01 : f32
    %110 = vector.broadcast %cst_39 : f32 to vector<64x128xf32>
    %111 = arith.subf %17, %110 : vector<64x128xf32>
    %112 = arith.mulf %111, %111 : vector<64x128xf32>
    %cst_40 = arith.constant 11.0903549 : f32
    %113 = vector.broadcast %cst_40 : f32 to vector<64x128xf32>
    %114 = arith.mulf %113, %112 : vector<64x128xf32>
    %115 = arith.addf %109, %114 : vector<64x128xf32>
    %cst_41 = arith.constant 0.000000e+00 : f32
    %116 = vector.broadcast %cst_41 : f32 to vector<64x128xf32>
    %117 = arith.subf %116, %115 : vector<64x128xf32>
    %118 = math.exp %117 : vector<64x128xf32>
    %cst_42 = arith.constant 0.00226963428 : f32
    %119 = vector.broadcast %cst_42 : f32 to vector<64x128xf32>
    %120 = arith.mulf %119, %118 : vector<64x128xf32>
    %cst_43 = arith.constant 0.000000e+00 : f32
    %121 = vector.broadcast %cst_43 : f32 to vector<64x128xf32>
    %122 = arith.select %50, %120, %121 : vector<64x128xi1>, vector<64x128xf32>
    %cst_44 = arith.constant 0.000000e+00 : f32
    %123 = vector.broadcast %cst_44 : f32 to vector<64x128xf32>
    %124 = arith.mulf %68, %33 : vector<64x128xf32>
    %c0_45 = arith.constant 0 : index
    %c0_46 = arith.constant 0 : index
    %c0_47 = arith.constant 0 : index
    %125 = vector.load %arg4[%c0_45, %c0_46, %c0_47] : memref<20x128x128xf32, #tpu.memory_space<vmem>>, vector<1x128x128xf32>
    %126 = vector.shape_cast %125 : vector<1x128x128xf32> to vector<128x128xf32>
    %cst_48 = arith.constant dense<0.000000e+00> : vector<64x128xf32>
    %127 = tpu.matmul %124, %126, %cst_48 {dimension_numbers = #tpu.dot_dimension_numbers<[1], [0], [0], [1], [0, 0, 1, 1], [], []>} : vector<64x128xf32>, vector<128x128xf32>, vector<64x128xf32> -> vector<64x128xf32>
    %128 = arith.addf %123, %127 : vector<64x128xf32>
    %129 = arith.mulf %68, %37 : vector<64x128xf32>
    %c1_49 = arith.constant 1 : index
    %c0_50 = arith.constant 0 : index
    %c0_51 = arith.constant 0 : index
    %130 = vector.load %arg4[%c1_49, %c0_50, %c0_51] : memref<20x128x128xf32, #tpu.memory_space<vmem>>, vector<1x128x128xf32>
    %131 = vector.shape_cast %130 : vector<1x128x128xf32> to vector<128x128xf32>
    %cst_52 = arith.constant dense<0.000000e+00> : vector<64x128xf32>
    %132 = tpu.matmul %129, %131, %cst_52 {dimension_numbers = #tpu.dot_dimension_numbers<[1], [0], [0], [1], [0, 0, 1, 1], [], []>} : vector<64x128xf32>, vector<128x128xf32>, vector<64x128xf32> -> vector<64x128xf32>
    %133 = arith.addf %128, %132 : vector<64x128xf32>
    %134 = arith.mulf %68, %43 : vector<64x128xf32>
    %c2_53 = arith.constant 2 : index
    %c0_54 = arith.constant 0 : index
    %c0_55 = arith.constant 0 : index
    %135 = vector.load %arg4[%c2_53, %c0_54, %c0_55] : memref<20x128x128xf32, #tpu.memory_space<vmem>>, vector<1x128x128xf32>
    %136 = vector.shape_cast %135 : vector<1x128x128xf32> to vector<128x128xf32>
    %cst_56 = arith.constant dense<0.000000e+00> : vector<64x128xf32>
    %137 = tpu.matmul %134, %136, %cst_56 {dimension_numbers = #tpu.dot_dimension_numbers<[1], [0], [0], [1], [0, 0, 1, 1], [], []>} : vector<64x128xf32>, vector<128x128xf32>, vector<64x128xf32> -> vector<64x128xf32>
    %138 = arith.addf %133, %137 : vector<64x128xf32>
    %139 = arith.mulf %68, %40 : vector<64x128xf32>
    %c3 = arith.constant 3 : index
    %c0_57 = arith.constant 0 : index
    %c0_58 = arith.constant 0 : index
    %140 = vector.load %arg4[%c3, %c0_57, %c0_58] : memref<20x128x128xf32, #tpu.memory_space<vmem>>, vector<1x128x128xf32>
    %141 = vector.shape_cast %140 : vector<1x128x128xf32> to vector<128x128xf32>
    %cst_59 = arith.constant dense<0.000000e+00> : vector<64x128xf32>
    %142 = tpu.matmul %139, %141, %cst_59 {dimension_numbers = #tpu.dot_dimension_numbers<[1], [0], [0], [1], [0, 0, 1, 1], [], []>} : vector<64x128xf32>, vector<128x128xf32>, vector<64x128xf32> -> vector<64x128xf32>
    %143 = arith.addf %138, %142 : vector<64x128xf32>
    %144 = arith.mulf %68, %46 : vector<64x128xf32>
    %c4 = arith.constant 4 : index
    %c0_60 = arith.constant 0 : index
    %c0_61 = arith.constant 0 : index
    %145 = vector.load %arg4[%c4, %c0_60, %c0_61] : memref<20x128x128xf32, #tpu.memory_space<vmem>>, vector<1x128x128xf32>
    %146 = vector.shape_cast %145 : vector<1x128x128xf32> to vector<128x128xf32>
    %cst_62 = arith.constant dense<0.000000e+00> : vector<64x128xf32>
    %147 = tpu.matmul %144, %146, %cst_62 {dimension_numbers = #tpu.dot_dimension_numbers<[1], [0], [0], [1], [0, 0, 1, 1], [], []>} : vector<64x128xf32>, vector<128x128xf32>, vector<64x128xf32> -> vector<64x128xf32>
    %148 = arith.addf %143, %147 : vector<64x128xf32>
    %149 = arith.mulf %86, %33 : vector<64x128xf32>
    %c5 = arith.constant 5 : index
    %c0_63 = arith.constant 0 : index
    %c0_64 = arith.constant 0 : index
    %150 = vector.load %arg4[%c5, %c0_63, %c0_64] : memref<20x128x128xf32, #tpu.memory_space<vmem>>, vector<1x128x128xf32>
    %151 = vector.shape_cast %150 : vector<1x128x128xf32> to vector<128x128xf32>
    %cst_65 = arith.constant dense<0.000000e+00> : vector<64x128xf32>
    %152 = tpu.matmul %149, %151, %cst_65 {dimension_numbers = #tpu.dot_dimension_numbers<[1], [0], [0], [1], [0, 0, 1, 1], [], []>} : vector<64x128xf32>, vector<128x128xf32>, vector<64x128xf32> -> vector<64x128xf32>
    %153 = arith.addf %148, %152 : vector<64x128xf32>
    %154 = arith.mulf %86, %37 : vector<64x128xf32>
    %c6 = arith.constant 6 : index
    %c0_66 = arith.constant 0 : index
    %c0_67 = arith.constant 0 : index
    %155 = vector.load %arg4[%c6, %c0_66, %c0_67] : memref<20x128x128xf32, #tpu.memory_space<vmem>>, vector<1x128x128xf32>
    %156 = vector.shape_cast %155 : vector<1x128x128xf32> to vector<128x128xf32>
    %cst_68 = arith.constant dense<0.000000e+00> : vector<64x128xf32>
    %157 = tpu.matmul %154, %156, %cst_68 {dimension_numbers = #tpu.dot_dimension_numbers<[1], [0], [0], [1], [0, 0, 1, 1], [], []>} : vector<64x128xf32>, vector<128x128xf32>, vector<64x128xf32> -> vector<64x128xf32>
    %158 = arith.addf %153, %157 : vector<64x128xf32>
    %159 = arith.mulf %86, %43 : vector<64x128xf32>
    %c7 = arith.constant 7 : index
    %c0_69 = arith.constant 0 : index
    %c0_70 = arith.constant 0 : index
    %160 = vector.load %arg4[%c7, %c0_69, %c0_70] : memref<20x128x128xf32, #tpu.memory_space<vmem>>, vector<1x128x128xf32>
    %161 = vector.shape_cast %160 : vector<1x128x128xf32> to vector<128x128xf32>
    %cst_71 = arith.constant dense<0.000000e+00> : vector<64x128xf32>
    %162 = tpu.matmul %159, %161, %cst_71 {dimension_numbers = #tpu.dot_dimension_numbers<[1], [0], [0], [1], [0, 0, 1, 1], [], []>} : vector<64x128xf32>, vector<128x128xf32>, vector<64x128xf32> -> vector<64x128xf32>
    %163 = arith.addf %158, %162 : vector<64x128xf32>
    %164 = arith.mulf %86, %40 : vector<64x128xf32>
    %c8 = arith.constant 8 : index
    %c0_72 = arith.constant 0 : index
    %c0_73 = arith.constant 0 : index
    %165 = vector.load %arg4[%c8, %c0_72, %c0_73] : memref<20x128x128xf32, #tpu.memory_space<vmem>>, vector<1x128x128xf32>
    %166 = vector.shape_cast %165 : vector<1x128x128xf32> to vector<128x128xf32>
    %cst_74 = arith.constant dense<0.000000e+00> : vector<64x128xf32>
    %167 = tpu.matmul %164, %166, %cst_74 {dimension_numbers = #tpu.dot_dimension_numbers<[1], [0], [0], [1], [0, 0, 1, 1], [], []>} : vector<64x128xf32>, vector<128x128xf32>, vector<64x128xf32> -> vector<64x128xf32>
    %168 = arith.addf %163, %167 : vector<64x128xf32>
    %169 = arith.mulf %86, %46 : vector<64x128xf32>
    %c9 = arith.constant 9 : index
    %c0_75 = arith.constant 0 : index
    %c0_76 = arith.constant 0 : index
    %170 = vector.load %arg4[%c9, %c0_75, %c0_76] : memref<20x128x128xf32, #tpu.memory_space<vmem>>, vector<1x128x128xf32>
    %171 = vector.shape_cast %170 : vector<1x128x128xf32> to vector<128x128xf32>
    %cst_77 = arith.constant dense<0.000000e+00> : vector<64x128xf32>
    %172 = tpu.matmul %169, %171, %cst_77 {dimension_numbers = #tpu.dot_dimension_numbers<[1], [0], [0], [1], [0, 0, 1, 1], [], []>} : vector<64x128xf32>, vector<128x128xf32>, vector<64x128xf32> -> vector<64x128xf32>
    %173 = arith.addf %168, %172 : vector<64x128xf32>
    %174 = arith.mulf %104, %33 : vector<64x128xf32>
    %c10 = arith.constant 10 : index
    %c0_78 = arith.constant 0 : index
    %c0_79 = arith.constant 0 : index
    %175 = vector.load %arg4[%c10, %c0_78, %c0_79] : memref<20x128x128xf32, #tpu.memory_space<vmem>>, vector<1x128x128xf32>
    %176 = vector.shape_cast %175 : vector<1x128x128xf32> to vector<128x128xf32>
    %cst_80 = arith.constant dense<0.000000e+00> : vector<64x128xf32>
    %177 = tpu.matmul %174, %176, %cst_80 {dimension_numbers = #tpu.dot_dimension_numbers<[1], [0], [0], [1], [0, 0, 1, 1], [], []>} : vector<64x128xf32>, vector<128x128xf32>, vector<64x128xf32> -> vector<64x128xf32>
    %178 = arith.addf %173, %177 : vector<64x128xf32>
    %179 = arith.mulf %104, %37 : vector<64x128xf32>
    %c11 = arith.constant 11 : index
    %c0_81 = arith.constant 0 : index
    %c0_82 = arith.constant 0 : index
    %180 = vector.load %arg4[%c11, %c0_81, %c0_82] : memref<20x128x128xf32, #tpu.memory_space<vmem>>, vector<1x128x128xf32>
    %181 = vector.shape_cast %180 : vector<1x128x128xf32> to vector<128x128xf32>
    %cst_83 = arith.constant dense<0.000000e+00> : vector<64x128xf32>
    %182 = tpu.matmul %179, %181, %cst_83 {dimension_numbers = #tpu.dot_dimension_numbers<[1], [0], [0], [1], [0, 0, 1, 1], [], []>} : vector<64x128xf32>, vector<128x128xf32>, vector<64x128xf32> -> vector<64x128xf32>
    %183 = arith.addf %178, %182 : vector<64x128xf32>
    %184 = arith.mulf %104, %43 : vector<64x128xf32>
    %c12 = arith.constant 12 : index
    %c0_84 = arith.constant 0 : index
    %c0_85 = arith.constant 0 : index
    %185 = vector.load %arg4[%c12, %c0_84, %c0_85] : memref<20x128x128xf32, #tpu.memory_space<vmem>>, vector<1x128x128xf32>
    %186 = vector.shape_cast %185 : vector<1x128x128xf32> to vector<128x128xf32>
    %cst_86 = arith.constant dense<0.000000e+00> : vector<64x128xf32>
    %187 = tpu.matmul %184, %186, %cst_86 {dimension_numbers = #tpu.dot_dimension_numbers<[1], [0], [0], [1], [0, 0, 1, 1], [], []>} : vector<64x128xf32>, vector<128x128xf32>, vector<64x128xf32> -> vector<64x128xf32>
    %188 = arith.addf %183, %187 : vector<64x128xf32>
    %189 = arith.mulf %104, %40 : vector<64x128xf32>
    %c13 = arith.constant 13 : index
    %c0_87 = arith.constant 0 : index
    %c0_88 = arith.constant 0 : index
    %190 = vector.load %arg4[%c13, %c0_87, %c0_88] : memref<20x128x128xf32, #tpu.memory_space<vmem>>, vector<1x128x128xf32>
    %191 = vector.shape_cast %190 : vector<1x128x128xf32> to vector<128x128xf32>
    %cst_89 = arith.constant dense<0.000000e+00> : vector<64x128xf32>
    %192 = tpu.matmul %189, %191, %cst_89 {dimension_numbers = #tpu.dot_dimension_numbers<[1], [0], [0], [1], [0, 0, 1, 1], [], []>} : vector<64x128xf32>, vector<128x128xf32>, vector<64x128xf32> -> vector<64x128xf32>
    %193 = arith.addf %188, %192 : vector<64x128xf32>
    %194 = arith.mulf %104, %46 : vector<64x128xf32>
    %c14 = arith.constant 14 : index
    %c0_90 = arith.constant 0 : index
    %c0_91 = arith.constant 0 : index
    %195 = vector.load %arg4[%c14, %c0_90, %c0_91] : memref<20x128x128xf32, #tpu.memory_space<vmem>>, vector<1x128x128xf32>
    %196 = vector.shape_cast %195 : vector<1x128x128xf32> to vector<128x128xf32>
    %cst_92 = arith.constant dense<0.000000e+00> : vector<64x128xf32>
    %197 = tpu.matmul %194, %196, %cst_92 {dimension_numbers = #tpu.dot_dimension_numbers<[1], [0], [0], [1], [0, 0, 1, 1], [], []>} : vector<64x128xf32>, vector<128x128xf32>, vector<64x128xf32> -> vector<64x128xf32>
    %198 = arith.addf %193, %197 : vector<64x128xf32>
    %199 = arith.mulf %122, %33 : vector<64x128xf32>
    %c15 = arith.constant 15 : index
    %c0_93 = arith.constant 0 : index
    %c0_94 = arith.constant 0 : index
    %200 = vector.load %arg4[%c15, %c0_93, %c0_94] : memref<20x128x128xf32, #tpu.memory_space<vmem>>, vector<1x128x128xf32>
    %201 = vector.shape_cast %200 : vector<1x128x128xf32> to vector<128x128xf32>
    %cst_95 = arith.constant dense<0.000000e+00> : vector<64x128xf32>
    %202 = tpu.matmul %199, %201, %cst_95 {dimension_numbers = #tpu.dot_dimension_numbers<[1], [0], [0], [1], [0, 0, 1, 1], [], []>} : vector<64x128xf32>, vector<128x128xf32>, vector<64x128xf32> -> vector<64x128xf32>
    %203 = arith.addf %198, %202 : vector<64x128xf32>
    %204 = arith.mulf %122, %37 : vector<64x128xf32>
    %c16 = arith.constant 16 : index
    %c0_96 = arith.constant 0 : index
    %c0_97 = arith.constant 0 : index
    %205 = vector.load %arg4[%c16, %c0_96, %c0_97] : memref<20x128x128xf32, #tpu.memory_space<vmem>>, vector<1x128x128xf32>
    %206 = vector.shape_cast %205 : vector<1x128x128xf32> to vector<128x128xf32>
    %cst_98 = arith.constant dense<0.000000e+00> : vector<64x128xf32>
    %207 = tpu.matmul %204, %206, %cst_98 {dimension_numbers = #tpu.dot_dimension_numbers<[1], [0], [0], [1], [0, 0, 1, 1], [], []>} : vector<64x128xf32>, vector<128x128xf32>, vector<64x128xf32> -> vector<64x128xf32>
    %208 = arith.addf %203, %207 : vector<64x128xf32>
    %209 = arith.mulf %122, %43 : vector<64x128xf32>
    %c17 = arith.constant 17 : index
    %c0_99 = arith.constant 0 : index
    %c0_100 = arith.constant 0 : index
    %210 = vector.load %arg4[%c17, %c0_99, %c0_100] : memref<20x128x128xf32, #tpu.memory_space<vmem>>, vector<1x128x128xf32>
    %211 = vector.shape_cast %210 : vector<1x128x128xf32> to vector<128x128xf32>
    %cst_101 = arith.constant dense<0.000000e+00> : vector<64x128xf32>
    %212 = tpu.matmul %209, %211, %cst_101 {dimension_numbers = #tpu.dot_dimension_numbers<[1], [0], [0], [1], [0, 0, 1, 1], [], []>} : vector<64x128xf32>, vector<128x128xf32>, vector<64x128xf32> -> vector<64x128xf32>
    %213 = arith.addf %208, %212 : vector<64x128xf32>
    %214 = arith.mulf %122, %40 : vector<64x128xf32>
    %c18 = arith.constant 18 : index
    %c0_102 = arith.constant 0 : index
    %c0_103 = arith.constant 0 : index
    %215 = vector.load %arg4[%c18, %c0_102, %c0_103] : memref<20x128x128xf32, #tpu.memory_space<vmem>>, vector<1x128x128xf32>
    %216 = vector.shape_cast %215 : vector<1x128x128xf32> to vector<128x128xf32>
    %cst_104 = arith.constant dense<0.000000e+00> : vector<64x128xf32>
    %217 = tpu.matmul %214, %216, %cst_104 {dimension_numbers = #tpu.dot_dimension_numbers<[1], [0], [0], [1], [0, 0, 1, 1], [], []>} : vector<64x128xf32>, vector<128x128xf32>, vector<64x128xf32> -> vector<64x128xf32>
    %218 = arith.addf %213, %217 : vector<64x128xf32>
    %219 = arith.mulf %122, %46 : vector<64x128xf32>
    %c19 = arith.constant 19 : index
    %c0_105 = arith.constant 0 : index
    %c0_106 = arith.constant 0 : index
    %220 = vector.load %arg4[%c19, %c0_105, %c0_106] : memref<20x128x128xf32, #tpu.memory_space<vmem>>, vector<1x128x128xf32>
    %221 = vector.shape_cast %220 : vector<1x128x128xf32> to vector<128x128xf32>
    %cst_107 = arith.constant dense<0.000000e+00> : vector<64x128xf32>
    %222 = tpu.matmul %219, %221, %cst_107 {dimension_numbers = #tpu.dot_dimension_numbers<[1], [0], [0], [1], [0, 0, 1, 1], [], []>} : vector<64x128xf32>, vector<128x128xf32>, vector<64x128xf32> -> vector<64x128xf32>
    %223 = arith.addf %218, %222 : vector<64x128xf32>
    %c0_108 = arith.constant 0 : index
    %c0_109 = arith.constant 0 : index
    %224 = vector.load %arg8[%c0_108, %c0_109] : memref<64x128xf32, #tpu.memory_space<vmem>>, vector<64x128xf32>
    %225 = arith.addf %224, %223 : vector<64x128xf32>
    %c0_110 = arith.constant 0 : index
    %c0_111 = arith.constant 0 : index
    %226 = vector.load %arg8[%c0_110, %c0_111] : memref<64x128xf32, #tpu.memory_space<vmem>>, vector<64x128xf32>
    tpu.vector_store %arg8[%c0_110, %c0_111], %225 {strides = array<i32>} : memref<64x128xf32, #tpu.memory_space<vmem>>, vector<64x128xf32>,
    %c0_i32_112 = arith.constant 0 : i32
    %227 = arith.cmpi eq, %arg1, %c0_i32_112 : i32
    %228 = arith.extui %227 : i1 to i32
    %c0_i32_113 = arith.constant 0 : i32
    %229 = arith.cmpi ne, %228, %c0_i32_113 : i32
    scf.if %229 {
      %c0_114 = arith.constant 0 : index
      %c0_115 = arith.constant 0 : index
      %230 = vector.load %arg8[%c0_114, %c0_115] : memref<64x128xf32, #tpu.memory_space<vmem>>, vector<64x128xf32>
      %c0_116 = arith.constant 0 : index
      %c0_117 = arith.constant 0 : index
      %231 = vector.load %arg5[%c0_116, %c0_117] : memref<64x24xf32, #tpu.memory_space<vmem>>, vector<64x24xf32>
      %c0_118 = arith.constant 0 : index
      %c0_119 = arith.constant 0 : index
      %232 = vector.load %arg6[%c0_118, %c0_119] : memref<24x128xf32, #tpu.memory_space<vmem>>, vector<24x128xf32>
      %cst_120 = arith.constant dense<0.000000e+00> : vector<64x128xf32>
      %233 = tpu.matmul %231, %232, %cst_120 {dimension_numbers = #tpu.dot_dimension_numbers<[1], [0], [0], [1], [0, 0, 1, 1], [], []>} : vector<64x24xf32>, vector<24x128xf32>, vector<64x128xf32> -> vector<64x128xf32>
      %234 = arith.addf %230, %233 : vector<64x128xf32>
      %c0_121 = arith.constant 0 : index
      %c0_122 = arith.constant 0 : index
      %235 = vector.load %arg8[%c0_121, %c0_122] : memref<64x128xf32, #tpu.memory_space<vmem>>, vector<64x128xf32>
      tpu.vector_store %arg8[%c0_121, %c0_122], %234 {strides = array<i32>} : memref<64x128xf32, #tpu.memory_space<vmem>>, vector<64x128xf32>,
    } else {
    }
    return
  }
  func.func @transform_0(%arg0: i32, %arg1: i32) -> (i32, i32) {
    %c0_i32 = arith.constant 0 : i32
    %c0_i32_0 = arith.constant 0 : i32
    return %arg0, %c0_i32 : i32, i32
  }
  func.func @transform_1(%arg0: i32, %arg1: i32) -> (i32, i32) {
    %c0_i32 = arith.constant 0 : i32
    %c0_i32_0 = arith.constant 0 : i32
    return %c0_i32, %arg1 : i32, i32
  }
  func.func @transform_2(%arg0: i32, %arg1: i32) -> (i32, i32, i32) {
    %c0_i32 = arith.constant 0 : i32
    %c0_i32_0 = arith.constant 0 : i32
    %c0_i32_1 = arith.constant 0 : i32
    return %c0_i32, %arg1, %c0_i32_0 : i32, i32, i32
  }
  func.func @transform_3(%arg0: i32, %arg1: i32) -> (i32, i32) {
    %c0_i32 = arith.constant 0 : i32
    %c0_i32_0 = arith.constant 0 : i32
    return %arg0, %c0_i32 : i32, i32
  }
  func.func @transform_4(%arg0: i32, %arg1: i32) -> (i32, i32) {
    %c0_i32 = arith.constant 0 : i32
    %c0_i32_0 = arith.constant 0 : i32
    %c0_i32_1 = arith.constant 0 : i32
    return %c0_i32, %c0_i32_0 : i32, i32
  }
  func.func @transform_5(%arg0: i32, %arg1: i32) -> (i32, i32) {
    %c0_i32 = arith.constant 0 : i32
    %c0_i32_0 = arith.constant 0 : i32
    %c0_i32_1 = arith.constant 0 : i32
    return %c0_i32, %c0_i32_0 : i32, i32
  }
  func.func @transform_6(%arg0: i32, %arg1: i32) -> (i32, i32) {
    %c0_i32 = arith.constant 0 : i32
    %c0_i32_0 = arith.constant 0 : i32
    return %arg0, %c0_i32 : i32, i32
  }
}

</mosaic_0001>

<bundles_post_ra>
// kernel: tpu_custom_call.1
= control target key start
LH: loop header
LB: loop body
LE: loop exit
PB: predicated region body
PF: predicated region fallthrough
CT: control target
= control target key end

     0   :  { %11 = vsyncpa [#allocation3], 0  ;;  %s4614_s0 = inlined_call_operand.vmem [shape: f32[64,3], index: 0, kind: input, shape index: {}]   ;;  %s4615_s1 = inlined_call_operand.hbm [shape: f32[3,128], index: 1, kind: input, shape index: {}]   ;;  %s4616_s2 = inlined_call_operand.hbm [shape: f32[20,128,128], index: 2, kind: input, shape index: {}]   ;;  %s4617_s3 = inlined_call_operand.vmem [shape: f32[64,24], index: 3, kind: input, shape index: {}]   ;;  %s4618_s4 = inlined_call_operand.hbm [shape: f32[24,128], index: 4, kind: input, shape index: {}]   ;;  %s4619_s5 = inlined_call_operand.hbm [shape: f32[1,128], index: 5, kind: input, shape index: {}]   ;;  %s4620_s6 = inlined_call_operand.hbm [shape: f32[64,128], index: 6, kind: output, shape index: {}]  }
   0x1   :  { %12 = vsyncpa [#allocation6], 0 }
   0x2   :  { %13 = vsyncpa [#allocation9], 0  ;;  %s32_s23 = sshll.u32 %s4616_s2, 4  ;;  %s33_s23 = int_to_ptr.hbm [resolvable:$true] %s32_s23 }
   0x3   :  { %14 = vsyncpa [#allocation4], 0  ;;  %s2705_s24 = smov [#allocation5]   ;;  %s22_s28 = sshll.u32 %s4615_s1, 4  ;;  %s23_s28 = int_to_ptr.hbm [resolvable:$true] %s22_s28 }
   0x4   :  { %s34_s25 = sshll.u32 %s2705_s24, 4  ;;  %s2706_s29 = smov 128   ;;  %s35_s25 = int_to_ptr.vmem [resolvable:$true] %s34_s25 }
   0x5   :  { %s2707_s30 = smov 8   ;;  %s2708_s7 = smov [#allocation2]  }
   0x6   :  { %40 = dma.hbm_to_vmem [thread:$0]  %s33_s23, 40960, %s35_s25, [#allocation6], %s2706_s29, %s2706_s29, %s2707_s30  }
   0x7   :  { %s24_s8 = sshll.u32 %s2708_s7, 4  ;;  %s47_s10 = sshll.u32 %s4618_s4, 4  ;;  %s25_s8 = int_to_ptr.vmem [resolvable:$true] %s24_s8  ;;  %s48_s10 = int_to_ptr.hbm [resolvable:$true] %s47_s10 }
   0x8   :  { %27 = dma.hbm_to_vmem [thread:$0]  %s23_s28, 64, %s25_s8, [#allocation3]  }
   0x9   :  { %s61_s1 = sshll.u32 %s4619_s5, 4  ;;  %s2709_s13 = smov [#allocation7]   ;;  %s62_s1 = int_to_ptr.hbm [resolvable:$true] %s61_s1 }
   0xa   :  { %s49_s14 = sshll.u32 %s2709_s13, 4  ;;  %s2710_s15 = smov [#allocation8]   ;;  %s50_s14 = int_to_ptr.vmem [resolvable:$true] %s49_s14 }
   0xb   :  { %55 = dma.hbm_to_vmem [thread:$0]  %s48_s10, 384, %s50_s14, [#allocation6], %s2706_s29, %s2706_s29, %s2707_s30  }
   0xc   :  { %s63_s16 = sshll.u32 %s2710_s15, 4  ;;  %s64_s16 = int_to_ptr.vmem [resolvable:$true] %s63_s16 }
   0xd   :  { %66 = dma.hbm_to_vmem [thread:$0]  %s62_s1, 16, %s64_s16, [#allocation9]  }
   0xe   :  { %2697 = dma.done.wait [#allocation3], 64  }
   0xf   :  { %2698 = vsyncadd [#allocation3], 4294967232 }
  0x10   :  { %2699 = dma.done.wait [#allocation6], 41344  }
  0x11   :  { %2700 = vsyncadd [#allocation6], 4294925952 }
  0x12   :  { %2701 = dma.done.wait [#allocation9], 16  }
  0x13   :  { %2702 = vsyncadd [#allocation9], 4294967280  ;;  %v2711_v0 = vmov 0   ;;  %v106_v1 = vld [vmem:[%s4614_s0 + $0x30] sm:$0xff]  ;;  %v105_v2 = vld [vmem:[%s4614_s0 + $0x28] sm:$0xff]  ;;  %v2712_v4 = vmov 1  }
  0x14   :  { %2479 = vset.pattern.permute.xlu2 %v2711_v0  ;;  %2477 = vset.pattern.permute.xlu1 %v2711_v0  ;;  %v104_v3 = vld [vmem:[%s4614_s0 + $0x20] sm:$0xff]  ;;  %v107_v5 = vld [vmem:[%s4614_s0 + $0x38] sm:$0xff]  ;;  %v2713_v7 = vmov 2   ;;  %v101_v8 = vld [vmem:[%s4614_s0 + $0x8] sm:$0xff]  ;;  %s2359_s23 = sshll.u32 %s4620_s6, 4  ;;  %s2360_s23 = int_to_ptr.hbm [resolvable:$true] %s2359_s23 }
  0x15   :  { %2475 = vset.pattern.permute.xlu0 %v2711_v0  ;;  %141 = vperm.xlu2 %2479, %v106_v1   ;;  %v100_v6 = vld [vmem:[%s4614_s0] sm:$0xff]  ;;  %v103_v9 = vld [vmem:[%s4614_s0 + $0x18] sm:$0xff]  ;;  %v102_v10 = vld [vmem:[%s4614_s0 + $0x10] sm:$0xff] }
  0x16   :  { %136 = vperm.xlu1 %2477, %v105_v2   ;;  %131 = vperm.xlu0 %2475, %v104_v3   ;;  %v2792_v12 = vld [vmem:[#allocation2] ss:$0 sm:$0xff]  ;;  %v2794_v13 = vld [vmem:[#allocation2 + $0x1] ss:$0 sm:$0xff]  ;;  %v833_v26 = vld [vmem:[#allocation5 + $0xf0] sm:$0xff] }
  0x17   :  { %v834_v24 = vld [vmem:[#allocation5 + $0xf8] sm:$0xff]  ;;  %v832_v32 = vld [vmem:[#allocation5 + $0xe8] sm:$0xff]  ;;  %v831_v46 = vld [vmem:[#allocation5 + $0xe0] sm:$0xff] }
  0x18   :  { %2446 = vmatpush.msra.mxu1 %v834_v24  ;;  %835 = vmatpush.msra.mxu0 %v834_v24  ;;  %v830_v49 = vld [vmem:[#allocation5 + $0xd8] sm:$0xff]  ;;  %v829_v55 = vld [vmem:[#allocation5 + $0xd0] sm:$0xff]  ;;  %v828_v59 = vld [vmem:[#allocation5 + $0xc8] sm:$0xff] }
  0x1a   :  { %2447 = vmatpush.msra.mxu1 %v833_v26  ;;  %836 = vmatpush.msra.mxu0 %v833_v26 }
  0x1c   :  { %2448 = vmatpush.msra.mxu1 %v832_v32  ;;  %837 = vmatpush.msra.mxu0 %v832_v32 }
  0x1d   :  { %2480 = vset.pattern.permute.xlu2 %v2712_v4 }
  0x1e   :  { %2478 = vset.pattern.permute.xlu1 %v2712_v4  ;;  %2476 = vset.pattern.permute.xlu0 %v2712_v4 }
  0x1f   :  { %184 = vperm.xlu2 %2480, %v106_v1   ;;  %180 = vperm.xlu1 %2478, %v105_v2  }
  0x20   :  { %176 = vperm.xlu0 %2476, %v104_v3   ;;  %2449 = vmatpush.msra.mxu1 %v831_v46 }
  0x21   :  { %838 = vmatpush.msra.mxu0 %v831_v46 }
  0x22   :  { %2450 = vmatpush.msra.mxu1 %v830_v49 }
  0x23   :  { %839 = vmatpush.msra.mxu0 %v830_v49 }
  0x24   :  { %2451 = vmatpush.msra.mxu1 %v829_v55 }
  0x25   :  { %840 = vmatpush.msra.mxu0 %v829_v55 }
  0x26   :  { %2452 = vmatpush.msra.mxu1 %v828_v59 }
  0x27   :  { %188 = vperm.xlu2 %2480, %v107_v5   ;;  %2481 = vset.pattern.permute.xlu1 %v2711_v0 }
  0x28   :  { %2482 = vset.pattern.permute.xlu0 %v2711_v0  ;;  %146 = vperm.xlu1 %2481, %v107_v5  }
  0x29   :  { %111 = vperm.xlu0 %2482, %v100_v6   ;;  %841 = vmatpush.msra.mxu0 %v828_v59 }
  0x2f   :  { %2484 = vset.pattern.permute.xlu2 %v2713_v7 }
  0x30   :  { %218 = vperm.xlu2 %2484, %v104_v3   ;;  %2483 = vset.pattern.permute.xlu1 %v2712_v4 }
  0x31   :  { %2487 = vset.pattern.permute.xlu0 %v2713_v7  ;;  %160 = vperm.xlu1 %2483, %v100_v6  }
  0x32   :  { %222 = vperm.xlu0 %2487, %v105_v2  }
  0x38   :  { %2486 = vset.pattern.permute.xlu2 %v2712_v4 }
  0x39   :  { %164 = vperm.xlu2 %2486, %v101_v8   ;;  %2485 = vset.pattern.permute.xlu1 %v2711_v0 }
  0x3a   :  { %2490 = vset.pattern.permute.xlu0 %v2712_v4  ;;  %116 = vperm.xlu1 %2485, %v101_v8  }
  0x3b   :  { %172 = vperm.xlu0 %2490, %v103_v9  }
  0x41   :  { %168 = vperm.xlu2 %2486, %v102_v10  }
  0x42   :  { %121 = vperm.xlu1 %2485, %v102_v10  }
  0x43   :  { %2492 = vset.pattern.permute.xlu0 %v2713_v7 }
  0x44   :  { %214 = vperm.xlu0 %2492, %v103_v9  }
  0x49   :  { %2489 = vset.pattern.permute.xlu2 %v2711_v0 }
  0x4a   :  { %126 = vperm.xlu2 %2489, %v103_v9   ;;  %2488 = vset.pattern.permute.xlu1 %v2713_v7 }
  0x4b   :  { %226 = vperm.xlu1 %2488, %v106_v1  }
  0x52   :  { %2491 = vset.pattern.permute.xlu2 %v2713_v7 }
  0x53   :  { %202 = vperm.xlu2 %2491, %v100_v6   ;;  %230 = vperm.xlu1 %2488, %v107_v5  }
  0x5b   :  { %210 = vperm.xlu2 %2491, %v102_v10   ;;  %206 = vperm.xlu1 %2488, %v101_v8  }
  0x6f   :  { %v142_v11 = vpop.permute.xlu2 %141 }
  0x70   :  { %v2797_v15 = vsub.f32 %v142_v11, %v2792_v12  ;;  %v2885_v11 = vld [vmem:[#allocation2 + $0x2] ss:$0 sm:$0xff] }
  0x72   :  { %v248_v17 = vmul.f32 %v2797_v15, %v2797_v15 }
  0x79   :  { %v185_v14 = vpop.permute.xlu2 %184 }
  0x7a   :  { %v2800_v16 = vsub.f32 %v185_v14, %v2794_v13 }
  0x7c   :  { %v256_v18 = vmul.f32 %v2800_v16, %v2800_v16 }
  0x7e   :  { %v2806_v19 = vadd.f32 %v256_v18, %v248_v17 }
  0x80   :  { %vm272_vm0 = vcmp.gt.f32.partialorder %v2806_v19, 0.0 }
  0x81   :  { %v189_v22 = vpop.permute.xlu2 %188  ;;  %v2812_v23 = vsel %vm272_vm0, %v2806_v19, 1.0 }
  0x82   :  { %2497 = vrsqrt.f32 %v2812_v23  ;;  %v2850_v47 = vsub.f32 %v189_v22, %v2794_v13  ;;  %vm348_vm3 = vweird.f32 %v2812_v23 }
  0x84   :  { %v257_v56 = vmul.f32 %v2850_v47, %v2850_v47 }
  0x88   :  { %v137_v20 = vpop.permute.xlu1 %136  ;;  %v132_v21 = vpop.permute.xlu0 %131 }
  0x89   :  { %v2816_v25 = vsub.f32 %v137_v20, %v2792_v12  ;;  %v2819_v29 = vsub.f32 %v132_v21, %v2792_v12  ;;  %v2498_v36 = vpop.eup %2497 }
  0x8a   :  { %v2829_v34 = vpop.permute.xlu2 %218  ;;  %v343_v40 = vmul.f32 %v2498_v36, %v2812_v23  ;;  %vm349_vm4 = vweird.f32 %v2498_v36  ;;  %v827_v23 = vld [vmem:[#allocation5 + $0xc0] sm:$0xff] }
  0x8b   :  { %v247_v33 = vmul.f32 %v2816_v25, %v2816_v25  ;;  %v246_v37 = vmul.f32 %v2819_v29, %v2819_v29  ;;  %vm350_vm7 = vmor %vm348_vm3, %vm349_vm4  ;;  %v238_v24 = vsub.f32 %v2829_v34, %v2885_v11  ;;  %2453 = vmatpush.msra.mxu1 %v827_v23  ;;  %842 = vmatpush.msra.mxu0 %v827_v23 }
  0x8c   :  { %v344_v45 = vmul.f32 %v2498_v36, %v343_v40  ;;  %v825_v40 = vld [vmem:[#allocation5 + $0xb0] sm:$0xff] }
  0x8e   :  { %v345_v53 = vmul.f32 0.5, %v344_v45 }
  0x90   :  { %v346_v63 = vsub.f32 1.5, %v345_v53  ;;  %v1014_v53 = vld [vmem:[#allocation5 + $0x1f0] sm:$0xff] }
  0x91   :  { %v181_v27 = vpop.permute.xlu1 %180 }
  0x92   :  { %v177_v28 = vpop.permute.xlu0 %176  ;;  %v2822_v30 = vsub.f32 %v181_v27, %v2794_v13  ;;  %v347_v5 = vmul.f32 %v2498_v36, %v346_v63 }
  0x93   :  { %v2825_v31 = vsub.f32 %v177_v28, %v2794_v13  ;;  %v2853_v48 = vpop.permute.xlu2 %164 }
  0x94   :  { %v255_v35 = vmul.f32 %v2822_v30, %v2822_v30  ;;  %v351_v18 = vsel %vm350_vm7, %v2498_v36, %v347_v5  ;;  %v2386_v36 = vadd.f32 0.25, %v238_v24  ;;  %v823_v5 = vld [vmem:[#allocation5 + $0xa0] sm:$0xff] }
  0x95   :  { %v254_v39 = vmul.f32 %v2825_v31, %v2825_v31  ;;  %v376_v28 = vmul.f32 %v351_v18, %v2797_v15  ;;  %v368_v34 = vmul.f32 %v351_v18, %v2806_v19  ;;  %v2394_v15 = vadd.f32 -0.25, %v238_v24 }
  0x96   :  { %v2835_v38 = vadd.f32 %v255_v35, %v247_v33  ;;  %v826_v33 = vld [vmem:[#allocation5 + $0xb8] sm:$0xff]  ;;  %v392_v35 = vmul.f32 %v351_v18, %v2800_v16  ;;  %v486_v18 = vmul.f32 %v238_v24, %v238_v24 }
  0x97   :  { %v2844_v42 = vadd.f32 %v254_v39, %v246_v37  ;;  %2454 = vmatpush.msra.mxu1 %v826_v33  ;;  %843 = vmatpush.msra.mxu0 %v826_v33  ;;  %v2923_v16 = vsel %vm272_vm0, %v376_v28, 1.0  ;;  %v2380_v59 = vadd.f32 -0.5, %v368_v34  ;;  %v2948_v28 = vsub.f32 %v2853_v48, %v2794_v13 }
  0x98   :  { %vm271_vm1 = vcmp.gt.f32.partialorder %v2835_v38, 0.0  ;;  %4741 = vst [vmem:[#allocation16_spill] sm:$0xff] %v2923_v16  ;;  %v2927_v55 = vsel %vm272_vm0, %v392_v35, 0.0 }
  0x99   :  { %v279_v41 = vsel %vm271_vm1, %v2835_v38, 1.0  ;;  %vm270_vm2 = vcmp.gt.f32.partialorder %v2844_v42, 0.0  ;;  %2455 = vmatpush.msra.mxu1 %v825_v40  ;;  %844 = vmatpush.msra.mxu0 %v825_v40  ;;  %v408_v35 = vmul.f32 0.0, %v2927_v55 }
  0x9a   :  { %2499 = vrsqrt.f32 %v279_v41  ;;  %v147_v43 = vpop.permute.xlu1 %146  ;;  %v2865_v58 = vsel %vm270_vm2, %v2844_v42, 1.0  ;;  %vm338_vm8 = vweird.f32 %v279_v41 }
  0x9b   :  { %v2847_v44 = vsub.f32 %v147_v43, %v2792_v12  ;;  %v112_v51 = vpop.permute.xlu0 %111  ;;  %2501 = vrsqrt.f32 %v2865_v58  ;;  %v2879_v6 = vpop.permute.xlu2 %168  ;;  %v1015_v43 = vld [vmem:[#allocation5 + $0x1f8] sm:$0xff]  ;;  %vm328_vm12 = vweird.f32 %v2865_v58 }
  0x9c   :  { %v2858_v54 = vsub.f32 %v112_v51, %v2792_v12  ;;  %1016 = vmatpush.msra.mxu3 %v1015_v43  ;;  %v824_v51 = vld [vmem:[#allocation5 + $0xa8] sm:$0xff]  ;;  %v2970_v43 = vsub.f32 %v2879_v6, %v2794_v13  ;;  %v822_v6 = vld [vmem:[#allocation5 + $0x98] sm:$0xff] }
  0x9d   :  { %v249_v50 = vmul.f32 %v2847_v44, %v2847_v44  ;;  %2456 = vmatpush.msra.mxu1 %v824_v51  ;;  %845 = vmatpush.msra.mxu0 %v824_v51 }
  0x9e   :  { %v242_v0 = vmul.f32 %v2858_v54, %v2858_v54  ;;  %1017 = vmatpush.msra.mxu3 %v1014_v53  ;;  %v938_v53 = vld [vmem:[#allocation5 + $0x160] sm:$0xff] }
  0x9f   :  { %v2867_v61 = vadd.f32 %v257_v56, %v249_v50  ;;  %v542_v56 = vmul.f32 %v2386_v36, %v2386_v36  ;;  %2457 = vmatpush.msra.mxu1 %v823_v5  ;;  %v520_v36 = vmul.f32 %v2380_v59, %v2380_v59  ;;  %846 = vmatpush.msra.mxu0 %v823_v5 }
  0xa0   :  { %v2500_v52 = vpop.eup %2499  ;;  %v2988_v59 = vadd.f32 %v486_v18, %v2844_v42 }
  0xa1   :  { %v333_v57 = vmul.f32 %v2500_v52, %v279_v41  ;;  %4740 = vst [vmem:[#allocation15_spill] sm:$0xff] %v2867_v61  ;;  %vm339_vm5 = vweird.f32 %v2500_v52  ;;  %vm273_vm6 = vcmp.gt.f32.partialorder %v2867_v61, 0.0  ;;  %v2883_v10 = vpop.eup %2501  ;;  %v941_v41 = vld [vmem:[#allocation5 + $0x178] sm:$0xff]  ;;  %2458 = vmatpush.msra.mxu1 %v822_v6  ;;  %847 = vmatpush.msra.mxu0 %v822_v6 }
  0xa2   :  { %vm340_vm9 = vmor %vm338_vm8, %vm339_vm5  ;;  %v2890_v14 = vsel %vm273_vm6, %v2867_v61, 1.0  ;;  %v323_v22 = vmul.f32 %v2883_v10, %v2865_v58  ;;  %942 = vmatpush.msra.mxu2 %v941_v41  ;;  %vm329_vm11 = vweird.f32 %v2883_v10 }
  0xa3   :  { %v334_v60 = vmul.f32 %v2500_v52, %v333_v57  ;;  %v161_v62 = vpop.permute.xlu1 %160  ;;  %2503 = vrsqrt.f32 %v2890_v14  ;;  %vm330_vm13 = vmor %vm328_vm12, %vm329_vm11  ;;  %vm358_vm3 = vweird.f32 %v2890_v14 }
  0xa4   :  { %v2873_v1 = vsub.f32 %v161_v62, %v2794_v13  ;;  %v223_v9 = vpop.permute.xlu0 %222  ;;  %v324_v39 = vmul.f32 %v2883_v10, %v323_v22  ;;  %v127_v46 = vpop.permute.xlu2 %126 }
  0xa5   :  { %v335_v2 = vmul.f32 0.5, %v334_v60  ;;  %v2900_v21 = vsub.f32 %v223_v9, %v2885_v11  ;;  %v2404_v60 = vadd.f32 -1.0, %v368_v34  ;;  %v1013_v9 = vld [vmem:[#allocation5 + $0x1e8] sm:$0xff]  ;;  %v2937_v22 = vsub.f32 %v127_v46, %v2792_v12 }
  0xa6   :  { %v250_v3 = vmul.f32 %v2873_v1, %v2873_v1  ;;  %v325_v62 = vmul.f32 0.5, %v324_v39  ;;  %1018 = vmatpush.msra.mxu3 %v1013_v9 }
  0xa7   :  { %v336_v4 = vsub.f32 1.5, %v335_v2  ;;  %v2395_v27 = vadd.f32 -0.25, %v2900_v21  ;;  %v614_v2 = vmul.f32 %v2394_v15, %v2394_v15  ;;  %v2963_v48 = vmul.f32 %v2404_v60, %v2404_v60 }
  0xa8   :  { %v2881_v7 = vadd.f32 %v250_v3, %v242_v0  ;;  %v424_v0 = vmul.f32 0.0, %v2923_v16  ;;  %v326_v34 = vsub.f32 1.5, %v325_v62  ;;  %v2387_v15 = vadd.f32 0.25, %v2900_v21 }
  0xa9   :  { %v337_v8 = vmul.f32 %v2500_v52, %v336_v4  ;;  %v615_v45 = vmul.f32 %v2395_v27, %v2395_v27  ;;  %v2919_v49 = vpop.eup %2503  ;;  %v2944_v27 = vmul.f32 11.090355, %v542_v56  ;;  %v2965_v40 = vmul.f32 11.090355, %v614_v2 }
  0xaa   :  { %vm266_vm10 = vcmp.gt.f32.partialorder %v2881_v7, 0.0  ;;  %v353_v3 = vmul.f32 %v2919_v49, %v2890_v14  ;;  %v2961_v39 = vadd.f32 %v424_v0, %v2927_v55  ;;  %v2984_v56 = vsub.f32 %v2923_v16, %v408_v35  ;;  %v1012_v0 = vld [vmem:[#allocation5 + $0x1e0] sm:$0xff] }
  0xab   :  { %v2892_v17 = vsel %vm340_vm9, %v2500_v52, %v337_v8  ;;  %v2913_v32 = vsel %vm266_vm10, %v2881_v7, 1.0  ;;  %v940_v52 = vld [vmem:[#allocation5 + $0x170] sm:$0xff]  ;;  %v2934_v4 = vmul.f32 11.090355, %v615_v45  ;;  %v939_v8 = vld [vmem:[#allocation5 + $0x168] sm:$0xff]  ;;  %4743 = vst [vmem:[#allocation18_spill] sm:$0xff] %v2965_v40  ;;  %v245_v45 = vmul.f32 %v2937_v22, %v2937_v22  ;;  %1019 = vmatpush.msra.mxu3 %v1012_v0 }
  0xac   :  { %v2896_v20 = vmul.f32 %v2892_v17, %v2835_v38  ;;  %2505 = vrsqrt.f32 %v2913_v32  ;;  %v117_v50 = vpop.permute.xlu1 %116  ;;  %943 = vmatpush.msra.mxu2 %v940_v52  ;;  %4742 = vst [vmem:[#allocation17_spill] sm:$0xff] %v2961_v39  ;;  %v354_v41 = vmul.f32 %v2919_v49, %v353_v3  ;;  %v2990_v62 = vmul.f32 11.090355, %v520_v36  ;;  %v1009_v0 = vld [vmem:[#allocation5 + $0x1c8] sm:$0xff] }
  0xad   :  { %v173_v57 = vpop.permute.xlu0 %172  ;;  %v2955_v24 = vsub.f32 %v117_v50, %v2792_v12  ;;  %v251_v50 = vmul.f32 %v2948_v28, %v2948_v28  ;;  %4744 = vst [vmem:[#allocation19_spill] sm:$0xff] %v2984_v56  ;;  %v2994_v2 = vmul.f32 %v2961_v39, %v2927_v55  ;;  %v543_v9 = vmul.f32 %v2387_v15, %v2387_v15 }
  0xae   :  { %v2379_v26 = vadd.f32 -0.5, %v2896_v20  ;;  %v2940_v23 = vsub.f32 %v173_v57, %v2794_v13  ;;  %944 = vmatpush.msra.mxu2 %v939_v8  ;;  %v203_v13 = vpop.permute.xlu2 %202  ;;  %v327_v57 = vmul.f32 %v2883_v10, %v326_v34  ;;  %v355_v3 = vmul.f32 0.5, %v354_v41  ;;  %v937_v41 = vld [vmem:[#allocation5 + $0x158] sm:$0xff] }
  0xaf   :  { %v243_v51 = vmul.f32 %v2955_v24, %v2955_v24  ;;  %4745 = vst [vmem:[#allocation20_spill] sm:$0xff] %v2994_v2  ;;  %v252_v8 = vmul.f32 %v2970_v43, %v2970_v43  ;;  %v3004_v35 = vsub.f32 %v203_v13, %v2885_v11  ;;  %vm288_vm0 = vweird.f32 %v2913_v32  ;;  %v1010_v13 = vld [vmem:[#allocation5 + $0x1d0] sm:$0xff] }
  0xb0   :  { %v519_v37 = vmul.f32 %v2379_v26, %v2379_v26  ;;  %v253_v46 = vmul.f32 %v2940_v23, %v2940_v23  ;;  %945 = vmatpush.msra.mxu2 %v938_v53  ;;  %v331_v6 = vsel %vm330_vm13, %v2883_v10, %v327_v57  ;;  %v820_v10 = vld [vmem:[#allocation5 + $0x88] sm:$0xff]  ;;  %v375_v53 = vmul.f32 %v2892_v17, %v2816_v25 }
  0xb1   :  { %v3007_v58 = vadd.f32 %v251_v50, %v243_v51  ;;  %v2382_v15 = vadd.f32 0.25, %v3004_v35  ;;  %v936_v51 = vld [vmem:[#allocation5 + $0x150] sm:$0xff]  ;;  %v391_v57 = vmul.f32 %v2892_v17, %v2822_v30  ;;  %v819_v30 = vld [vmem:[#allocation5 + $0x80] sm:$0xff]  ;;  %v935_v17 = vld [vmem:[#allocation5 + $0x148] sm:$0xff]  ;;  %vm359_vm7 = vweird.f32 %v2919_v49 }
  0xb2   :  { %v2929_v63 = vmul.f32 11.090355, %v519_v37  ;;  %v2942_v26 = vpop.eup %2505  ;;  %v3001_v18 = vadd.f32 %v253_v46, %v245_v45  ;;  %v2390_v45 = vadd.f32 -0.25, %v3004_v35  ;;  %946 = vmatpush.msra.mxu2 %v937_v41  ;;  %v356_v46 = vsub.f32 1.5, %v355_v3  ;;  %vm360_vm8 = vmor %vm358_vm3, %vm359_vm7 }
  0xb3   :  { %v283_v37 = vmul.f32 %v2942_v26, %v2913_v32  ;;  %vm289_vm14 = vweird.f32 %v2942_v26  ;;  %v390_v32 = vmul.f32 %v331_v6, %v2825_v31  ;;  %vm267_vm5 = vcmp.gt.f32.partialorder %v3007_v58, 0.0 }
  0xb4   :  { %v2952_v33 = vadd.f32 %v2934_v4, %v2929_v63  ;;  %v122_v60 = vpop.permute.xlu1 %121  ;;  %vm269_vm15 = vcmp.gt.f32.partialorder %v3001_v18, 0.0  ;;  %vm290_vm4 = vmor %vm288_vm0, %vm289_vm14  ;;  %947 = vmatpush.msra.mxu2 %v936_v51  ;;  %v366_v31 = vmul.f32 %v331_v6, %v2844_v42  ;;  %v3044_v41 = vmul.f32 11.090355, %v543_v9 }
  0xb5   :  { %v284_v52 = vmul.f32 %v2942_v26, %v283_v37  ;;  %v3010_v34 = vsub.f32 %v122_v60, %v2792_v12  ;;  %v821_v37 = vld [vmem:[#allocation5 + $0x90] sm:$0xff]  ;;  %v3021_v12 = vsel %vm269_vm15, %v3001_v18, 1.0  ;;  %v3049_v51 = vsel %vm267_vm5, %v3007_v58, 1.0 }
  0xb6   :  { %2459 = vmatpush.msra.mxu1 %v821_v37  ;;  %848 = vmatpush.msra.mxu0 %v821_v37  ;;  %2507 = vrsqrt.f32 %v3021_v12  ;;  %v357_v37 = vmul.f32 %v2919_v49, %v356_v46  ;;  %4746 = vst [vmem:[#allocation21_spill] sm:$0xff] %v3044_v41  ;;  %v2403_v9 = vadd.f32 -1.0, %v2896_v20  ;;  %vm298_vm12 = vweird.f32 %v3049_v51 }
  0xb7   :  { %v285_v5 = vmul.f32 0.5, %v284_v52  ;;  %v1011_v52 = vld [vmem:[#allocation5 + $0x1d8] sm:$0xff]  ;;  %v244_v25 = vmul.f32 %v3010_v34, %v3010_v34  ;;  %948 = vmatpush.msra.mxu2 %v935_v17  ;;  %2509 = vrsqrt.f32 %v3049_v51 }
  0xb8   :  { %1020 = vmatpush.msra.mxu3 %v1011_v52  ;;  %2460 = vmatpush.msra.mxu1 %v820_v10  ;;  %v361_v20 = vsel %vm360_vm8, %v2919_v49, %v357_v37 }
  0xb9   :  { %v286_v36 = vsub.f32 1.5, %v285_v5  ;;  %v538_v5 = vmul.f32 %v2382_v15, %v2382_v15  ;;  %849 = vmatpush.msra.mxu0 %v820_v10  ;;  %v3051_v15 = vadd.f32 %v252_v8, %v244_v25  ;;  %v377_v49 = vmul.f32 %v361_v20, %v2847_v44 }
  0xba   :  { %1021 = vmatpush.msra.mxu3 %v1010_v13  ;;  %2461 = vmatpush.msra.mxu1 %v819_v30  ;;  %v393_v37 = vmul.f32 %v361_v20, %v2850_v47 }
  0xbb   :  { %v287_v50 = vmul.f32 %v2942_v26, %v286_v36  ;;  %v610_v36 = vmul.f32 %v2390_v45, %v2390_v45  ;;  %v3055_v45 = vsel %vm271_vm1, %v375_v53, 1.0  ;;  %850 = vmatpush.msra.mxu0 %v819_v30  ;;  %v3068_v13 = vmul.f32 11.090355, %v538_v5 }
  0xbc   :  { %1022 = vmatpush.msra.mxu3 %v1009_v0  ;;  %4747 = vst [vmem:[#allocation22_spill] sm:$0xff] %v3055_v45  ;;  %v3062_v46 = vpop.eup %2507  ;;  %v423_v17 = vmul.f32 0.0, %v3055_v45  ;;  %v687_v0 = vmul.f32 %v2403_v9, %v2403_v9 }
  0xbd   :  { %v3033_v60 = vsel %vm290_vm4, %v2942_v26, %v287_v50  ;;  %v374_v26 = vmul.f32 %v331_v6, %v2819_v29  ;;  %v399_v29 = vsel %vm271_vm1, %v391_v57, 0.0  ;;  %v398_v6 = vsel %vm270_vm2, %v390_v32, 0.0  ;;  %v3108_v47 = vpop.eup %2509 }
  0xbe   :  { %v362_v3 = vmul.f32 %v3033_v60, %v2881_v7  ;;  %v618_v53 = vmul.f32 11.090355, %v610_v36  ;;  %v313_v32 = vmul.f32 %v3062_v46, %v3021_v12  ;;  %v407_v25 = vmul.f32 0.0, %v399_v29 }
  0xbf   :  { %v3072_v57 = vsel %vm270_vm2, %v374_v26, 1.0  ;;  %vm268_vm1 = vcmp.gt.f32.partialorder %v3051_v15, 0.0  ;;  %vm318_vm2 = vweird.f32 %v3021_v12  ;;  %vm319_vm9 = vweird.f32 %v3062_v46 }
  0xc0   :  { %v2374_v52 = vadd.f32 -0.5, %v362_v3  ;;  %v2398_v50 = vadd.f32 -1.0, %v362_v3  ;;  %4748 = vst [vmem:[#allocation23_spill] sm:$0xff] %v3072_v57  ;;  %v406_v3 = vmul.f32 0.0, %v398_v6  ;;  %v314_v42 = vmul.f32 %v3062_v46, %v313_v32 }
  0xc1   :  { %v422_v5 = vmul.f32 0.0, %v3072_v57  ;;  %v3097_v9 = vsel %vm268_vm1, %v3051_v15, 1.0  ;;  %v3104_v44 = vsub.f32 %v3055_v45, %v407_v25  ;;  %v487_v32 = vmul.f32 %v2900_v21, %v2900_v21 }
  0xc2   :  { %v514_v8 = vmul.f32 %v2374_v52, %v2374_v52  ;;  %v682_v10 = vmul.f32 %v2398_v50, %v2398_v50  ;;  %v315_v52 = vmul.f32 0.5, %v314_v42  ;;  %v3112_v42 = vmul.f32 11.090355, %v687_v0 }
  0xc3   :  { %4750 = vst [vmem:[#allocation25_spill] sm:$0xff] %v3104_v44  ;;  %v3115_v39 = vsub.f32 %v3072_v57, %v406_v3  ;;  %v559_v25 = vadd.f32 %v3044_v41, %v2929_v63  ;;  %2511 = vrsqrt.f32 %v3097_v9  ;;  %v385_v21 = vsel %vm273_vm6, %v377_v49, 1.0 }
  0xc4   :  { %v3078_v30 = vmul.f32 11.090355, %v514_v8  ;;  %v690_v14 = vmul.f32 11.090355, %v682_v10  ;;  %v3101_v8 = vmul.f32 %v2984_v56, %v2927_v55  ;;  %v2378_v10 = vadd.f32 -0.5, %v366_v31  ;;  %4752 = vst [vmem:[#allocation27_spill] sm:$0xff] %v3112_v42 }
  0xc5   :  { %v316_v2 = vsub.f32 1.5, %v315_v52  ;;  %4753 = vst [vmem:[#allocation28_spill] sm:$0xff] %v3115_v39  ;;  %v3117_v55 = vadd.f32 %v422_v5, %v398_v6  ;;  %v369_v0 = vmul.f32 %v361_v20, %v2867_v61  ;;  %v293_v3 = vmul.f32 %v3108_v47, %v3049_v51 }
  0xc6   :  { %v3086_v36 = vadd.f32 %v618_v53, %v3078_v30  ;;  %v3089_v26 = vadd.f32 %v690_v14, %v3068_v13  ;;  %v3092_v50 = vadd.f32 %v690_v14, %v618_v53  ;;  %4749 = vst [vmem:[#allocation24_spill] sm:$0xff] %v3101_v8  ;;  %v3110_v53 = vadd.f32 %v423_v17, %v399_v29 }
  0xc7   :  { %v2402_v14 = vadd.f32 -1.0, %v366_v31  ;;  %4754 = vst [vmem:[#allocation29_spill] sm:$0xff] %v3117_v55  ;;  %v3126_v17 = vsel %vm273_vm6, %v393_v37, 0.0  ;;  %v518_v31 = vmul.f32 %v2378_v10, %v2378_v10  ;;  %v3134_v63 = vmul.f32 11.090355, %v2963_v48  ;;  %vm320_vm6 = vmor %vm318_vm2, %vm319_vm9 }
  0xc8   :  { %4751 = vst [vmem:[#allocation26_spill] sm:$0xff] %v3110_v53  ;;  %v3137_v5 = vmul.f32 %v3110_v53, %v399_v29  ;;  %v3140_v49 = vadd.f32 %v487_v32, %v2835_v38  ;;  %v751_v12 = vadd.f32 %v3112_v42, %v2934_v4  ;;  %v317_v37 = vmul.f32 %v3062_v46, %v316_v2  ;;  %v211_v2 = vpop.permute.xlu2 %210  ;;  %v808_v53 = vld [vmem:[#allocation5 + $0x70] sm:$0xff] }
  0xc9   :  { %4755 = vst [vmem:[#allocation30_spill] sm:$0xff] %v3126_v17  ;;  %v3146_v52 = vmul.f32 %v3104_v44, %v399_v29  ;;  %v3148_v20 = vmul.f32 %v2402_v14, %v2402_v14  ;;  %v409_v10 = vmul.f32 0.0, %v3126_v17  ;;  %v425_v48 = vmul.f32 0.0, %v385_v21  ;;  %v3159_v42 = vpop.eup %2511 }
  0xca   :  { %4756 = vst [vmem:[#allocation31_spill] sm:$0xff] %v3134_v63  ;;  %v3152_v41 = vmul.f32 %v3117_v55, %v398_v6  ;;  %v3155_v38 = vmul.f32 %v3115_v39, %v398_v6  ;;  %v386_v4 = vmul.f32 %v3033_v60, %v2873_v1  ;;  %v567_v32 = vsub.f32 0.0, %v559_v25 }
  0xcb   :  { %4757 = vst [vmem:[#allocation32_spill] sm:$0xff] %v3137_v5  ;;  %v3161_v29 = vmul.f32 11.090355, %v518_v31  ;;  %v2381_v14 = vadd.f32 -0.5, %v369_v0  ;;  %v370_v8 = vmul.f32 %v3033_v60, %v2858_v54  ;;  %v294_v16 = vmul.f32 %v3108_v47, %v293_v3  ;;  %v227_v5 = vpop.permute.xlu1 %226 }
  0xcc   :  { %4758 = vst [vmem:[#allocation33_spill] sm:$0xff] %v3140_v49  ;;  %v639_v6 = vsub.f32 0.0, %v2952_v33  ;;  %v3170_v1 = vsub.f32 %v385_v21, %v409_v10  ;;  %v3173_v25 = vadd.f32 %v425_v48, %v3126_v17  ;;  %v482_v31 = vmul.f32 %v3004_v35, %v3004_v35 }
  0xcd   :  { %4759 = vst [vmem:[#allocation34_spill] sm:$0xff] %v3146_v52  ;;  %v759_v52 = vsub.f32 0.0, %v751_v12  ;;  %v236_v54 = vsub.f32 %v211_v2, %v2885_v11  ;;  %v3180_v60 = vsel %vm266_vm10, %v386_v4, 0.0  ;;  %v303_v33 = vmul.f32 %v3159_v42, %v3097_v9 }
  0xce   :  { %4760 = vst [vmem:[#allocation35_spill] sm:$0xff] %v3152_v41  ;;  %v2405_v41 = vadd.f32 -1.0, %v369_v0  ;;  %v3182_v0 = vmul.f32 1.442695, %v567_v32  ;;  %v3189_v3 = vmul.f32 %v2381_v14, %v2381_v14  ;;  %v3193_v12 = vsel %vm266_vm10, %v370_v8, 1.0 }
  0xcf   :  { %4761 = vst [vmem:[#allocation36_spill] sm:$0xff] %v3155_v38  ;;  %v3168_v38 = vsel %vm320_vm6, %v3062_v46, %v317_v37  ;;  %v3187_v46 = vsub.f32 %v227_v5, %v2885_v11  ;;  %v295_v35 = vmul.f32 0.5, %v294_v16  ;;  %v3199_v48 = vmul.f32 1.442695, %v639_v6  ;;  %v215_v5 = vpop.permute.xlu0 %214 }
  0xd0   :  { %4762 = vst [vmem:[#allocation37_spill] sm:$0xff] %v3170_v1  ;;  %v365_v37 = vmul.f32 %v3168_v38, %v3001_v18  ;;  %v3197_v10 = vmul.f32 %v2405_v41, %v2405_v41  ;;  %v3201_v4 = vmul.f32 1.442695, %v759_v52  ;;  %v304_v32 = vmul.f32 %v3159_v42, %v303_v33 }
  0xd1   :  { %4763 = vst [vmem:[#allocation38_spill] sm:$0xff] %v3173_v25  ;;  %v3205_v2 = vmul.f32 %v3170_v1, %v385_v21  ;;  %v3208_v14 = vmul.f32 %v3173_v25, %v385_v21  ;;  %v402_v16 = vmul.f32 0.0, %v3180_v60  ;;  %v3212_v8 = vadd.f32 %v482_v31, %v2881_v7 }
  0xd2   :  { %4764 = vst [vmem:[#allocation39_spill] sm:$0xff] %v3199_v48  ;;  %v418_v41 = vmul.f32 0.0, %v3193_v12  ;;  %v305_v6 = vmul.f32 0.5, %v304_v32  ;;  %vm309_vm10 = vweird.f32 %v3159_v42  ;;  %v2396_v52 = vadd.f32 -0.25, %v3187_v46  ;;  %v933_v48 = vld [vmem:[#allocation5 + $0x138] sm:$0xff] }
  0xd3   :  { %4765 = vst [vmem:[#allocation40_spill] sm:$0xff] %v3201_v4  ;;  %v296_v33 = vsub.f32 1.5, %v295_v35  ;;  %v2377_v4 = vadd.f32 -0.5, %v365_v37  ;;  %v3220_v21 = vsub.f32 %v215_v5, %v2885_v11  ;;  %vm308_vm11 = vweird.f32 %v3097_v9  ;;  %v934_v5 = vld [vmem:[#allocation5 + $0x140] sm:$0xff] }
  0xd4   :  { %4766 = vst [vmem:[#allocation41_spill] sm:$0xff] %v3205_v2  ;;  %v554_v2 = vadd.f32 %v3068_v13, %v3078_v30  ;;  %v306_v25 = vsub.f32 1.5, %v305_v6  ;;  %v616_v7 = vmul.f32 %v2396_v52, %v2396_v52  ;;  %vm3224_vm13 = vmor %vm308_vm11, %vm309_vm10  ;;  %v484_v32 = vmul.f32 %v236_v54, %v236_v54  ;;  %v1008_v6 = vld [vmem:[#allocation5 + $0x1c0] sm:$0xff]  ;;  %v809_v52 = vld [vmem:[#allocation5 + $0x78] sm:$0xff]  ;;  %949 = vmatpush.msra.mxu2 %v934_v5 }
  0xd5   :  { %4767 = vst [vmem:[#allocation42_spill] sm:$0xff] %v3208_v14  ;;  %v2401_v14 = vadd.f32 -1.0, %v365_v37  ;;  %v2392_v35 = vadd.f32 -0.25, %v236_v54  ;;  %v2393_v17 = vadd.f32 -0.25, %v3220_v21  ;;  %v3230_v13 = vsub.f32 %v3193_v12, %v402_v16  ;;  %1023 = vmatpush.msra.mxu3 %v1008_v6  ;;  %v1007_v16 = vld [vmem:[#allocation5 + $0x1b8] sm:$0xff]  ;;  %876 = vmatpush.msrb.mxu1 %v809_v52  ;;  %v231_v52 = vpop.permute.xlu1 %230 }
  0xd6   :  { %v3233_v30 = vadd.f32 %v418_v41, %v3180_v60  ;;  %v307_v37 = vmul.f32 %v3159_v42, %v306_v25  ;;  %v624_v9 = vmul.f32 11.090355, %v616_v7  ;;  %v297_v1 = vmul.f32 %v3108_v47, %v296_v33  ;;  %950 = vmatpush.msra.mxu2 %v933_v48  ;;  %v1005_v48 = vld [vmem:[#allocation5 + $0x1a8] sm:$0xff] }
  0xd7   :  { %4770 = vst [vmem:[#allocation43_spill] sm:$0xff] %v3230_v13  ;;  %vm299_vm14 = vweird.f32 %v3108_v47  ;;  %v517_v56 = vmul.f32 %v2377_v4, %v2377_v4  ;;  %v562_v40 = vsub.f32 0.0, %v554_v2  ;;  %v685_v45 = vmul.f32 %v2401_v14, %v2401_v14  ;;  %v932_v4 = vld [vmem:[#allocation5 + $0x130] sm:$0xff]  ;;  %1024 = vmatpush.msra.mxu3 %v1007_v16  ;;  %877 = vmatpush.msrb.mxu1 %v808_v53 }
  0xd8   :  { %4771 = vst [vmem:[#allocation44_spill] sm:$0xff] %v3233_v30  ;;  %v3241_v25 = vsel %vm3224_vm13, %v3159_v42, %v307_v37  ;;  %v3244_v41 = vadd.f32 %v624_v9, %v2990_v62  ;;  %v3247_v33 = vadd.f32 %v3134_v63, %v624_v9  ;;  %v1006_v2 = vld [vmem:[#allocation5 + $0x1b0] sm:$0xff]  ;;  %v3251_v5 = vadd.f32 0.25, %v236_v54  ;;  %v807_v42 = vld [vmem:[#allocation5 + $0x68] sm:$0xff]  ;;  %vm300_vm0 = vmor %vm298_vm12, %vm299_vm14  ;;  %951 = vmatpush.msra.mxu2 %v932_v4 }
  0xd9   :  { %v364_v7 = vmul.f32 %v3241_v25, %v3051_v15  ;;  %v2388_v14 = vadd.f32 0.25, %v3187_v46  ;;  %v613_v6 = vmul.f32 %v2393_v17, %v2393_v17  ;;  %v458_v31 = vmul.f32 %v3233_v30, %v3193_v12  ;;  %v931_v17 = vld [vmem:[#allocation5 + $0x128] sm:$0xff]  ;;  %1025 = vmatpush.msra.mxu3 %v1006_v2  ;;  %878 = vmatpush.msrb.mxu1 %v807_v42  ;;  %v930_v4 = vld [vmem:[#allocation5 + $0x120] sm:$0xff]  ;;  %v929_v42 = vld [vmem:[#allocation5 + $0x118] sm:$0xff] }
  0xda   :  { %4772 = vst [vmem:[#allocation45_spill] sm:$0xff] %v3244_v41  ;;  %v466_v37 = vmul.f32 %v3230_v13, %v3180_v60  ;;  %v3263_v54 = vadd.f32 %v484_v32, %v3051_v15  ;;  %v612_v9 = vmul.f32 %v2392_v35, %v2392_v35  ;;  %v301_v16 = vsel %vm300_vm0, %v3108_v47, %v297_v1 }
  0xdb   :  { %4773 = vst [vmem:[#allocation46_spill] sm:$0xff] %v3247_v33  ;;  %v2376_v63 = vadd.f32 -0.5, %v364_v7  ;;  %v2400_v33 = vadd.f32 -1.0, %v364_v7  ;;  %v3266_v41 = vmul.f32 11.090355, %v517_v56  ;;  %v706_v51 = vsub.f32 0.0, %v3089_v26  ;;  %952 = vmatpush.msra.mxu2 %v931_v17  ;;  %1026 = vmatpush.msra.mxu3 %v1005_v48 }
  0xdc   :  { %v3268_v55 = vmul.f32 1.442695, %v562_v40  ;;  %v754_v32 = vsub.f32 0.0, %v3092_v50  ;;  %v3272_v57 = vmul.f32 11.090355, %v685_v45  ;;  %v544_v44 = vmul.f32 %v2388_v14, %v2388_v14  ;;  %v806_v26 = vld [vmem:[#allocation5 + $0x60] sm:$0xff] }
  0xdd   :  { %v516_v53 = vmul.f32 %v2376_v63, %v2376_v63  ;;  %v684_v35 = vmul.f32 %v2400_v33, %v2400_v33  ;;  %v621_v61 = vmul.f32 11.090355, %v613_v6  ;;  %v363_v56 = vmul.f32 %v301_v16, %v3007_v58  ;;  %v1004_v50 = vld [vmem:[#allocation5 + $0x1a0] sm:$0xff]  ;;  %879 = vmatpush.msrb.mxu1 %v806_v26  ;;  %953 = vmatpush.msra.mxu2 %v930_v4  ;;  %v805_v7 = vld [vmem:[#allocation5 + $0x58] sm:$0xff]  ;;  %v927_v26 = vld [vmem:[#allocation5 + $0x108] sm:$0xff] }
  0xde   :  { %4774 = vst [vmem:[#allocation47_spill] sm:$0xff] %v3272_v57  ;;  %v387_v47 = vmul.f32 %v301_v16, %v2948_v28  ;;  %v620_v1 = vmul.f32 11.090355, %v612_v9  ;;  %v3277_v40 = vsub.f32 %v231_v52, %v2885_v11  ;;  %v371_v45 = vmul.f32 %v301_v16, %v2955_v24  ;;  %1027 = vmatpush.msra.mxu3 %v1004_v50  ;;  %v1003_v9 = vld [vmem:[#allocation5 + $0x198] sm:$0xff]  ;;  %v804_v52 = vld [vmem:[#allocation5 + $0x50] sm:$0xff]  ;;  %v1001_v50 = vld [vmem:[#allocation5 + $0x188] sm:$0xff] }
  0xdf   :  { %v3280_v2 = vmul.f32 11.090355, %v516_v53  ;;  %v3282_v63 = vmul.f32 11.090355, %v684_v35  ;;  %v3285_v33 = vadd.f32 %v621_v61, %v3266_v41  ;;  %v3289_v28 = vmul.f32 %v3233_v30, %v3180_v60  ;;  %880 = vmatpush.msrb.mxu1 %v805_v7  ;;  %954 = vmatpush.msra.mxu2 %v929_v42  ;;  %v803_v35 = vld [vmem:[#allocation5 + $0x48] sm:$0xff] }
  0xe0   :  { %v3291_v14 = vadd.f32 %v466_v37, %v458_v31  ;;  %v3293_v6 = vmul.f32 1.442695, %v706_v51  ;;  %v3296_v24 = vadd.f32 %v3272_v57, %v621_v61  ;;  %v3298_v17 = vmul.f32 1.442695, %v754_v32  ;;  %v928_v31 = vld [vmem:[#allocation5 + $0x110] sm:$0xff]  ;;  %1028 = vmatpush.msra.mxu3 %v1003_v9  ;;  %v207_v9 = vpop.permute.xlu1 %206  ;;  %v926_v32 = vld [vmem:[#allocation5 + $0x100] sm:$0xff] }
  0xe1   :  { %4775 = vst [vmem:[#allocation48_spill] sm:$0xff] %v3282_v63  ;;  %v3301_v48 = vadd.f32 %v620_v1, %v3280_v2  ;;  %v3304_v16 = vadd.f32 %v3282_v63, %v620_v1  ;;  %v3306_v60 = vmul.f32 11.090355, %v544_v44  ;;  %v1002_v37 = vld [vmem:[#allocation5 + $0x190] sm:$0xff]  ;;  %v3310_v61 = vsel %vm267_vm5, %v387_v47, 0.0  ;;  %881 = vmatpush.msrb.mxu1 %v804_v52  ;;  %955 = vmatpush.msra.mxu2 %v928_v31 }
  0xe2   :  { %4776 = vst [vmem:[#allocation49_spill] sm:$0xff] %v3291_v14  ;;  %v2375_v51 = vadd.f32 -0.5, %v363_v56  ;;  %v2389_v53 = vadd.f32 0.25, %v3277_v40  ;;  %v3316_v44 = vsel %vm267_vm5, %v371_v45, 1.0  ;;  %v540_v1 = vmul.f32 %v3251_v5, %v3251_v5  ;;  %1029 = vmatpush.msra.mxu3 %v1002_v37  ;;  %v801_v37 = vld [vmem:[#allocation5 + $0x38] sm:$0xff] }
  0xe3   :  { %4777 = vst [vmem:[#allocation50_spill] sm:$0xff] %v3296_v24  ;;  %v3322_v4 = vmul.f32 %v3187_v46, %v3187_v46  ;;  %v2397_v47 = vadd.f32 -0.25, %v3277_v40  ;;  %v373_v7 = vmul.f32 %v3168_v38, %v2937_v22  ;;  %v389_v42 = vmul.f32 %v3168_v38, %v2940_v23  ;;  %v802_v46 = vld [vmem:[#allocation5 + $0x40] sm:$0xff]  ;;  %882 = vmatpush.msrb.mxu1 %v803_v35 }
  0xe4   :  { %4778 = vst [vmem:[#allocation51_spill] sm:$0xff] %v3301_v48  ;;  %v2385_v45 = vadd.f32 0.25, %v3220_v21  ;;  %v558_v5 = vadd.f32 %v2944_v27, %v3161_v29  ;;  %v403_v63 = vmul.f32 0.0, %v3310_v61  ;;  %v2399_v52 = vadd.f32 -1.0, %v363_v56  ;;  %956 = vmatpush.msra.mxu2 %v927_v26  ;;  %v1000_v22 = vld [vmem:[#allocation5 + $0x180] sm:$0xff]  ;;  %1030 = vmatpush.msra.mxu3 %v1001_v50  ;;  %v800_v26 = vld [vmem:[#allocation5 + $0x30] sm:$0xff] }
  0xe5   :  { %4779 = vst [vmem:[#allocation52_spill] sm:$0xff] %v3304_v16  ;;  %v560_v31 = vadd.f32 %v3306_v60, %v2990_v62  ;;  %v617_v14 = vmul.f32 %v2397_v47, %v2397_v47  ;;  %v3336_v23 = vmul.f32 0.0, %v3316_v44  ;;  %v515_v38 = vmul.f32 %v2375_v51, %v2375_v51  ;;  %883 = vmatpush.msrb.mxu1 %v802_v46 }
  0xe6   :  { %v545_v57 = vmul.f32 %v2389_v53, %v2389_v53  ;;  %v566_v16 = vsub.f32 0.0, %v558_v5  ;;  %v529_v48 = vmul.f32 11.090355, %v3189_v3  ;;  %v3340_v24 = vmul.f32 11.090355, %v3197_v10  ;;  %957 = vmatpush.msra.mxu2 %v926_v32  ;;  %1031 = vmatpush.msra.mxu3 %v1000_v22 }
  0xe7   :  { %v625_v56 = vmul.f32 11.090355, %v617_v14  ;;  %v3343_v62 = vsub.f32 %v207_v9, %v2885_v11  ;;  %vm498_vm3 = vcmp.le.f32.partialorder %v3212_v8, 5.5625  ;;  %v3346_v35 = vmul.f32 11.090355, %v540_v1  ;;  %884 = vmatpush.msrb.mxu1 %v801_v37  ;;  %v799_v1 = vld [vmem:[#allocation5 + $0x28] sm:$0xff] }
  0xe8   :  { %v541_v51 = vmul.f32 %v2385_v45, %v2385_v45  ;;  %v578_v53 = vmul.f32 1.442695, %v566_v16  ;;  %2513 = vpow2.f32 %v3268_v55  ;;  %v568_v3 = vsub.f32 0.0, %v560_v31  ;;  %v2025_v8 = vld [vmem:[#allocation5 + $0x8e8] sm:$0xff] }
  0xe9   :  { %4780 = vst [vmem:[#allocation53_spill] sm:$0xff] %v3346_v35  ;;  %v3349_v47 = vadd.f32 %v625_v56, %v529_v48  ;;  %v3352_v10 = vadd.f32 %v3340_v24, %v625_v56  ;;  %v2383_v11 = vadd.f32 0.25, %v3343_v62  ;;  %vm502_vm4 = vcmp.le.f32.partialorder %v2988_v59, 5.5625  ;;  %885 = vmatpush.msrb.mxu1 %v800_v26  ;;  %v2089_v59 = vld [vmem:[#allocation5 + $0x918] sm:$0xff] }
  0xea   :  { %v683_v14 = vmul.f32 %v2399_v52, %v2399_v52  ;;  %v3356_v32 = vmul.f32 11.090355, %v545_v57  ;;  %2515 = vpow2.f32 %v578_v53  ;;  %v2391_v16 = vadd.f32 -0.25, %v3343_v62  ;;  %v1089_v53 = vld [vmem:[#allocation5 + $0x278] sm:$0xff] }
  0xeb   :  { %4781 = vst [vmem:[#allocation54_spill] sm:$0xff] %v3352_v10  ;;  %v3361_v55 = vsel %vm269_vm15, %v373_v7, 1.0  ;;  %v372_v50 = vmul.f32 %v3241_v25, %v3010_v34  ;;  %v556_v45 = vadd.f32 %v3346_v35, %v3280_v2  ;;  %v539_v5 = vmul.f32 %v2383_v11, %v2383_v11  ;;  %v798_v7 = vld [vmem:[#allocation5 + $0x20] sm:$0xff]  ;;  %886 = vmatpush.msrb.mxu1 %v799_v1  ;;  %v1088_v1 = vld [vmem:[#allocation5 + $0x270] sm:$0xff] }
  0xec   :  { %v3369_v57 = vsel %vm269_vm15, %v389_v42, 0.0  ;;  %v388_v9 = vmul.f32 %v3241_v25, %v2970_v43  ;;  %v611_v46 = vmul.f32 %v2391_v16, %v2391_v16  ;;  %2517 = vpow2.f32 %v3182_v0  ;;  %1090 = vmatpush.msrb.mxu0 %v1089_v53  ;;  %v1229_v16 = vld [vmem:[#allocation5 + $0x378] sm:$0xff] }
  0xed   :  { %v582_v52 = vmul.f32 1.442695, %v568_v3  ;;  %v3374_v31 = vmul.f32 11.090355, %v541_v51  ;;  %v523_v34 = vmul.f32 11.090355, %v515_v38  ;;  %v434_v2 = vmul.f32 %v3230_v13, %v3193_v12  ;;  %887 = vmatpush.msrb.mxu1 %v798_v7  ;;  %1230 = vmatpush.msrb.mxu2 %v1229_v16 }
  0xee   :  { %v2514_v22 = vpop.eup %2513  ;;  %v561_v37 = vadd.f32 %v3356_v32, %v529_v48  ;;  %v3379_v42 = vmul.f32 11.090355, %v683_v14  ;;  %v3381_v56 = vmul.f32 11.090355, %v539_v5  ;;  %v619_v43 = vmul.f32 11.090355, %v611_v46  ;;  %1091 = vmatpush.msrb.mxu0 %v1088_v1 }
  0xef   :  { %v3384_v25 = vsub.f32 %v3316_v44, %v403_v63  ;;  %v3388_v0 = vsel %vm268_vm1, %v372_v50, 1.0  ;;  %v564_v38 = vsub.f32 0.0, %v556_v45  ;;  %v3390_v51 = vmul.f32 0.0036028198, %v2514_v22  ;;  %v797_v12 = vld [vmem:[#allocation5 + $0x18] sm:$0xff]  ;;  %v796_v14 = vld [vmem:[#allocation5 + $0x10] sm:$0xff] }
  0xf0   :  { %4782 = vst [vmem:[#allocation55_spill] sm:$0xff] %v3379_v42  ;;  %v2516_v26 = vpop.eup %2515  ;;  %vm503_vm15 = vcmp.le.f32.partialorder %v3140_v49, 5.5625  ;;  %v3395_v48 = vsel %vm268_vm1, %v388_v9, 0.0  ;;  %v555_v63 = vadd.f32 %v3381_v56, %v523_v34  ;;  %v3398_v3 = vadd.f32 %v619_v43, %v523_v34  ;;  %888 = vmatpush.msrb.mxu1 %v797_v12  ;;  %v1228_v5 = vld [vmem:[#allocation5 + $0x370] sm:$0xff]  ;;  %v4806_v35 = vld [vmem:[#allocation39_spill] sm:$0xff] }
  0xf1   :  { %4783 = vst [vmem:[#allocation56_spill] sm:$0xff] %v3381_v56  ;;  %v3401_v11 = vadd.f32 %v3379_v42, %v619_v43  ;;  %v3403_v50 = vmul.f32 0.0036028198, %v2516_v26  ;;  %v3408_v45 = vsel %vm498_vm3, %v3390_v51, 0.0  ;;  %2519 = vpow2.f32 %v582_v52  ;;  %v1303_v43 = vld [vmem:[#allocation5 + $0x3f8] sm:$0xff]  ;;  %1231 = vmatpush.msrb.mxu2 %v1228_v5  ;;  %v795_v26 = vld [vmem:[#allocation5 + $0x8] sm:$0xff] }
  0xf2   :  { %4784 = vst [vmem:[#allocation57_spill] sm:$0xff] %v3384_v25  ;;  %v3411_v15 = vsub.f32 %v434_v2, %v3289_v28  ;;  %v2518_v9 = vpop.eup %2517  ;;  %v3415_v46 = vadd.f32 %v3374_v31, %v3266_v41  ;;  %v569_v7 = vsub.f32 0.0, %v561_v37  ;;  %v563_v34 = vsub.f32 0.0, %v555_v63  ;;  %889 = vmatpush.msrb.mxu1 %v796_v14  ;;  %v1087_v2 = vld [vmem:[#allocation5 + $0x268] sm:$0xff]  ;;  %1304 = vmatpush.msrb.mxu3 %v1303_v43  ;;  %v794_v43 = vld [vmem:[#allocation5] sm:$0xff] }
  0xf3   :  { %4785 = vst [vmem:[#allocation58_spill] sm:$0xff] %v3395_v48  ;;  %v810_v22 = vmul.f32 %v3408_v45, %v3230_v13  ;;  %v574_v53 = vmul.f32 1.442695, %v564_v38  ;;  %v3422_v28 = vsel %vm502_vm4, %v3403_v50, 0.0  ;;  %v991_v41 = vmul.f32 %v3408_v45, %v3233_v30  ;;  %1092 = vmatpush.msrb.mxu0 %v1087_v2 }
  0xf4   :  { %4786 = vst [vmem:[#allocation59_spill] sm:$0xff] %v3403_v50  ;;  %v917_v52 = vmul.f32 %v3408_v45, %v3411_v15  ;;  %2521 = vpow2.f32 %v3293_v6  ;;  %v404_v37 = vmul.f32 0.0, %v3395_v48  ;;  %v814_v38 = vmul.f32 %v3422_v28, %v3115_v39  ;;  %v1086_v6 = vld [vmem:[#allocation5 + $0x260] sm:$0xff]  ;;  %890 = vmatpush.msrb.mxu1 %v795_v26  ;;  %v1085_v50 = vld [vmem:[#allocation5 + $0x258] sm:$0xff] }
  0xf5   :  { %4787 = vst [vmem:[#allocation60_spill] sm:$0xff] %v3411_v15  ;;  %v572_v12 = vmul.f32 1.442695, %v563_v34  ;;  %851 = vmatmul.f32.vlgmr.msra.gmra.mxu0 %v810_v22  ;;  %v3434_v63 = vadd.f32 %v3336_v23, %v3310_v61  ;;  %v420_v16 = vmul.f32 0.0, %v3388_v0  ;;  %v483_v14 = vmul.f32 %v3343_v62, %v3343_v62  ;;  %1032 = vmatmul.f32.vlgmr.msra.gmra.mxu3 %v991_v41  ;;  %v1227_v23 = vld [vmem:[#allocation5 + $0x368] sm:$0xff]  ;;  %v1155_v41 = vld [vmem:[#allocation5 + $0x2f8] sm:$0xff] }
  0xf6   :  { %v3439_v1 = vmul.f32 0.0036028198, %v2518_v9  ;;  %958 = vmatmul.f32.vlgmr.msra.gmra.mxu2 %v917_v52  ;;  %v405_v5 = vmul.f32 0.0, %v3369_v57  ;;  %v421_v34 = vmul.f32 0.0, %v3361_v55  ;;  %v584_v22 = vmul.f32 1.442695, %v569_v7  ;;  %863 = vmatmul.f32.vlgmr.msra.gmra.mxu1 %v814_v38 }
  0xf7   :  { %4788 = vst [vmem:[#allocation61_spill] sm:$0xff] %v3434_v63  ;;  %2523 = vpow2.f32 %v572_v12  ;;  %v2520_v30 = vpop.eup %2519  ;;  %v435_v13 = vmul.f32 %v3384_v25, %v3316_v44  ;;  %v4790_v62 = vsub.f32 0.0, %v3086_v36  ;;  %v565_v52 = vsub.f32 0.0, %v3415_v46  ;;  %1232 = vmatpush.msrb.mxu2 %v1227_v23  ;;  %v1302_v7 = vld [vmem:[#allocation5 + $0x3f0] sm:$0xff]  ;;  %1093 = vmatpush.msrb.mxu0 %v1086_v6  ;;  %v1226_v46 = vld [vmem:[#allocation5 + $0x360] sm:$0xff]  ;;  %v1301_v12 = vld [vmem:[#allocation5 + $0x3e8] sm:$0xff] }
  0xf8   :  { %4789 = vst [vmem:[#allocation62_spill] sm:$0xff] %v3439_v1  ;;  %2525 = vpow2.f32 %v574_v53  ;;  %v3452_v2 = vsub.f32 %v3388_v0, %v404_v37  ;;  %v3456_v38 = vadd.f32 %v3322_v4, %v2806_v19  ;;  %v489_v36 = vmul.f32 %v3277_v40, %v3277_v40  ;;  %1305 = vmatpush.msrb.mxu3 %v1302_v7  ;;  %v1084_v40 = vld [vmem:[#allocation5 + $0x250] sm:$0xff]  ;;  %v1082_v7 = vld [vmem:[#allocation5 + $0x240] sm:$0xff] }
  0xf9   :  { %v3447_v9 = vmul.f32 1.442695, %v4790_v62  ;;  %2527 = vpow2.f32 %v3298_v17  ;;  %v3461_v26 = vadd.f32 %v420_v16, %v3395_v48  ;;  %v3464_v53 = vadd.f32 %v483_v14, %v3007_v58  ;;  %891 = vmatpush.msrb.mxu1 %v794_v43  ;;  %v1154_v4 = vld [vmem:[#allocation5 + $0x2f0] sm:$0xff]  ;;  %1233 = vmatpush.msrb.mxu2 %v1226_v46  ;;  %v1083_v62 = vld [vmem:[#allocation5 + $0x248] sm:$0xff] }
  0xfa   :  { %4791 = vst [vmem:[#allocation63_spill] sm:$0xff] %v3456_v38  ;;  %v3469_v17 = vsel %vm503_vm15, %v3439_v1, 0.0  ;;  %v443_v19 = vmul.f32 %v3434_v63, %v3310_v61  ;;  %v3473_v37 = vpop.eup %2521  ;;  %v3476_v16 = vsub.f32 %v3361_v55, %v405_v5  ;;  %v3479_v58 = vadd.f32 %v421_v34, %v3369_v57  ;;  %1094 = vmatpush.msrb.mxu0 %v1085_v50 }
  0xfb   :  { %4792 = vst [vmem:[#allocation64_spill] sm:$0xff] %v3461_v26  ;;  %v3481_v14 = vmul.f32 0.0036028198, %v2520_v30  ;;  %2529 = vpow2.f32 %v584_v22  ;;  %1156 = vmatpush.msra.mxu1 %v1155_v41  ;;  %v3485_v6 = vmul.f32 %v3434_v63, %v3316_v44  ;;  %v3489_v43 = vmul.f32 %v3220_v21, %v3220_v21  ;;  %1306 = vmatpush.msrb.mxu3 %v1301_v12  ;;  %v4798_v44 = vld [vmem:[#allocation15_spill] sm:$0xff]  ;;  %v4799_v22 = vld [vmem:[#allocation25_spill] sm:$0xff] }
  0xfc   :  { %4793 = vst [vmem:[#allocation65_spill] sm:$0xff] %v3464_v53  ;;  %v576_v23 = vmul.f32 1.442695, %v565_v52  ;;  %v694_v5 = vmul.f32 11.090355, %v3148_v20  ;;  %v3494_v30 = vmul.f32 %v3452_v2, %v3388_v0  ;;  %vm500_vm5 = vcmp.le.f32.partialorder %v3263_v54, 5.5625  ;;  %1095 = vmatpush.msrb.mxu0 %v1084_v40 }
  0xfd   :  { %4794 = vst [vmem:[#allocation66_spill] sm:$0xff] %v3476_v16  ;;  %v2524_v34 = vpop.eup %2523  ;;  %vm504_vm7 = vcmp.le.f32.partialorder %v3456_v38, 5.5625  ;;  %v3499_v50 = vadd.f32 %v489_v36, %v4798_v44  ;;  %v815_v21 = vmul.f32 %v3469_v17, %v4799_v22  ;;  %1157 = vmatpush.msra.mxu1 %v1154_v4  ;;  %vm499_vm8 = vcmp.le.f32.partialorder %v3464_v53, 5.5625  ;;  %v1153_v40 = vld [vmem:[#allocation5 + $0x2e8] sm:$0xff]  ;;  %v1225_v4 = vld [vmem:[#allocation5 + $0x358] sm:$0xff]  ;;  %v1938_v54 = vld [vmem:[#allocation5 + $0x800] sm:$0xff] }
  0xfe   :  { %4795 = vst [vmem:[#allocation67_spill] sm:$0xff] %v3479_v58  ;;  %v2526_v52 = vpop.eup %2525  ;;  %v3504_v20 = vmul.f32 0.0036028198, %v2524_v34  ;;  %v3506_v41 = vsub.f32 %v435_v13, %v443_v19  ;;  %v444_v46 = vmul.f32 %v3461_v26, %v3395_v48  ;;  %v3515_v36 = vsel %vm504_vm7, %v3481_v14, 0.0  ;;  %1096 = vmatpush.msrb.mxu0 %v1083_v62  ;;  %v4802_v44 = vld [vmem:[#allocation23_spill] sm:$0xff]  ;;  %v4803_v34 = vld [vmem:[#allocation29_spill] sm:$0xff]  ;;  %1234 = vmatpush.msrb.mxu2 %v1225_v4 }
  0xff   :  { %4796 = vst [vmem:[#allocation68_spill] sm:$0xff] %v3481_v14  ;;  %v3510_v12 = vpop.eup %2527  ;;  %866 = vmatmul.f32.gmra.mxu1 %v815_v21  ;;  %v462_v1 = vmul.f32 %v4803_v34, %v4802_v44  ;;  %v4804_v13 = vld [vmem:[#allocation22_spill] sm:$0xff]  ;;  %2531 = vpow2.f32 %v4806_v35  ;;  %v1300_v14 = vld [vmem:[#allocation5 + $0x3e0] sm:$0xff]  ;;  %v702_v56 = vadd.f32 %v694_v5, %v2944_v27  ;;  %vm505_vm1 = vcmp.le.f32.partialorder %v3499_v50, 5.5625 }
 0x100   :  { %4797 = vst [vmem:[#allocation69_spill] sm:$0xff] %v3485_v6  ;;  %v4805_v19 = vld [vmem:[#allocation26_spill] sm:$0xff]  ;;  %v3525_v21 = vsel %vm499_vm8, %v3504_v20, 0.0  ;;  %1158 = vmatpush.msra.mxu1 %v1153_v40  ;;  %v1152_v48 = vld [vmem:[#allocation5 + $0x2e0] sm:$0xff]  ;;  %2533 = vpow2.f32 %v576_v23  ;;  %1097 = vmatpush.msrb.mxu0 %v1082_v7  ;;  %v3536_v40 = vmul.f32 0.0036028198, %v2526_v52  ;;  %v439_v15 = vmul.f32 %v4799_v22, %v4804_v13 }
 0x101   :  { %4800 = vst [vmem:[#allocation15_spill] sm:$0xff] %v3504_v20  ;;  %v463_v10 = vmul.f32 %v4805_v19, %v4804_v13  ;;  %v4808_v62 = vld [vmem:[#allocation18_spill] sm:$0xff]  ;;  %v2530_v6 = vpop.eup %2529  ;;  %v811_v38 = vmul.f32 %v3525_v21, %v3384_v25  ;;  %v918_v35 = vmul.f32 %v3525_v21, %v3506_v41  ;;  %v992_v53 = vmul.f32 %v3525_v21, %v3434_v63  ;;  %v4809_v20 = vld [vmem:[#allocation19_spill] sm:$0xff]  ;;  %v4810_v7 = vld [vmem:[#allocation36_spill] sm:$0xff] }
 0x102   :  { %4801 = vst [vmem:[#allocation70_spill] sm:$0xff] %v3506_v41  ;;  %v630_v42 = vadd.f32 %v4808_v62, %v3161_v29  ;;  %v1081_v4 = vld [vmem:[#allocation5 + $0x238] sm:$0xff]  ;;  %1307 = vmatpush.msrb.mxu3 %v1300_v14  ;;  %v1224_v23 = vld [vmem:[#allocation5 + $0x350] sm:$0xff]  ;;  %v816_v29 = vmul.f32 %v3515_v36, %v4809_v20  ;;  %1159 = vmatpush.msra.mxu1 %v1152_v48  ;;  %v710_v41 = vsub.f32 0.0, %v702_v56  ;;  %2535 = vpow2.f32 %v3447_v9 }
 0x103   :  { %4807 = vst [vmem:[#allocation23_spill] sm:$0xff] %v3525_v21  ;;  %1235 = vmatpush.msrb.mxu2 %v1224_v23  ;;  %v1299_v27 = vld [vmem:[#allocation5 + $0x3d8] sm:$0xff]  ;;  %854 = vmatmul.f32.gmra.mxu0 %v811_v38  ;;  %v1080_v52 = vld [vmem:[#allocation5 + $0x230] sm:$0xff]  ;;  %v3544_v63 = vadd.f32 %v4810_v7, %v462_v1  ;;  %v3550_v48 = vadd.f32 %v694_v5, %v4808_v62  ;;  %v1079_v5 = vld [vmem:[#allocation5 + $0x228] sm:$0xff]  ;;  %vm2271_vm9 = vcmask 195584  }
 0x104   :  { %v638_v25 = vsub.f32 0.0, %v630_v42  ;;  %961 = vmatmul.f32.gmra.mxu2 %v918_v35  ;;  %v4811_v14 = vld [vmem:[#allocation34_spill] sm:$0xff]  ;;  %v3554_v23 = vmul.f32 %v3479_v58, %v3369_v57  ;;  %v3556_v42 = vmul.f32 0.0036028198, %v2530_v6  ;;  %1035 = vmatmul.f32.gmra.mxu3 %v992_v53  ;;  %v722_v9 = vmul.f32 1.442695, %v710_v41 }
 0x105   :  { %v3547_v21 = vadd.f32 %v4811_v14, %v463_v10  ;;  %1098 = vmatpush.msrb.mxu0 %v1081_v4  ;;  %v2532_v38 = vpop.eup %2531  ;;  %v3560_v1 = vmul.f32 %v3476_v16, %v3369_v57  ;;  %v3563_v10 = vmul.f32 0.0022696343, %v3473_v37  ;;  %1308 = vmatpush.msrb.mxu3 %v1299_v27  ;;  %v3567_v13 = vmul.f32 %v3422_v28, %v3544_v63  ;;  %v1078_v62 = vld [vmem:[#allocation5 + $0x220] sm:$0xff]  ;;  %v1151_v35 = vld [vmem:[#allocation5 + $0x2d8] sm:$0xff]  ;;  %v1223_v4 = vld [vmem:[#allocation5 + $0x348] sm:$0xff] }
 0x106   :  { %4813 = vst [vmem:[#allocation39_spill] sm:$0xff] %v3556_v42  ;;  %v650_v56 = vmul.f32 1.442695, %v638_v25  ;;  %v2534_v25 = vpop.eup %2533  ;;  %v3575_v6 = vadd.f32 %v3489_v43, %v3001_v18  ;;  %v3580_v57 = vsel %vm500_vm5, %v3536_v40, 0.0  ;;  %v3582_v37 = vmul.f32 0.0036028198, %v2532_v38  ;;  %1160 = vmatpush.msra.mxu1 %v1151_v35  ;;  %1236 = vmatpush.msrb.mxu2 %v1223_v4 }
 0x107   :  { %4812 = vst [vmem:[#allocation22_spill] sm:$0xff] %v3547_v21  ;;  %v3571_v53 = vmul.f32 %v3469_v17, %v3547_v21  ;;  %1099 = vmatpush.msrb.mxu0 %v1080_v52  ;;  %869 = vmatmul.f32.gmra.mxu1 %v816_v29  ;;  %v3586_v41 = vsub.f32 %v3494_v30, %v444_v46  ;;  %v4818_v18 = vld [vmem:[#allocation32_spill] sm:$0xff]  ;;  %v4819_v27 = vld [vmem:[#allocation45_spill] sm:$0xff]  ;;  %v4820_v14 = vld [vmem:[#allocation46_spill] sm:$0xff] }
 0x108   :  { %4814 = vst [vmem:[#allocation18_spill] sm:$0xff] %v3563_v10  ;;  %2537 = vpow2.f32 %v650_v56  ;;  %v3589_v43 = vsub.f32 %v439_v15, %v4818_v18  ;;  %v640_v7 = vsub.f32 0.0, %v4819_v27  ;;  %v760_v52 = vsub.f32 0.0, %v4820_v14  ;;  %v1298_v30 = vld [vmem:[#allocation5 + $0x3d0] sm:$0xff]  ;;  %v3603_v15 = vpop.eup %2535  ;;  %v1077_v27 = vld [vmem:[#allocation5 + $0x218] sm:$0xff] }
 0x109   :  { %4815 = vst [vmem:[#allocation36_spill] sm:$0xff] %v3567_v13  ;;  %2539 = vpow2.f32 %v722_v9  ;;  %v3596_v56 = vsel %vm505_vm1, %v3556_v42, 0.0  ;;  %1100 = vmatpush.msrb.mxu0 %v1079_v5  ;;  %v1150_v46 = vld [vmem:[#allocation5 + $0x2d0] sm:$0xff]  ;;  %v3601_v29 = vsel %vm503_vm15, %v3582_v37, 0.0  ;;  %v637_v9 = vsub.f32 0.0, %v3285_v33  ;;  %1309 = vmatpush.msrb.mxu3 %v1298_v30  ;;  %v1222_v33 = vld [vmem:[#allocation5 + $0x340] sm:$0xff] }
 0x10a   :  { %4816 = vst [vmem:[#allocation34_spill] sm:$0xff] %v3571_v53  ;;  %v812_v38 = vmul.f32 %v3580_v57, %v3452_v2  ;;  %v919_v18 = vmul.f32 %v3580_v57, %v3586_v41  ;;  %v3612_v5 = vmul.f32 %v3601_v29, %v3589_v43  ;;  %v993_v35 = vmul.f32 %v3580_v57, %v3461_v26 }
 0x10b   :  { %4817 = vst [vmem:[#allocation71_spill] sm:$0xff] %v3582_v37  ;;  %1101 = vmatpush.msrb.mxu0 %v1078_v62  ;;  %v3616_v14 = vmul.f32 0.0036028198, %v2534_v25  ;;  %1161 = vmatpush.msra.mxu1 %v1150_v46  ;;  %v1297_v37 = vld [vmem:[#allocation5 + $0x3c8] sm:$0xff]  ;;  %v438_v22 = vmul.f32 %v3115_v39, %v4802_v44  ;;  %v3622_v4 = vmul.f32 %v3601_v29, %v3547_v21  ;;  %v3625_v30 = vmul.f32 0.0022696343, %v3510_v12 }
 0x10c   :  { %4821 = vst [vmem:[#allocation32_spill] sm:$0xff] %v3601_v29  ;;  %857 = vmatmul.f32.gmra.mxu0 %v812_v38  ;;  %964 = vmatmul.f32.gmra.mxu2 %v919_v18  ;;  %v437_v25 = vmul.f32 %v3476_v16, %v3361_v55  ;;  %v1076_v62 = vld [vmem:[#allocation5 + $0x210] sm:$0xff]  ;;  %v4827_v46 = vld [vmem:[#allocation31_spill] sm:$0xff]  ;;  %v654_v39 = vmul.f32 1.442695, %v640_v7  ;;  %vm501_vm2 = vcmp.le.f32.partialorder %v3575_v6, 5.5625  ;;  %v3639_v38 = vmul.f32 %v3461_v26, %v3388_v0 }
 0x10d   :  { %4822 = vst [vmem:[#allocation45_spill] sm:$0xff] %v3612_v5  ;;  %v4826_v5 = vld [vmem:[#allocation37_spill] sm:$0xff]  ;;  %v704_v53 = vadd.f32 %v4827_v46, %v3306_v60  ;;  %v3633_v13 = vmul.f32 1.442695, %v760_v52  ;;  %v4828_v12 = vld [vmem:[#allocation50_spill] sm:$0xff]  ;;  %1038 = vmatmul.f32.gmra.mxu3 %v993_v35  ;;  %1102 = vmatpush.msrb.mxu0 %v1077_v27  ;;  %v4829_v18 = vld [vmem:[#allocation51_spill] sm:$0xff] }
 0x10e   :  { %4823 = vst [vmem:[#allocation46_spill] sm:$0xff] %v3616_v14  ;;  %v817_v42 = vmul.f32 %v3596_v56, %v4826_v5  ;;  %v2538_v44 = vpop.eup %2537  ;;  %v636_v21 = vsub.f32 0.0, %v4829_v18  ;;  %v3642_v49 = vmul.f32 1.442695, %v637_v9  ;;  %v1075_v60 = vld [vmem:[#allocation5 + $0x208] sm:$0xff]  ;;  %1237 = vmatpush.msrb.mxu2 %v1222_v33  ;;  %1310 = vmatpush.msrb.mxu3 %v1297_v37  ;;  %v3649_v52 = vsel %vm501_vm2, %v3616_v14, 0.0 }
 0x10f   :  { %4824 = vst [vmem:[#allocation72_spill] sm:$0xff] %v3622_v4  ;;  %v757_v4 = vsub.f32 0.0, %v4828_v12  ;;  %v2540_v29 = vpop.eup %2539  ;;  %v3644_v7 = vmul.f32 0.0036028198, %v2538_v44  ;;  %1103 = vmatpush.msrb.mxu0 %v1076_v62  ;;  %v1074_v27 = vld [vmem:[#allocation5 + $0x200] sm:$0xff]  ;;  %v712_v12 = vsub.f32 0.0, %v704_v53  ;;  %v3659_v37 = vsub.f32 %v437_v25, %v3554_v23 }
 0x110   :  { %4825 = vst [vmem:[#allocation73_spill] sm:$0xff] %v3625_v30  ;;  %v4831_v35 = vld [vmem:[#allocation35_spill] sm:$0xff]  ;;  %v3654_v0 = vmul.f32 0.0022696343, %v2540_v29  ;;  %v4833_v9 = vld [vmem:[#allocation52_spill] sm:$0xff]  ;;  %v641_v33 = vsub.f32 0.0, %v3349_v47  ;;  %872 = vmatmul.f32.gmra.mxu1 %v817_v42  ;;  %v813_v42 = vmul.f32 %v3649_v52, %v3476_v16  ;;  %2541 = vpow2.f32 %v654_v39 }
 0x111   :  { %4830 = vst [vmem:[#allocation31_spill] sm:$0xff] %v3644_v7  ;;  %v3652_v46 = vsub.f32 %v438_v22, %v4831_v35  ;;  %v1149_v44 = vld [vmem:[#allocation5 + $0x2c8] sm:$0xff]  ;;  %v1221_v26 = vld [vmem:[#allocation5 + $0x338] sm:$0xff]  ;;  %v1296_v14 = vld [vmem:[#allocation5 + $0x3c0] sm:$0xff]  ;;  %v3664_v62 = vsel %vm502_vm4, %v3644_v7, 0.0  ;;  %v635_v22 = vsub.f32 0.0, %v3398_v3  ;;  %1104 = vmatpush.msrb.mxu0 %v1075_v60  ;;  %v920_v3 = vmul.f32 %v3649_v52, %v3659_v37 }
 0x112   :  { %4832 = vst [vmem:[#allocation50_spill] sm:$0xff] %v3654_v0  ;;  %v755_v53 = vsub.f32 0.0, %v3401_v11  ;;  %1162 = vmatpush.msra.mxu1 %v1149_v44  ;;  %v1148_v29 = vld [vmem:[#allocation5 + $0x2c0] sm:$0xff]  ;;  %v3675_v23 = vsel %vm502_vm4, %v3654_v0, 0.0  ;;  %1238 = vmatpush.msrb.mxu2 %v1221_v26  ;;  %v1220_v11 = vld [vmem:[#allocation5 + $0x330] sm:$0xff]  ;;  %v3683_v25 = vmul.f32 %v3664_v62, %v3544_v63  ;;  %v994_v60 = vmul.f32 %v3649_v52, %v3479_v58  ;;  %v1295_v35 = vld [vmem:[#allocation5 + $0x3b8] sm:$0xff] }
 0x113   :  { %4834 = vst [vmem:[#allocation51_spill] sm:$0xff] %v3664_v62  ;;  %v3670_v47 = vmul.f32 %v3664_v62, %v3652_v46  ;;  %1311 = vmatpush.msrb.mxu3 %v1296_v14  ;;  %1105 = vmatpush.msrb.mxu0 %v1074_v27  ;;  %v726_v44 = vmul.f32 1.442695, %v712_v12  ;;  %v3689_v18 = vmul.f32 %v3675_v23, %v3652_v46  ;;  %v3695_v39 = vmul.f32 1.442695, %v636_v21  ;;  %v1377_v0 = vld [vmem:[#allocation5 + $0x478] sm:$0xff] }
 0x114   :  { %4836 = vst [vmem:[#allocation52_spill] sm:$0xff] %v3675_v23  ;;  %1163 = vmatpush.msra.mxu1 %v1148_v29  ;;  %v3693_v26 = vmul.f32 %v3675_v23, %v3544_v63  ;;  %v3697_v14 = vmul.f32 1.442695, %v757_v4  ;;  %860 = vmatmul.f32.gmra.mxu0 %v813_v42  ;;  %v705_v27 = vadd.f32 %v3340_v24, %v3356_v32  ;;  %v644_v29 = vmul.f32 1.442695, %v635_v22  ;;  %v4842_v42 = vld [vmem:[#allocation16_spill] sm:$0xff] }
 0x115   :  { %4835 = vst [vmem:[#allocation35_spill] sm:$0xff] %v3670_v47  ;;  %967 = vmatmul.f32.gmra.mxu2 %v920_v3  ;;  %v3701_v12 = vmul.f32 1.442695, %v755_v53  ;;  %1041 = vmatmul.f32.gmra.mxu3 %v994_v60  ;;  %v921_v4 = vmul.f32 %v3422_v28, %v3652_v46  ;;  %v440_v24 = vmul.f32 %v4809_v20, %v4842_v42  ;;  %v4843_v32 = vld [vmem:[#allocation17_spill] sm:$0xff]  ;;  %2543 = vpow2.f32 %v726_v44  ;;  %v4848_v20 = vld [vmem:[#allocation60_spill] sm:$0xff] }
 0x116   :  { %4837 = vst [vmem:[#allocation74_spill] sm:$0xff] %v3683_v25  ;;  %v656_v25 = vmul.f32 1.442695, %v641_v33  ;;  %1239 = vmatpush.msrb.mxu2 %v1220_v11  ;;  %v995_v33 = vmul.f32 %v3422_v28, %v4803_v34  ;;  %1312 = vmatpush.msrb.mxu3 %v1295_v35  ;;  %v464_v22 = vmul.f32 %v4843_v32, %v4842_v42  ;;  %v2542_v3 = vpop.eup %2541  ;;  %v4844_v28 = vld [vmem:[#allocation49_spill] sm:$0xff]  ;;  %v1147_v42 = vld [vmem:[#allocation5 + $0x2b8] sm:$0xff]  ;;  %v758_v44 = vsub.f32 0.0, %v3550_v48 }
 0x117   :  { %4838 = vst [vmem:[#allocation75_spill] sm:$0xff] %v3689_v18  ;;  %v3704_v18 = vmul.f32 0.0036028198, %v3603_v15  ;;  %v1065_v11 = vmul.f32 %v3408_v45, %v4844_v28  ;;  %v3728_v60 = vmul.f32 %v3469_v17, %v4805_v19  ;;  %v4845_v35 = vld [vmem:[#allocation57_spill] sm:$0xff]  ;;  %1164 = vmatpush.msra.mxu1 %v1147_v42  ;;  %1378 = vmatpush.msra.mxu0 %v1377_v0  ;;  %v4846_v34 = vld [vmem:[#allocation30_spill] sm:$0xff]  ;;  %v1218_v48 = vld [vmem:[#allocation5 + $0x320] sm:$0xff] }
 0x118   :  { %4839 = vst [vmem:[#allocation76_spill] sm:$0xff] %v3693_v26  ;;  %v4841_v26 = vld [vmem:[#allocation47_spill] sm:$0xff]  ;;  %2406 = vmatmul.msk.f32.vlgmr.msrb.gmra.mxu1 %vm498_vm3, %v3390_v51  ;;  %v1294_v51 = vld [vmem:[#allocation5 + $0x3b0] sm:$0xff]  ;;  %v3743_v47 = vmul.f32 0.0036028198, %v2542_v3  ;;  %v4850_v62 = vld [vmem:[#allocation20_spill] sm:$0xff]  ;;  %2545 = vpow2.f32 %v656_v25 }
 0x119   :  { %4840 = vst [vmem:[#allocation77_spill] sm:$0xff] %v3704_v18  ;;  %v701_v21 = vadd.f32 %v4841_v26, %v3374_v31  ;;  %v3719_v15 = vsel %vm498_vm3, %v3704_v18, 0.0  ;;  %v713_v31 = vsub.f32 0.0, %v705_v27  ;;  %v467_v26 = vmul.f32 %v4845_v35, %v3310_v61  ;;  %v1146_v45 = vld [vmem:[#allocation5 + $0x2b0] sm:$0xff]  ;;  %1313 = vmatpush.msrb.mxu3 %v1294_v51  ;;  %v4851_v42 = vld [vmem:[#allocation24_spill] sm:$0xff] }
 0x11a   :  { %v3735_v27 = vmul.f32 %v3469_v17, %v3589_v43  ;;  %v1376_v23 = vld [vmem:[#allocation5 + $0x470] sm:$0xff]  ;;  %v3741_v61 = vmul.f32 %v3719_v15, %v4848_v20  ;;  %4849 = vst [vmem:[#allocation47_spill] sm:$0xff] %v3743_v47  ;;  %v3746_v17 = vsub.f32 %v440_v24, %v4850_v62  ;;  %v3749_v0 = vadd.f32 %v4851_v42, %v464_v22  ;;  %v1293_v16 = vld [vmem:[#allocation5 + $0x3a8] sm:$0xff]  ;;  %v2160_v3 = vld [vmem:[#allocation5 + $0x980] sm:$0xff] }
 0x11b   :  { %v709_v53 = vsub.f32 0.0, %v701_v21  ;;  %v1219_v21 = vld [vmem:[#allocation5 + $0x328] sm:$0xff]  ;;  %v4847_v19 = vld [vmem:[#allocation38_spill] sm:$0xff]  ;;  %1165 = vmatpush.msra.mxu1 %v1146_v45  ;;  %1379 = vmatpush.msra.mxu0 %v1376_v23  ;;  %v473_v35 = vmul.f32 %v4826_v5, %v4846_v34  ;;  %2547 = vpow2.f32 %v3642_v49  ;;  %v728_v62 = vmul.f32 1.442695, %v713_v31  ;;  %v2544_v49 = vpop.eup %2543 }
 0x11c   :  { %v449_v7 = vmul.f32 %v4847_v19, %v4846_v34  ;;  %1240 = vmatpush.msrb.mxu2 %v1219_v21  ;;  %v3757_v21 = vsel %vm504_vm7, %v3743_v47, 0.0  ;;  %1106 = vmatmul.f32.vlgmr.msrb.gmra.mxu0 %v1065_v11  ;;  %v3761_v25 = vmul.f32 %v3515_v36, %v3749_v0  ;;  %v3766_v23 = vsel %vm498_vm3, %v3563_v10, 0.0  ;;  %v4854_v24 = vld [vmem:[#allocation69_spill] sm:$0xff]  ;;  %v4856_v31 = vld [vmem:[#allocation40_spill] sm:$0xff]  ;;  %v4858_v11 = vld [vmem:[#allocation55_spill] sm:$0xff] }
 0x11d   :  { %v720_v18 = vmul.f32 1.442695, %v709_v53  ;;  %970 = vmatmul.f32.gmra.mxu2 %v921_v4  ;;  %4853 = vst [vmem:[#allocation16_spill] sm:$0xff] %v3766_v23  ;;  %v770_v34 = vmul.f32 1.442695, %v758_v44  ;;  %1044 = vmatmul.f32.gmra.mxu3 %v995_v33  ;;  %v3769_v22 = vadd.f32 %v467_v26, %v4854_v24  ;;  %v3773_v4 = vmul.f32 %v3757_v21, %v3746_v17  ;;  %v4857_v33 = vld [vmem:[#allocation56_spill] sm:$0xff] }
 0x11e   :  { %1241 = vmatpush.msrb.mxu2 %v1218_v48  ;;  %v3777_v53 = vmul.f32 %v3719_v15, %v4844_v28  ;;  %1314 = vmatpush.msrb.mxu3 %v1293_v16  ;;  %v699_v26 = vadd.f32 %v4858_v11, %v4857_v33  ;;  %v4859_v44 = vld [vmem:[#allocation53_spill] sm:$0xff]  ;;  %v4860_v51 = vld [vmem:[#allocation48_spill] sm:$0xff]  ;;  %v3791_v24 = vmul.f32 %v3766_v23, %v4848_v20  ;;  %v4868_v47 = vld [vmem:[#allocation23_spill] sm:$0xff] }
 0x11f   :  { %2549 = vpow2.f32 %v720_v18  ;;  %v461_v18 = vmul.f32 %v3479_v58, %v3361_v55  ;;  %v700_v45 = vadd.f32 %v4860_v51, %v4859_v44  ;;  %v4861_v48 = vld [vmem:[#allocation41_spill] sm:$0xff]  ;;  %v3795_v16 = vmul.f32 %v3757_v21, %v3749_v0  ;;  %v2546_v55 = vpop.eup %2545  ;;  %v1217_v44 = vld [vmem:[#allocation5 + $0x318] sm:$0xff]  ;;  %v1144_v10 = vld [vmem:[#allocation5 + $0x2a0] sm:$0xff] }
 0x120   :  { %4855 = vst [vmem:[#allocation49_spill] sm:$0xff] %v3777_v53  ;;  %2551 = vpow2.f32 %v4856_v31  ;;  %v3787_v42 = vsub.f32 %v4861_v48, %v449_v7  ;;  %v1145_v33 = vld [vmem:[#allocation5 + $0x2a8] sm:$0xff]  ;;  %v4866_v51 = vld [vmem:[#allocation42_spill] sm:$0xff]  ;;  %v707_v48 = vsub.f32 0.0, %v699_v26  ;;  %v3803_v53 = vmul.f32 0.0022696343, %v2544_v49  ;;  %1242 = vmatpush.msrb.mxu2 %v1217_v44 }
 0x121   :  { %2553 = vpow2.f32 %v644_v29  ;;  %4862 = vst [vmem:[#allocation30_spill] sm:$0xff] %v3791_v24  ;;  %v4864_v29 = vld [vmem:[#allocation15_spill] sm:$0xff]  ;;  %v1375_v11 = vld [vmem:[#allocation5 + $0x468] sm:$0xff]  ;;  %v3801_v7 = vadd.f32 %v473_v35, %v4866_v51  ;;  %v2548_v24 = vpop.eup %2547  ;;  %1166 = vmatpush.msra.mxu1 %v1145_v33  ;;  %v708_v5 = vsub.f32 0.0, %v700_v45  ;;  %v3811_v35 = vmul.f32 %v3766_v23, %v4844_v28  ;;  %v4871_v49 = vld [vmem:[#allocation58_spill] sm:$0xff] }
 0x122   :  { %4863 = vst [vmem:[#allocation60_spill] sm:$0xff] %v3795_v16  ;;  %2555 = vpow2.f32 %v728_v62  ;;  %2407 = vmatmul.msk.f32.gmra.mxu1 %vm499_vm8, %v4864_v29  ;;  %v1066_v16 = vmul.f32 %v4868_v47, %v3769_v22  ;;  %1380 = vmatpush.msra.mxu0 %v1375_v11  ;;  %v1292_v62 = vld [vmem:[#allocation5 + $0x3a0] sm:$0xff]  ;;  %v3807_v29 = vmul.f32 0.0036028198, %v2546_v55  ;;  %v1216_v51 = vld [vmem:[#allocation5 + $0x310] sm:$0xff]  ;;  %v3816_v47 = vadd.f32 %v3560_v1, %v461_v18  ;;  %v1291_v45 = vld [vmem:[#allocation5 + $0x398] sm:$0xff] }
 0x123   :  { %4867 = vst [vmem:[#allocation20_spill] sm:$0xff] %v3803_v53  ;;  %2557 = vpow2.f32 %v770_v34  ;;  %v1374_v58 = vld [vmem:[#allocation5 + $0x460] sm:$0xff]  ;;  %v468_v34 = vmul.f32 %v3452_v2, %v4871_v49  ;;  %1315 = vmatpush.msrb.mxu3 %v1292_v62  ;;  %v3818_v33 = vmul.f32 0.0036028198, %v2548_v24  ;;  %v716_v11 = vmul.f32 1.442695, %v707_v48  ;;  %1167 = vmatpush.msra.mxu1 %v1144_v10 }
 0x124   :  { %4869 = vst [vmem:[#allocation24_spill] sm:$0xff] %v3807_v29  ;;  %1381 = vmatpush.msra.mxu0 %v1374_v58  ;;  %2559 = vpow2.f32 %v3695_v39  ;;  %v3826_v49 = vsel %vm505_vm1, %v3807_v29, 0.0  ;;  %v718_v44 = vmul.f32 1.442695, %v708_v5  ;;  %v3833_v18 = vmul.f32 %v3596_v56, %v3801_v7  ;;  %1243 = vmatpush.msrb.mxu2 %v1216_v51  ;;  %v2023_v31 = vld [vmem:[#allocation5 + $0x8d8] sm:$0xff]  ;;  %v4373_v6 = vld [vmem:[#allocation7 + $0x10] sm:$0xff] }
 0x125   :  { %4870 = vst [vmem:[#allocation63_spill] sm:$0xff] %v3811_v35  ;;  %v2550_v26 = vpop.eup %2549  ;;  %973 = vmatmul.f32.gmra.mxu2 %v3735_v27  ;;  %1109 = vmatmul.f32.gmra.mxu0 %v1066_v16  ;;  %v3838_v58 = vsel %vm501_vm2, %v3818_v33, 0.0  ;;  %v3842_v10 = vmul.f32 %v3826_v49, %v3787_v42  ;;  %2561 = vpow2.f32 %v3701_v12  ;;  %v4875_v39 = vsub.f32 0.0, %v4833_v9  ;;  %v1215_v35 = vld [vmem:[#allocation5 + $0x308] sm:$0xff] }
 0x126   :  { %v3820_v55 = vpop.eup %2551  ;;  %4872 = vst [vmem:[#allocation69_spill] sm:$0xff] %v3826_v49  ;;  %v3828_v62 = vmul.f32 0.0022696343, %v2550_v26  ;;  %1047 = vmatmul.f32.gmra.mxu3 %v3728_v60  ;;  %v3852_v16 = vmul.f32 %v3838_v58, %v3659_v37  ;;  %2563 = vpow2.f32 %v3633_v13  ;;  %v3864_v12 = vmul.f32 %v3838_v58, %v3816_v47  ;;  %v4879_v26 = vld [vmem:[#allocation54_spill] sm:$0xff]  ;;  %1244 = vmatpush.msrb.mxu2 %v1215_v35 }
 0x127   :  { %v2554_v1 = vpop.eup %2553  ;;  %4874 = vst [vmem:[#allocation56_spill] sm:$0xff] %v3842_v10  ;;  %v766_v27 = vmul.f32 1.442695, %v4875_v39  ;;  %1316 = vmatpush.msrb.mxu3 %v1291_v45  ;;  %2565 = vpow2.f32 %v716_v11  ;;  %v3869_v60 = vsel %vm504_vm7, %v3803_v53, 0.0  ;;  %v761_v13 = vsub.f32 0.0, %v4879_v26  ;;  %v1373_v39 = vld [vmem:[#allocation5 + $0x458] sm:$0xff] }
 0x128   :  { %4873 = vst [vmem:[#allocation40_spill] sm:$0xff] %v3828_v62  ;;  %v2556_v5 = vpop.eup %2555  ;;  %v3848_v24 = vmul.f32 0.0036028198, %v2554_v1  ;;  %v3860_v9 = vsel %vm501_vm2, %v3828_v62, 0.0  ;;  %2567 = vpow2.f32 %v718_v44  ;;  %v3883_v45 = vadd.f32 %v468_v34, %v3639_v38  ;;  %v1143_v1 = vld [vmem:[#allocation5 + $0x298] sm:$0xff]  ;;  %1382 = vmatpush.msra.mxu0 %v1373_v39  ;;  %v1290_v38 = vld [vmem:[#allocation5 + $0x390] sm:$0xff] }
 0x129   :  { %v3855_v48 = vpop.eup %2557  ;;  %4876 = vst [vmem:[#allocation55_spill] sm:$0xff] %v3860_v9  ;;  %v3877_v11 = vmul.f32 0.0022696343, %v2556_v5  ;;  %v3891_v53 = vmul.f32 %v3860_v9, %v3659_v37  ;;  %v3895_v44 = vmul.f32 %v3826_v49, %v3801_v7  ;;  %1168 = vmatpush.msra.mxu1 %v1143_v1  ;;  %v1142_v34 = vld [vmem:[#allocation5 + $0x290] sm:$0xff]  ;;  %2569 = vpow2.f32 %v766_v27  ;;  %1317 = vmatpush.msrb.mxu3 %v1290_v38  ;;  %v1214_v1 = vld [vmem:[#allocation5 + $0x300] sm:$0xff] }
 0x12a   :  { %4877 = vst [vmem:[#allocation53_spill] sm:$0xff] %v3864_v12  ;;  %v3875_v51 = vsel %vm499_vm8, %v3848_v24, 0.0  ;;  %2408 = vmatmul.msk.f32.gmra.mxu1 %vm500_vm5, %v3536_v40  ;;  %v4881_v12 = vld [vmem:[#allocation70_spill] sm:$0xff]  ;;  %v2560_v5 = vpop.eup %2559  ;;  %v923_v40 = vmul.f32 %v3515_v36, %v3746_v17  ;;  %v1067_v23 = vmul.f32 %v3580_v57, %v3883_v45  ;;  %v997_v27 = vmul.f32 %v3515_v36, %v4843_v32  ;;  %v1289_v57 = vld [vmem:[#allocation5 + $0x388] sm:$0xff]  ;;  %v1288_v36 = vld [vmem:[#allocation5 + $0x380] sm:$0xff] }
 0x12b   :  { %4878 = vst [vmem:[#allocation48_spill] sm:$0xff] %v3869_v60  ;;  %v3887_v26 = vmul.f32 %v3875_v51, %v4881_v12  ;;  %v1372_v62 = vld [vmem:[#allocation5 + $0x450] sm:$0xff]  ;;  %v3902_v29 = vsel %vm505_vm1, %v3877_v11, 0.0  ;;  %v3910_v39 = vmul.f32 0.0036028198, %v2560_v5  ;;  %1169 = vmatpush.msra.mxu1 %v1142_v34  ;;  %2571 = vpow2.f32 %v3697_v14  ;;  %1245 = vmatpush.msrb.mxu2 %v1214_v1 }
 0x12c   :  { %4880 = vst [vmem:[#allocation41_spill] sm:$0xff] %v3877_v11  ;;  %v3914_v10 = vmul.f32 %v3902_v29, %v3787_v42  ;;  %v3918_v11 = vmul.f32 %v3860_v9, %v3816_v47  ;;  %1383 = vmatpush.msra.mxu0 %v1372_v62  ;;  %v3930_v38 = vmul.f32 %v3875_v51, %v3769_v22 }
 0x12d   :  { %4882 = vst [vmem:[#allocation15_spill] sm:$0xff] %v3891_v53  ;;  %v3906_v53 = vmul.f32 %v3869_v60, %v3746_v17  ;;  %976 = vmatmul.f32.gmra.mxu2 %v923_v40  ;;  %1112 = vmatmul.f32.gmra.mxu0 %v1067_v23  ;;  %v3926_v5 = vsel %vm500_vm5, %v3910_v39, 0.0  ;;  %v3943_v40 = vsel %vm498_vm3, %v3625_v30, 0.0  ;;  %v1517_v30 = vld [vmem:[#allocation5 + $0x578] sm:$0xff] }
 0x12e   :  { %4883 = vst [vmem:[#allocation65_spill] sm:$0xff] %v3895_v44  ;;  %v2562_v44 = vpop.eup %2561  ;;  %1050 = vmatmul.f32.gmra.mxu3 %v997_v27  ;;  %v3934_v62 = vmul.f32 %v3926_v5, %v3586_v41  ;;  %v3949_v1 = vmul.f32 %v3926_v5, %v3883_v45  ;;  %v3953_v27 = vmul.f32 %v3869_v60, %v3749_v0 }
 0x12f   :  { %4884 = vst [vmem:[#allocation42_spill] sm:$0xff] %v3902_v29  ;;  %v2564_v49 = vpop.eup %2563  ;;  %v3938_v23 = vmul.f32 0.0022696343, %v2562_v44  ;;  %1318 = vmatpush.msrb.mxu3 %v1289_v57  ;;  %v3965_v57 = vmul.f32 %v3902_v29, %v3801_v7  ;;  %v1140_v29 = vld [vmem:[#allocation5 + $0x280] sm:$0xff]  ;;  %1518 = vmatpush.msra.mxu2 %v1517_v30  ;;  %v4018_v30 = vmul.f32 %v3943_v40, %v4844_v28 }
 0x130   :  { %4885 = vst [vmem:[#allocation23_spill] sm:$0xff] %v3906_v53  ;;  %v776_v53 = vmul.f32 1.442695, %v761_v13  ;;  %v2566_v35 = vpop.eup %2565 }
 0x131   :  { %4886 = vst [vmem:[#allocation58_spill] sm:$0xff] %v3914_v10  ;;  %v2568_v13 = vpop.eup %2567  ;;  %v3936_v14 = vmul.f32 0.0022696343, %v2566_v35  ;;  %1319 = vmatpush.msrb.mxu3 %v1288_v36  ;;  %v1371_v10 = vld [vmem:[#allocation5 + $0x448] sm:$0xff] }
 0x132   :  { %4887 = vst [vmem:[#allocation54_spill] sm:$0xff] %v3918_v11  ;;  %v3945_v34 = vmul.f32 0.0022696343, %v2568_v13  ;;  %v2570_v35 = vpop.eup %2569  ;;  %v3961_v11 = vmul.f32 0.0022696343, %v3820_v55  ;;  %2573 = vpow2.f32 %v776_v53  ;;  %v4893_v13 = vld [vmem:[#allocation46_spill] sm:$0xff]  ;;  %1384 = vmatpush.msra.mxu0 %v1371_v10 }
 0x133   :  { %4888 = vst [vmem:[#allocation70_spill] sm:$0xff] %v3930_v38  ;;  %v3958_v44 = vsel %vm499_vm8, %v3936_v14, 0.0  ;;  %2409 = vmatmul.msk.f32.gmra.mxu1 %vm501_vm2, %v4893_v13  ;;  %v2572_v36 = vpop.eup %2571  ;;  %v924_v13 = vmul.f32 %v3596_v56, %v3787_v42  ;;  %v1516_v10 = vld [vmem:[#allocation5 + $0x570] sm:$0xff] }
 0x134   :  { %4889 = vst [vmem:[#allocation78_spill] sm:$0xff] %v3945_v34  ;;  %v3973_v60 = vsel %vm500_vm5, %v3945_v34, 0.0  ;;  %v3977_v55 = vmul.f32 %v3958_v44, %v4881_v12  ;;  %v3981_v53 = vmul.f32 %v3958_v44, %v3769_v22  ;;  %v4009_v34 = vmul.f32 0.0022696343, %v2564_v49  ;;  %1519 = vmatpush.msra.mxu2 %v1516_v10 }
 0x135   :  { %4890 = vst [vmem:[#allocation79_spill] sm:$0xff] %v3949_v1  ;;  %v1370_v1 = vld [vmem:[#allocation5 + $0x440] sm:$0xff]  ;;  %v3990_v38 = vmul.f32 %v3973_v60, %v3586_v41  ;;  %v4005_v9 = vmul.f32 %v3973_v60, %v3883_v45  ;;  %979 = vmatmul.f32.gmra.mxu2 %v924_v13 }
 0x136   :  { %4891 = vst [vmem:[#allocation80_spill] sm:$0xff] %v3953_v27  ;;  %v1141_v27 = vld [vmem:[#allocation5 + $0x288] sm:$0xff]  ;;  %1385 = vmatpush.msra.mxu0 %v1370_v1 }
 0x137   :  { %4892 = vst [vmem:[#allocation81_spill] sm:$0xff] %v3965_v57  ;;  %v3984_v57 = vmul.f32 0.0022696343, %v3855_v48  ;;  %1170 = vmatpush.msra.mxu1 %v1141_v27  ;;  %v998_v48 = vmul.f32 %v3596_v56, %v4847_v19  ;;  %v1068_v27 = vmul.f32 %v3649_v52, %v3816_v47  ;;  %v4022_v52 = vmul.f32 %v3943_v40, %v4848_v20  ;;  %v2162_v20 = vld [vmem:[#allocation5 + $0x990] sm:$0xff] }
 0x138   :  { %4894 = vst [vmem:[#allocation46_spill] sm:$0xff] %v3977_v55  ;;  %v3992_v55 = vmul.f32 0.0022696343, %v2570_v35  ;;  %v1591_v35 = vld [vmem:[#allocation5 + $0x5f8] sm:$0xff]  ;;  %v2574_v1 = vpop.eup %2573 }
 0x139   :  { %4895 = vst [vmem:[#allocation82_spill] sm:$0xff] %v3981_v53  ;;  %v3997_v53 = vsel %vm499_vm8, %v3938_v23, 0.0  ;;  %1171 = vmatpush.msra.mxu1 %v1140_v29  ;;  %1115 = vmatmul.f32.gmra.mxu0 %v1068_v27  ;;  %v4032_v49 = vsel %vm502_vm4, %v3984_v57, 0.0  ;;  %v4047_v27 = vmul.f32 0.0022696343, %v2574_v1  ;;  %v1451_v1 = vld [vmem:[#allocation5 + $0x4f8] sm:$0xff] }
 0x13a   :  { %4896 = vst [vmem:[#allocation83_spill] sm:$0xff] %v3990_v38  ;;  %v4007_v38 = vmul.f32 0.0022696343, %v2572_v36  ;;  %v4014_v56 = vsel %vm500_vm5, %v3992_v55, 0.0  ;;  %v4036_v28 = vmul.f32 %v3997_v53, %v3769_v22  ;;  %1053 = vmatmul.f32.gmra.mxu3 %v998_v48  ;;  %v4041_v36 = vsel %vm503_vm15, %v3961_v11, 0.0 }
 0x13b   :  { %4897 = vst [vmem:[#allocation84_spill] sm:$0xff] %v4018_v30  ;;  %v4045_v13 = vmul.f32 %v3997_v53, %v4881_v12  ;;  %1592 = vmatpush.msra.mxu3 %v1591_v35  ;;  %v4055_v22 = vmul.f32 %v4014_v56, %v3586_v41  ;;  %v4060_v48 = vsel %vm504_vm7, %v4009_v34, 0.0  ;;  %v4912_v35 = vld [vmem:[#allocation59_spill] sm:$0xff]  ;;  %1452 = vmatpush.msrb.mxu1 %v1451_v1  ;;  %v1589_v1 = vld [vmem:[#allocation5 + $0x5e8] sm:$0xff] }
 0x13c   :  { %4898 = vst [vmem:[#allocation85_spill] sm:$0xff] %v4022_v52  ;;  %v4027_v29 = vsel %vm501_vm2, %v4007_v38, 0.0  ;;  %v4051_v52 = vmul.f32 %v4014_v56, %v3883_v45  ;;  %v4072_v45 = vmul.f32 %v4032_v49, %v3544_v63  ;;  %2410 = vmatmul.msk.f32.gmra.mxu1 %vm502_vm4, %v4912_v35  ;;  %v1369_v41 = vld [vmem:[#allocation5 + $0x438] sm:$0xff]  ;;  %v1368_v35 = vld [vmem:[#allocation5 + $0x430] sm:$0xff]  ;;  %v1359_v30 = vmul.f32 %v3757_v21, %v4843_v32 }
 0x13d   :  { %4899 = vst [vmem:[#allocation86_spill] sm:$0xff] %v4027_v29  ;;  %v4064_v12 = vmul.f32 %v4027_v29, %v3816_v47  ;;  %v4068_v10 = vmul.f32 %v4027_v29, %v3659_v37  ;;  %v4080_v47 = vsel %vm505_vm1, %v4047_v27, 0.0  ;;  %v4084_v37 = vmul.f32 %v4032_v49, %v3652_v46  ;;  %1386 = vmatpush.msra.mxu0 %v1369_v41  ;;  %v1514_v46 = vld [vmem:[#allocation5 + $0x560] sm:$0xff] }
 0x13e   :  { %4900 = vst [vmem:[#allocation87_spill] sm:$0xff] %v4032_v49  ;;  %v4102_v41 = vmul.f32 %v4060_v48, %v3746_v17  ;;  %v4924_v17 = vld [vmem:[#allocation62_spill] sm:$0xff]  ;;  %v4957_v29 = vld [vmem:[#allocation40_spill] sm:$0xff] }
 0x13f   :  { %4901 = vst [vmem:[#allocation88_spill] sm:$0xff] %v4036_v28  ;;  %1387 = vmatpush.msra.mxu0 %v1368_v35  ;;  %v1513_v35 = vld [vmem:[#allocation5 + $0x558] sm:$0xff] }
 0x140   :  { %4903 = vst [vmem:[#allocation33_spill] sm:$0xff] %v4041_v36 }
 0x141   :  { %4904 = vst [vmem:[#allocation89_spill] sm:$0xff] %v4045_v13  ;;  %v1590_v13 = vld [vmem:[#allocation5 + $0x5f0] sm:$0xff] }
 0x142   :  { %4905 = vst [vmem:[#allocation90_spill] sm:$0xff] %v4047_v27  ;;  %1593 = vmatpush.msra.mxu3 %v1590_v13  ;;  %v4923_v13 = vld [vmem:[#allocation36_spill] sm:$0xff] }
 0x143   :  { %4906 = vst [vmem:[#allocation91_spill] sm:$0xff] %v4051_v52  ;;  %v4918_v52 = vld [vmem:[#allocation43_spill] sm:$0xff]  ;;  %1118 = vmatmul.f32.gmra.mxu0 %v4923_v13  ;;  %1320 = vmatmul.f32.vlgmr.msrb.gmra.mxu3 %v3741_v61  ;;  %v1512_v61 = vld [vmem:[#allocation5 + $0x550] sm:$0xff] }
 0x144   :  { %4907 = vst [vmem:[#allocation92_spill] sm:$0xff] %v4055_v22  ;;  %v1515_v22 = vld [vmem:[#allocation5 + $0x568] sm:$0xff]  ;;  %v1205_v28 = vmul.f32 %v3719_v15, %v4918_v52  ;;  %1594 = vmatpush.msra.mxu3 %v1589_v1  ;;  %2411 = vmatmul.msk.f32.gmra.mxu1 %vm503_vm15, %v4924_v17  ;;  %v1365_v17 = vld [vmem:[#allocation5 + $0x418] sm:$0xff]  ;;  %v1872_v27 = vld [vmem:[#allocation5 + $0x7c0] sm:$0xff] }
 0x145   :  { %4908 = vst [vmem:[#allocation93_spill] sm:$0xff] %v4060_v48  ;;  %1520 = vmatpush.msra.mxu2 %v1515_v22  ;;  %v4110_v22 = vmul.f32 %v4080_v47, %v3787_v42  ;;  %v1448_v42 = vld [vmem:[#allocation5 + $0x4e0] sm:$0xff] }
 0x146   :  { %4909 = vst [vmem:[#allocation94_spill] sm:$0xff] %v4064_v12  ;;  %v4092_v12 = vmul.f32 %v4041_v36, %v3589_v43  ;;  %1246 = vmatmul.f32.vlgmr.msrb.gmra.mxu2 %v1205_v28  ;;  %v1587_v28 = vld [vmem:[#allocation5 + $0x5d8] sm:$0xff]  ;;  %v4927_v1 = vld [vmem:[#allocation68_spill] sm:$0xff] }
 0x147   :  { %4910 = vst [vmem:[#allocation95_spill] sm:$0xff] %v4068_v10  ;;  %v4915_v10 = vld [vmem:[#allocation22_spill] sm:$0xff]  ;;  %1521 = vmatpush.msra.mxu2 %v1514_v46 }
 0x148   :  { %4911 = vst [vmem:[#allocation96_spill] sm:$0xff] %v4072_v45  ;;  %v4088_v63 = vmul.f32 %v4041_v36, %v4915_v10  ;;  %v1450_v45 = vld [vmem:[#allocation5 + $0x4f0] sm:$0xff]  ;;  %v4953_v36 = vld [vmem:[#allocation47_spill] sm:$0xff] }
 0x149   :  { %4913 = vst [vmem:[#allocation59_spill] sm:$0xff] %v4080_v47  ;;  %1453 = vmatpush.msrb.mxu1 %v1450_v45  ;;  %v1449_v45 = vld [vmem:[#allocation5 + $0x4e8] sm:$0xff]  ;;  %1522 = vmatpush.msra.mxu2 %v1513_v35  ;;  %v4926_v46 = vld [vmem:[#allocation34_spill] sm:$0xff] }
 0x14a   :  { %4914 = vst [vmem:[#allocation97_spill] sm:$0xff] %v4084_v37  ;;  %v4098_v37 = vmul.f32 %v4060_v48, %v3749_v0  ;;  %v1367_v0 = vld [vmem:[#allocation5 + $0x428] sm:$0xff]  ;;  %v1586_v35 = vld [vmem:[#allocation5 + $0x5d0] sm:$0xff]  ;;  %v1736_v48 = vld [vmem:[#allocation5 + $0x6e0] sm:$0xff] }
 0x14b   :  { %4916 = vst [vmem:[#allocation22_spill] sm:$0xff] %v4088_v63  ;;  %1388 = vmatpush.msra.mxu0 %v1367_v0  ;;  %1454 = vmatpush.msrb.mxu1 %v1449_v45  ;;  %v1447_v0 = vld [vmem:[#allocation5 + $0x4d8] sm:$0xff]  ;;  %v1511_v45 = vld [vmem:[#allocation5 + $0x548] sm:$0xff] }
 0x14c   :  { %4917 = vst [vmem:[#allocation98_spill] sm:$0xff] %v4092_v12  ;;  %v4106_v12 = vmul.f32 %v4080_v47, %v3801_v7  ;;  %v1588_v7 = vld [vmem:[#allocation5 + $0x5e0] sm:$0xff]  ;;  %1121 = vmatmul.f32.gmra.mxu0 %v4926_v46  ;;  %1323 = vmatmul.f32.gmra.mxu3 %v3887_v26  ;;  %v1363_v26 = vld [vmem:[#allocation5 + $0x408] sm:$0xff]  ;;  %v1809_v63 = vld [vmem:[#allocation5 + $0x758] sm:$0xff] }
 0x14d   :  { %4919 = vst [vmem:[#allocation43_spill] sm:$0xff] %v4098_v37  ;;  %1595 = vmatpush.msra.mxu3 %v1588_v7  ;;  %1455 = vmatpush.msrb.mxu1 %v1448_v42  ;;  %v1446_v7 = vld [vmem:[#allocation5 + $0x4d0] sm:$0xff]  ;;  %v1207_v42 = vmul.f32 %v3926_v5, %v3452_v2  ;;  %v4928_v46 = vld [vmem:[#allocation39_spill] sm:$0xff] }
 0x14e   :  { %4920 = vst [vmem:[#allocation99_spill] sm:$0xff] %v4102_v41  ;;  %v1366_v41 = vld [vmem:[#allocation5 + $0x420] sm:$0xff]  ;;  %1523 = vmatpush.msra.mxu2 %v1512_v61  ;;  %2412 = vmatmul.msk.f32.gmra.mxu1 %vm504_vm7, %v4927_v1  ;;  %v1585_v61 = vld [vmem:[#allocation5 + $0x5c8] sm:$0xff]  ;;  %v4948_v37 = vld [vmem:[#allocation18_spill] sm:$0xff] }
 0x14f   :  { %4921 = vst [vmem:[#allocation100_spill] sm:$0xff] %v4106_v12  ;;  %1389 = vmatpush.msra.mxu0 %v1366_v41  ;;  %1596 = vmatpush.msra.mxu3 %v1587_v28  ;;  %v1364_v41 = vld [vmem:[#allocation5 + $0x410] sm:$0xff]  ;;  %v1362_v28 = vld [vmem:[#allocation5 + $0x400] sm:$0xff]  ;;  %v1445_v1 = vld [vmem:[#allocation5 + $0x4c8] sm:$0xff] }
 0x150   :  { %4922 = vst [vmem:[#allocation101_spill] sm:$0xff] %v4110_v22  ;;  %v4925_v22 = vld [vmem:[#allocation57_spill] sm:$0xff]  ;;  %1456 = vmatpush.msrb.mxu1 %v1447_v0  ;;  %1524 = vmatpush.msra.mxu2 %v1511_v45  ;;  %v1584_v0 = vld [vmem:[#allocation5 + $0x5c0] sm:$0xff]  ;;  %v4929_v45 = vld [vmem:[#allocation66_spill] sm:$0xff] }
 0x151   :  { %v1206_v13 = vmul.f32 %v3875_v51, %v4925_v22  ;;  %1390 = vmatpush.msra.mxu0 %v1365_v17  ;;  %1597 = vmatpush.msra.mxu3 %v1586_v35  ;;  %v1509_v17 = vld [vmem:[#allocation5 + $0x538] sm:$0xff]  ;;  %v1508_v35 = vld [vmem:[#allocation5 + $0x530] sm:$0xff]  ;;  %v1654_v47 = vld [vmem:[#allocation5 + $0x620] sm:$0xff] }
 0x152   :  { %1457 = vmatpush.msrb.mxu1 %v1446_v7  ;;  %v4930_v7 = vld [vmem:[#allocation77_spill] sm:$0xff] }
 0x153   :  { %1249 = vmatmul.f32.gmra.mxu2 %v1206_v13  ;;  %1391 = vmatpush.msra.mxu0 %v1364_v41  ;;  %v1510_v13 = vld [vmem:[#allocation5 + $0x540] sm:$0xff]  ;;  %v1583_v41 = vld [vmem:[#allocation5 + $0x5b8] sm:$0xff] }
 0x154   :  { %1124 = vmatmul.f32.gmra.mxu0 %v3761_v25  ;;  %1326 = vmatmul.f32.gmra.mxu3 %v3934_v62  ;;  %v1208_v25 = vmul.f32 %v3838_v58, %v4929_v45  ;;  %v1444_v62 = vld [vmem:[#allocation5 + $0x4c0] sm:$0xff] }
 0x155   :  { %1392 = vmatpush.msra.mxu0 %v1363_v26  ;;  %1525 = vmatpush.msra.mxu2 %v1510_v13  ;;  %v1665_v26 = vld [vmem:[#allocation5 + $0x678] sm:$0xff]  ;;  %v1507_v13 = vld [vmem:[#allocation5 + $0x528] sm:$0xff] }
 0x156   :  { %1598 = vmatpush.msra.mxu3 %v1585_v61  ;;  %2413 = vmatmul.msk.f32.gmra.mxu1 %vm505_vm1, %v4928_v46  ;;  %v1582_v61 = vld [vmem:[#allocation5 + $0x5b0] sm:$0xff] }
 0x157   :  { %1393 = vmatpush.msra.mxu0 %v1362_v28  ;;  %1458 = vmatpush.msrb.mxu1 %v1445_v1  ;;  %v4932_v28 = vld [vmem:[#allocation51_spill] sm:$0xff] }
 0x158   :  { %1526 = vmatpush.msra.mxu2 %v1509_v17  ;;  %1599 = vmatpush.msra.mxu3 %v1584_v0  ;;  %v4934_v17 = vld [vmem:[#allocation35_spill] sm:$0xff]  ;;  %v1442_v0 = vld [vmem:[#allocation5 + $0x4b0] sm:$0xff] }
 0x159   :  { %1459 = vmatpush.msrb.mxu1 %v1444_v62  ;;  %1666 = vmatpush.msrb.mxu0 %v1665_v26  ;;  %v1506_v62 = vld [vmem:[#allocation5 + $0x520] sm:$0xff] }
 0x15a   :  { %1527 = vmatpush.msra.mxu2 %v1508_v35  ;;  %1600 = vmatpush.msra.mxu3 %v1583_v41  ;;  %v1581_v35 = vld [vmem:[#allocation5 + $0x5a8] sm:$0xff]  ;;  %v1440_v26 = vld [vmem:[#allocation5 + $0x4a0] sm:$0xff] }
 0x15b   :  { %1252 = vmatmul.f32.gmra.mxu2 %v1207_v42  ;;  %v1443_v42 = vld [vmem:[#allocation5 + $0x4b8] sm:$0xff]  ;;  %v1441_v41 = vld [vmem:[#allocation5 + $0x4a8] sm:$0xff] }
 0x15c   :  { %1127 = vmatmul.f32.gmra.mxu0 %v3833_v18  ;;  %1329 = vmatmul.f32.gmra.mxu3 %v3852_v16  ;;  %v4931_v18 = vld [vmem:[#allocation28_spill] sm:$0xff] }
 0x15d   :  { %1460 = vmatpush.msrb.mxu1 %v1443_v42  ;;  %v1209_v46 = vmul.f32 %v4932_v28, %v4931_v18  ;;  %v4933_v16 = vld [vmem:[#allocation44_spill] sm:$0xff]  ;;  %1528 = vmatpush.msra.mxu2 %v1507_v13 }
 0x15e   :  { %2414 = vmatmul.msk.f32.vlgmr.msra.gmra.mxu1 %vm498_vm3, %v4930_v7  ;;  %v1353_v1 = vmul.f32 %v3719_v15, %v4933_v16  ;;  %1601 = vmatpush.msra.mxu3 %v1582_v61  ;;  %v1663_v15 = vld [vmem:[#allocation5 + $0x668] sm:$0xff]  ;;  %v1505_v7 = vld [vmem:[#allocation5 + $0x518] sm:$0xff]  ;;  %v1580_v42 = vld [vmem:[#allocation5 + $0x5a0] sm:$0xff]  ;;  %v2077_v50 = vmul.f32 %v3943_v40, %v4933_v16 }
 0x15f   :  { %1461 = vmatpush.msrb.mxu1 %v1442_v0  ;;  %1529 = vmatpush.msra.mxu2 %v1506_v62  ;;  %v1662_v13 = vld [vmem:[#allocation5 + $0x660] sm:$0xff]  ;;  %v4935_v61 = vld [vmem:[#allocation25_spill] sm:$0xff]  ;;  %v1579_v62 = vld [vmem:[#allocation5 + $0x598] sm:$0xff] }
 0x160   :  { %1602 = vmatpush.msra.mxu3 %v1581_v35  ;;  %v1439_v35 = vld [vmem:[#allocation5 + $0x498] sm:$0xff] }
 0x161   :  { %1462 = vmatpush.msrb.mxu1 %v1441_v41  ;;  %1530 = vmatpush.msra.mxu2 %v1505_v7  ;;  %v1661_v41 = vld [vmem:[#allocation5 + $0x658] sm:$0xff]  ;;  %v1438_v7 = vld [vmem:[#allocation5 + $0x490] sm:$0xff] }
 0x162   :  { %1603 = vmatpush.msra.mxu3 %v1580_v42  ;;  %v1660_v42 = vld [vmem:[#allocation5 + $0x650] sm:$0xff] }
 0x163   :  { %1255 = vmatmul.f32.gmra.mxu2 %v1208_v25  ;;  %v1664_v25 = vld [vmem:[#allocation5 + $0x670] sm:$0xff]  ;;  %1463 = vmatpush.msrb.mxu1 %v1440_v26  ;;  %v4939_v26 = vld [vmem:[#allocation19_spill] sm:$0xff] }
 0x164   :  { %1394 = vmatmul.f32.vlgmr.msra.gmra.mxu0 %v1353_v1  ;;  %1332 = vmatmul.f32.gmra.mxu3 %v4934_v17  ;;  %v4937_v17 = vld [vmem:[#allocation61_spill] sm:$0xff] }
 0x165   :  { %1667 = vmatpush.msrb.mxu0 %v1664_v25  ;;  %v1354_v0 = vmul.f32 %v3875_v51, %v4937_v17  ;;  %v1504_v25 = vld [vmem:[#allocation5 + $0x510] sm:$0xff]  ;;  %1604 = vmatpush.msra.mxu3 %v1579_v62  ;;  %v1437_v62 = vld [vmem:[#allocation5 + $0x488] sm:$0xff] }
 0x166   :  { %2415 = vmatmul.msk.f32.gmra.mxu1 %vm499_vm8, %v3848_v24  ;;  %v4938_v24 = vld [vmem:[#allocation45_spill] sm:$0xff]  ;;  %1531 = vmatpush.msra.mxu2 %v1504_v25  ;;  %v1576_v25 = vld [vmem:[#allocation5 + $0x580] sm:$0xff] }
 0x167   :  { %1668 = vmatpush.msrb.mxu0 %v1663_v15  ;;  %v1503_v15 = vld [vmem:[#allocation5 + $0x508] sm:$0xff]  ;;  %1464 = vmatpush.msrb.mxu1 %v1439_v35  ;;  %v1578_v51 = vld [vmem:[#allocation5 + $0x590] sm:$0xff]  ;;  %v1813_v35 = vld [vmem:[#allocation5 + $0x778] sm:$0xff] }
 0x168   :  { %1532 = vmatpush.msra.mxu2 %v1503_v15  ;;  %1605 = vmatpush.msra.mxu3 %v1578_v51  ;;  %v1658_v15 = vld [vmem:[#allocation5 + $0x640] sm:$0xff]  ;;  %v4941_v51 = vld [vmem:[#allocation37_spill] sm:$0xff] }
 0x169   :  { %1669 = vmatpush.msrb.mxu0 %v1662_v13  ;;  %v1211_v13 = vmul.f32 %v3757_v21, %v4939_v26  ;;  %1465 = vmatpush.msrb.mxu1 %v1438_v7  ;;  %v4942_v7 = vld [vmem:[#allocation69_spill] sm:$0xff] }
 0x16b   :  { %1258 = vmatmul.f32.gmra.mxu2 %v1209_v46  ;;  %v4936_v46 = vld [vmem:[#allocation32_spill] sm:$0xff]  ;;  %1670 = vmatpush.msrb.mxu0 %v1661_v41 }
 0x16c   :  { %v1210_v1 = vmul.f32 %v4936_v46, %v4935_v61  ;;  %1397 = vmatmul.f32.gmra.mxu0 %v1354_v0  ;;  %1335 = vmatmul.f32.gmra.mxu3 %v4938_v24  ;;  %v1502_v24 = vld [vmem:[#allocation5 + $0x500] sm:$0xff] }
 0x16d   :  { %1671 = vmatpush.msrb.mxu0 %v1660_v42  ;;  %1533 = vmatpush.msra.mxu2 %v1502_v24  ;;  %v1436_v41 = vld [vmem:[#allocation5 + $0x480] sm:$0xff]  ;;  %v1812_v24 = vld [vmem:[#allocation5 + $0x770] sm:$0xff] }
 0x16e   :  { %2416 = vmatmul.msk.f32.gmra.mxu1 %vm500_vm5, %v3910_v39  ;;  %v1577_v39 = vld [vmem:[#allocation5 + $0x588] sm:$0xff]  ;;  %v4943_v42 = vld [vmem:[#allocation67_spill] sm:$0xff] }
 0x16f   :  { %1606 = vmatpush.msra.mxu3 %v1577_v39  ;;  %1466 = vmatpush.msrb.mxu1 %v1437_v62  ;;  %v4945_v39 = vld [vmem:[#allocation31_spill] sm:$0xff] }
 0x170   :  { %1814 = vmatpush.msrb.mxu2 %v1813_v35  ;;  %v1657_v62 = vld [vmem:[#allocation5 + $0x638] sm:$0xff]  ;;  %v1811_v35 = vld [vmem:[#allocation5 + $0x768] sm:$0xff] }
 0x171   :  { %1607 = vmatpush.msra.mxu3 %v1576_v25  ;;  %1467 = vmatpush.msrb.mxu1 %v1436_v41  ;;  %v1879_v25 = vld [vmem:[#allocation5 + $0x7f8] sm:$0xff]  ;;  %v1878_v41 = vld [vmem:[#allocation5 + $0x7f0] sm:$0xff] }
 0x172   :  { %1815 = vmatpush.msrb.mxu2 %v1812_v24 }
 0x173   :  { %1261 = vmatmul.f32.gmra.mxu2 %v1210_v1  ;;  %v4940_v1 = vld [vmem:[#allocation64_spill] sm:$0xff]  ;;  %1880 = vmatpush.msrb.mxu3 %v1879_v25  ;;  %v4949_v25 = vld [vmem:[#allocation71_spill] sm:$0xff] }
 0x174   :  { %v1355_v0 = vmul.f32 %v3926_v5, %v4940_v1  ;;  %1338 = vmatmul.f32.gmra.mxu3 %v3773_v4  ;;  %v1659_v5 = vld [vmem:[#allocation5 + $0x648] sm:$0xff]  ;;  %v1212_v4 = vmul.f32 %v4942_v7, %v4941_v51  ;;  %1816 = vmatpush.msrb.mxu2 %v1811_v35 }
 0x175   :  { %1672 = vmatpush.msrb.mxu0 %v1659_v5  ;;  %v4172_v5 = vpop.f32.mrf.mxu0  ;;  %1881 = vmatpush.msrb.mxu3 %v1878_v41  ;;  %v1877_v35 = vld [vmem:[#allocation5 + $0x7e8] sm:$0xff] }
 0x176   :  { %1400 = vmatmul.f32.gmra.mxu0 %v1355_v0  ;;  %2417 = vmatmul.msk.f32.gmra.mxu1 %vm501_vm2, %v3818_v33  ;;  %v4166_v33 = vpop.f32.mrf.mxu1  ;;  %v4944_v0 = vld [vmem:[#allocation56_spill] sm:$0xff] }
 0x177   :  { %1673 = vmatpush.msrb.mxu0 %v1658_v15  ;;  %v4946_v15 = vld [vmem:[#allocation29_spill] sm:$0xff]  ;;  %1882 = vmatpush.msrb.mxu3 %v1877_v35 }
 0x178   :  { %v1655_v41 = vld [vmem:[#allocation5 + $0x628] sm:$0xff] }
 0x179   :  { %1674 = vmatpush.msrb.mxu0 %v1657_v62  ;;  %v4188_v62 = vpop.f32.mrf.mxu3  ;;  %v4951_v35 = vld [vmem:[#allocation21_spill] sm:$0xff] }
 0x17b   :  { %1264 = vmatmul.f32.gmra.mxu2 %v1211_v13  ;;  %v1356_v13 = vmul.f32 %v3838_v58, %v4943_v42  ;;  %v1739_v58 = vld [vmem:[#allocation5 + $0x6f8] sm:$0xff] }
 0x17c   :  { %1341 = vmatmul.f32.gmra.mxu3 %v4944_v0  ;;  %1740 = vmatpush.msra.mxu1 %v1739_v58  ;;  %v4947_v0 = vld [vmem:[#allocation16_spill] sm:$0xff] }
 0x17d   :  { %v1567_v12 = vmul.f32 %v4947_v0, %v4918_v52  ;;  %v1810_v58 = vld [vmem:[#allocation5 + $0x760] sm:$0xff] }
 0x17e   :  { %1403 = vmatmul.f32.gmra.mxu0 %v1356_v13  ;;  %2418 = vmatmul.msk.f32.gmra.mxu1 %vm502_vm4, %v4945_v39  ;;  %v1656_v13 = vld [vmem:[#allocation5 + $0x630] sm:$0xff]  ;;  %v4181_v24 = vpop.f32.mrf.mxu1 }
 0x17f   :  { %v1738_v39 = vld [vmem:[#allocation5 + $0x6f0] sm:$0xff]  ;;  %1675 = vmatpush.msrb.mxu0 %v1656_v13  ;;  %1817 = vmatpush.msrb.mxu2 %v1810_v58 }
 0x180   :  { %1741 = vmatpush.msra.mxu1 %v1738_v39  ;;  %v4950_v13 = vld [vmem:[#allocation26_spill] sm:$0xff] }
 0x181   :  { %v1358_v39 = vmul.f32 %v4936_v46, %v4950_v13  ;;  %1676 = vmatpush.msrb.mxu0 %v1655_v41  ;;  %1818 = vmatpush.msrb.mxu2 %v1809_v63  ;;  %v4952_v41 = vld [vmem:[#allocation27_spill] sm:$0xff] }
 0x182   :  { %v1653_v13 = vld [vmem:[#allocation5 + $0x618] sm:$0xff] }
 0x183   :  { %1267 = vmatmul.f32.gmra.mxu2 %v1212_v4  ;;  %v1357_v4 = vmul.f32 %v4932_v28, %v4946_v15  ;;  %v4183_v28 = vpop.f32.mrf.mxu2  ;;  %1677 = vmatpush.msrb.mxu0 %v1654_v47  ;;  %v1735_v47 = vld [vmem:[#allocation5 + $0x6d8] sm:$0xff] }
 0x184   :  { %1608 = vmatmul.f32.vlgmr.msra.gmra.mxu3 %v1567_v12  ;;  %v1876_v12 = vld [vmem:[#allocation5 + $0x7e0] sm:$0xff]  ;;  %v4954_v15 = vld [vmem:[#allocation78_spill] sm:$0xff] }
 0x185   :  { %1883 = vmatpush.msrb.mxu3 %v1876_v12  ;;  %v1808_v12 = vld [vmem:[#allocation5 + $0x750] sm:$0xff]  ;;  %1678 = vmatpush.msrb.mxu0 %v1653_v13 }
 0x186   :  { %1406 = vmatmul.f32.gmra.mxu0 %v1357_v4  ;;  %2419 = vmatmul.msk.f32.gmra.mxu1 %vm503_vm15, %v4949_v25  ;;  %v4190_v4 = vpop.f32.mrf.mxu0  ;;  %v1568_v25 = vmul.f32 %v3958_v44, %v4925_v22  ;;  %v4199_v58 = vpop.f32.mrf.mxu1 }
 0x187   :  { %v4208_v63 = vpop.f32.mrf.mxu3  ;;  %1819 = vmatpush.msrb.mxu2 %v1808_v12 }
 0x18b   :  { %2422 = vmatmul.msk.f32.vlgmr.msra.gmra.mxu2 %vm498_vm3, %v4948_v37  ;;  %v1737_v37 = vld [vmem:[#allocation5 + $0x6e8] sm:$0xff]  ;;  %v4201_v46 = vpop.f32.mrf.mxu2 }
 0x18c   :  { %1742 = vmatpush.msra.mxu1 %v1737_v37  ;;  %1611 = vmatmul.f32.gmra.mxu3 %v1568_v25  ;;  %v703_v37 = vadd.f32 %v4952_v41, %v4951_v35  ;;  %v1874_v25 = vld [vmem:[#allocation5 + $0x7d0] sm:$0xff] }
 0x18d   :  { %v1652_v35 = vld [vmem:[#allocation5 + $0x610] sm:$0xff] }
 0x18e   :  { %1409 = vmatmul.f32.gmra.mxu0 %v1358_v39  ;;  %1743 = vmatpush.msra.mxu1 %v1736_v48  ;;  %v1875_v39 = vld [vmem:[#allocation5 + $0x7d8] sm:$0xff]  ;;  %v1807_v48 = vld [vmem:[#allocation5 + $0x748] sm:$0xff]  ;;  %v1734_v41 = vld [vmem:[#allocation5 + $0x6d0] sm:$0xff]  ;;  %v711_v49 = vsub.f32 0.0, %v703_v37  ;;  %v4219_v12 = vpop.f32.mrf.mxu1 }
 0x18f   :  { %2420 = vmatmul.msk.f32.gmra.mxu1 %vm504_vm7, %v4953_v36  ;;  %1884 = vmatpush.msrb.mxu3 %v1875_v39  ;;  %v1569_v36 = vmul.f32 %v3973_v60, %v3452_v2  ;;  %v4955_v39 = vld [vmem:[#allocation24_spill] sm:$0xff] }
 0x190   :  { %1744 = vmatpush.msra.mxu1 %v1735_v47  ;;  %1820 = vmatpush.msrb.mxu2 %v1807_v48  ;;  %v724_v13 = vmul.f32 1.442695, %v711_v49  ;;  %v4226_v47 = vpop.f32.mrf.mxu3  ;;  %v1651_v37 = vld [vmem:[#allocation5 + $0x608] sm:$0xff]  ;;  %v1732_v49 = vld [vmem:[#allocation5 + $0x6c0] sm:$0xff] }
 0x191   :  { %1885 = vmatpush.msrb.mxu3 %v1874_v25  ;;  %1679 = vmatpush.msrb.mxu0 %v1652_v35  ;;  %v1873_v48 = vld [vmem:[#allocation5 + $0x7c8] sm:$0xff]  ;;  %v1805_v35 = vld [vmem:[#allocation5 + $0x738] sm:$0xff] }
 0x192   :  { %1745 = vmatpush.msra.mxu1 %v1734_v41  ;;  %v1360_v41 = vmul.f32 %v4942_v7, %v4847_v19  ;;  %2575 = vpow2.f32 %v724_v13  ;;  %v1804_v13 = vld [vmem:[#allocation5 + $0x730] sm:$0xff] }
 0x193   :  { %2423 = vmatmul.msk.f32.gmra.mxu2 %vm499_vm8, %v3936_v14  ;;  %v4210_v14 = vpop.f32.mrf.mxu0  ;;  %v4221_v21 = vpop.f32.mrf.mxu2  ;;  %1680 = vmatpush.msrb.mxu0 %v1651_v37 }
 0x194   :  { %1614 = vmatmul.f32.gmra.mxu3 %v1569_v36  ;;  %v1733_v36 = vld [vmem:[#allocation5 + $0x6c8] sm:$0xff] }
 0x195   :  { %1886 = vmatpush.msrb.mxu3 %v1873_v48  ;;  %1746 = vmatpush.msra.mxu1 %v1733_v36  ;;  %v4958_v36 = vld [vmem:[#allocation49_spill] sm:$0xff] }
 0x196   :  { %1412 = vmatmul.f32.gmra.mxu0 %v1359_v30  ;;  %v1806_v30 = vld [vmem:[#allocation5 + $0x740] sm:$0xff]  ;;  %v893_v37 = vpop.f32.mrf.mxu1 }
 0x197   :  { %2421 = vmatmul.msk.f32.gmra.mxu1 %vm505_vm1, %v4955_v39  ;;  %1821 = vmatpush.msrb.mxu2 %v1806_v30  ;;  %v4956_v39 = vld [vmem:[#allocation55_spill] sm:$0xff]  ;;  %v894_v7 = vadd.f32 %v893_v37, %v4172_v5  ;;  %v1730_v5 = vld [vmem:[#allocation5 + $0x6b0] sm:$0xff] }
 0x198   :  { %v1570_v32 = vmul.f32 %v4956_v39, %v4929_v45  ;;  %1747 = vmatpush.msra.mxu1 %v1732_v49  ;;  %1887 = vmatpush.msrb.mxu3 %v1872_v27  ;;  %v2576_v19 = vpop.eup %2575  ;;  %v1870_v49 = vld [vmem:[#allocation5 + $0x7b0] sm:$0xff] }
 0x199   :  { %1822 = vmatpush.msrb.mxu2 %v1805_v35  ;;  %v983_v48 = vadd.f32 %v4183_v28, %v894_v7  ;;  %v1871_v35 = vld [vmem:[#allocation5 + $0x7b8] sm:$0xff]  ;;  %v4959_v28 = vld [vmem:[#allocation52_spill] sm:$0xff]  ;;  %v1952_v7 = vld [vmem:[#allocation5 + $0x870] sm:$0xff] }
 0x19a   :  { %1888 = vmatpush.msrb.mxu3 %v1871_v35  ;;  %v1571_v37 = vmul.f32 %v4959_v28, %v4931_v18  ;;  %v4960_v39 = vld [vmem:[#allocation50_spill] sm:$0xff]  ;;  %v735_v35 = vmul.f32 0.0022696343, %v2576_v19  ;;  %v1869_v19 = vld [vmem:[#allocation5 + $0x7a8] sm:$0xff] }
 0x19b   :  { %2424 = vmatmul.msk.f32.gmra.mxu2 %vm500_vm5, %v4954_v15  ;;  %v4228_v25 = vpop.f32.mrf.mxu0  ;;  %v1650_v15 = vld [vmem:[#allocation5 + $0x600] sm:$0xff]  ;;  %v4238_v30 = vpop.f32.mrf.mxu2  ;;  %v1057_v27 = vadd.f32 %v4188_v62, %v983_v48 }
 0x19c   :  { %1681 = vmatpush.msrb.mxu0 %v1650_v15  ;;  %1617 = vmatmul.f32.gmra.mxu3 %v1570_v32  ;;  %v4242_v15 = vpop.f32.mrf.mxu3  ;;  %v1953_v32 = vld [vmem:[#allocation5 + $0x878] sm:$0xff] }
 0x19d   :  { %1823 = vmatpush.msrb.mxu2 %v1804_v13  ;;  %1889 = vmatpush.msrb.mxu3 %v1870_v49  ;;  %v4961_v13 = vld [vmem:[#allocation30_spill] sm:$0xff]  ;;  %v1729_v49 = vld [vmem:[#allocation5 + $0x6a8] sm:$0xff] }
 0x19e   :  { %1415 = vmatmul.f32.gmra.mxu0 %v1360_v41  ;;  %v1731_v41 = vld [vmem:[#allocation5 + $0x6b8] sm:$0xff] }
 0x19f   :  { %1468 = vmatmul.f32.vlgmr.msrb.gmra.mxu1 %v4958_v36  ;;  %1954 = vmatpush.msra.mxu0 %v1953_v32  ;;  %v896_v42 = vpop.f32.mrf.mxu1  ;;  %v4962_v32 = vld [vmem:[#allocation70_spill] sm:$0xff] }
 0x1a0   :  { %1748 = vmatpush.msra.mxu1 %v1731_v41  ;;  %v897_v62 = vadd.f32 %v896_v42, %v4190_v4  ;;  %1890 = vmatpush.msrb.mxu3 %v1869_v19  ;;  %v1951_v42 = vld [vmem:[#allocation5 + $0x868] sm:$0xff]  ;;  %v1801_v4 = vld [vmem:[#allocation5 + $0x718] sm:$0xff] }
 0x1a1   :  { %1955 = vmatpush.msra.mxu0 %v1952_v7 }
 0x1a2   :  { %1749 = vmatpush.msra.mxu1 %v1730_v5  ;;  %v984_v41 = vadd.f32 %v4201_v46, %v897_v62  ;;  %v1868_v5 = vld [vmem:[#allocation5 + $0x7a0] sm:$0xff] }
 0x1a3   :  { %2425 = vmatmul.msk.f32.gmra.mxu2 %vm501_vm2, %v4957_v29  ;;  %v1107_v45 = vpop.f32.mrf.mxu0  ;;  %v1803_v29 = vld [vmem:[#allocation5 + $0x728] sm:$0xff]  ;;  %v4254_v48 = vpop.f32.mrf.mxu2  ;;  %1956 = vmatpush.msra.mxu0 %v1951_v42  ;;  %v1728_v46 = vld [vmem:[#allocation5 + $0x6a0] sm:$0xff] }
 0x1a4   :  { %1824 = vmatpush.msrb.mxu2 %v1803_v29  ;;  %v4247_v36 = vadd.f32 %v1107_v45, %v1057_v27  ;;  %1620 = vmatmul.f32.gmra.mxu3 %v1571_v37  ;;  %v4258_v45 = vpop.f32.mrf.mxu3  ;;  %v1802_v29 = vld [vmem:[#allocation5 + $0x720] sm:$0xff]  ;;  %v1058_v37 = vadd.f32 %v4208_v63, %v984_v41 }
 0x1a5   :  { %1750 = vmatpush.msra.mxu1 %v1729_v49  ;;  %1891 = vmatpush.msrb.mxu3 %v1868_v5  ;;  %v4964_v49 = vld [vmem:[#allocation79_spill] sm:$0xff] }
 0x1a6   :  { %1682 = vmatmul.f32.vlgmr.msrb.gmra.mxu0 %v4961_v13  ;;  %1825 = vmatpush.msrb.mxu2 %v1802_v29  ;;  %v1950_v13 = vld [vmem:[#allocation5 + $0x860] sm:$0xff]  ;;  %v1727_v5 = vld [vmem:[#allocation5 + $0x698] sm:$0xff] }
 0x1a7   :  { %1471 = vmatmul.f32.gmra.mxu1 %v4962_v32  ;;  %v4963_v32 = vld [vmem:[#allocation46_spill] sm:$0xff]  ;;  %v899_v29 = vpop.f32.mrf.mxu1  ;;  %1957 = vmatpush.msra.mxu0 %v1950_v13 }
 0x1a8   :  { %1826 = vmatpush.msrb.mxu2 %v1801_v4  ;;  %1751 = vmatpush.msra.mxu1 %v1728_v46  ;;  %v900_v63 = vadd.f32 %v899_v29, %v4210_v14  ;;  %v1867_v4 = vld [vmem:[#allocation5 + $0x798] sm:$0xff]  ;;  %v1866_v46 = vld [vmem:[#allocation5 + $0x790] sm:$0xff] }
 0x1a9   :  { %1892 = vmatpush.msrb.mxu3 %v1867_v4  ;;  %v1726_v13 = vld [vmem:[#allocation5 + $0x690] sm:$0xff] }
 0x1aa   :  { %v985_v19 = vadd.f32 %v4221_v21, %v900_v63  ;;  %1752 = vmatpush.msra.mxu1 %v1727_v5  ;;  %v4965_v21 = vld [vmem:[#allocation48_spill] sm:$0xff]  ;;  %v1948_v29 = vld [vmem:[#allocation5 + $0x850] sm:$0xff] }
 0x1ab   :  { %2426 = vmatmul.msk.f32.gmra.mxu2 %vm502_vm4, %v4960_v39  ;;  %v4262_v39 = vsel %vm503_vm15, %v735_v35, 0.0  ;;  %v1110_v27 = vpop.f32.mrf.mxu0  ;;  %v4273_v41 = vpop.f32.mrf.mxu2  ;;  %1893 = vmatpush.msrb.mxu3 %v1866_v46  ;;  %v1798_v46 = vld [vmem:[#allocation5 + $0x700] sm:$0xff] }
 0x1ac   :  { %v1572_v7 = vmul.f32 %v4262_v39, %v4935_v61  ;;  %v4267_v62 = vadd.f32 %v1110_v27, %v1058_v37  ;;  %v4277_v42 = vpop.f32.mrf.mxu3  ;;  %v1800_v27 = vld [vmem:[#allocation5 + $0x710] sm:$0xff]  ;;  %v1949_v37 = vld [vmem:[#allocation5 + $0x858] sm:$0xff]  ;;  %v1059_v14 = vadd.f32 %v4226_v47, %v985_v19  ;;  %1753 = vmatpush.msra.mxu1 %v1726_v13 }
 0x1ad   :  { %1827 = vmatpush.msrb.mxu2 %v1800_v27  ;;  %1958 = vmatpush.msra.mxu0 %v1949_v37  ;;  %v4967_v27 = vld [vmem:[#allocation83_spill] sm:$0xff]  ;;  %v4968_v37 = vld [vmem:[#allocation53_spill] sm:$0xff] }
 0x1ae   :  { %1685 = vmatmul.f32.gmra.mxu0 %v4963_v32  ;;  %1623 = vmatmul.f32.gmra.mxu3 %v1572_v7  ;;  %v1799_v7 = vld [vmem:[#allocation5 + $0x708] sm:$0xff]  ;;  %v1573_v32 = vmul.f32 %v4965_v21, %v4939_v26  ;;  %v2101_v13 = vld [vmem:[#allocation5 + $0x978] sm:$0xff] }
 0x1af   :  { %1474 = vmatmul.f32.gmra.mxu1 %v4964_v49  ;;  %1828 = vmatpush.msrb.mxu2 %v1799_v7  ;;  %v4966_v49 = vld [vmem:[#allocation20_spill] sm:$0xff]  ;;  %v4970_v26 = vld [vmem:[#allocation41_spill] sm:$0xff] }
 0x1b0   :  { %v902_v4 = vpop.f32.mrf.mxu1  ;;  %1959 = vmatpush.msra.mxu0 %v1948_v29  ;;  %v1865_v7 = vld [vmem:[#allocation5 + $0x788] sm:$0xff]  ;;  %v1724_v29 = vld [vmem:[#allocation5 + $0x680] sm:$0xff] }
 0x1b1   :  { %v903_v47 = vadd.f32 %v902_v4, %v4228_v25  ;;  %1894 = vmatpush.msrb.mxu3 %v1865_v7  ;;  %1829 = vmatpush.msrb.mxu2 %v1798_v46  ;;  %v4971_v7 = vld [vmem:[#allocation15_spill] sm:$0xff] }
 0x1b3   :  { %2427 = vmatmul.msk.f32.gmra.mxu2 %vm503_vm15, %v735_v35  ;;  %v1113_v35 = vpop.f32.mrf.mxu0  ;;  %v4289_v19 = vpop.f32.mrf.mxu2  ;;  %v986_v5 = vadd.f32 %v4238_v30, %v903_v47  ;;  %v4969_v30 = vld [vmem:[#allocation42_spill] sm:$0xff]  ;;  %v1946_v47 = vld [vmem:[#allocation5 + $0x840] sm:$0xff] }
 0x1b4   :  { %v4282_v63 = vadd.f32 %v1113_v35, %v1059_v14  ;;  %v4293_v35 = vpop.f32.mrf.mxu3  ;;  %v1864_v14 = vld [vmem:[#allocation5 + $0x780] sm:$0xff]  ;;  %v1574_v4 = vmul.f32 %v4969_v30, %v4941_v51  ;;  %2102 = vmatpush.msra.mxu2 %v2101_v13  ;;  %v2175_v13 = vld [vmem:[#allocation5 + $0x9f8] sm:$0xff] }
 0x1b5   :  { %v1060_v25 = vadd.f32 %v4242_v15, %v986_v5  ;;  %1895 = vmatpush.msrb.mxu3 %v1864_v14 }
 0x1b6   :  { %1688 = vmatmul.f32.gmra.mxu0 %v4967_v27  ;;  %1626 = vmatmul.f32.gmra.mxu3 %v1573_v32  ;;  %v1725_v27 = vld [vmem:[#allocation5 + $0x688] sm:$0xff] }
 0x1b7   :  { %1477 = vmatmul.f32.gmra.mxu1 %v4968_v37  ;;  %v1947_v32 = vld [vmem:[#allocation5 + $0x848] sm:$0xff]  ;;  %2176 = vmatpush.msra.mxu3 %v2175_v13 }
 0x1b8   :  { %1754 = vmatpush.msra.mxu1 %v1725_v27  ;;  %1960 = vmatpush.msra.mxu0 %v1947_v32  ;;  %v4972_v27 = vld [vmem:[#allocation74_spill] sm:$0xff] }
 0x1b9   :  { %v905_v46 = vpop.f32.mrf.mxu1  ;;  %v2100_v32 = vld [vmem:[#allocation5 + $0x970] sm:$0xff] }
 0x1ba   :  { %1755 = vmatpush.msra.mxu1 %v1724_v29  ;;  %v906_v15 = vadd.f32 %v905_v46, %v4166_v33  ;;  %1961 = vmatpush.msra.mxu0 %v1946_v47  ;;  %v2174_v29 = vld [vmem:[#allocation5 + $0x9f0] sm:$0xff] }
 0x1bb   :  { %2428 = vmatmul.msk.f32.gmra.mxu2 %vm504_vm7, %v4966_v49  ;;  %v1116_v49 = vpop.f32.mrf.mxu0  ;;  %v4305_v5 = vpop.f32.mrf.mxu2  ;;  %v1944_v47 = vld [vmem:[#allocation5 + $0x830] sm:$0xff]  ;;  %2177 = vmatpush.msra.mxu3 %v2174_v29  ;;  %v1943_v29 = vld [vmem:[#allocation5 + $0x828] sm:$0xff] }
 0x1bc   :  { %v4298_v37 = vadd.f32 %v1116_v49, %v1060_v25  ;;  %v987_v14 = vadd.f32 %v4254_v48, %v906_v15  ;;  %v1945_v25 = vld [vmem:[#allocation5 + $0x838] sm:$0xff]  ;;  %2103 = vmatpush.msra.mxu2 %v2100_v32  ;;  %v2026_v48 = vld [vmem:[#allocation5 + $0x8f0] sm:$0xff] }
 0x1bd   :  { %v4309_v49 = vpop.f32.mrf.mxu3  ;;  %1962 = vmatpush.msra.mxu0 %v1945_v25  ;;  %v4973_v15 = vld [vmem:[#allocation75_spill] sm:$0xff]  ;;  %v4975_v32 = vld [vmem:[#allocation73_spill] sm:$0xff]  ;;  %v4976_v25 = vld [vmem:[#allocation72_spill] sm:$0xff] }
 0x1be   :  { %1691 = vmatmul.f32.gmra.mxu0 %v4971_v7  ;;  %1629 = vmatmul.f32.gmra.mxu3 %v1574_v4  ;;  %v2027_v7 = vld [vmem:[#allocation5 + $0x8f8] sm:$0xff]  ;;  %v2099_v4 = vld [vmem:[#allocation5 + $0x968] sm:$0xff]  ;;  %v1061_v33 = vadd.f32 %v4258_v45, %v987_v14 }
 0x1bf   :  { %1480 = vmatmul.f32.gmra.mxu1 %v4972_v27  ;;  %2104 = vmatpush.msra.mxu2 %v2099_v4  ;;  %v4974_v27 = vld [vmem:[#allocation63_spill] sm:$0xff]  ;;  %v2173_v4 = vld [vmem:[#allocation5 + $0x9e8] sm:$0xff] }
 0x1c0   :  { %2028 = vmatpush.msrb.mxu1 %v2027_v7  ;;  %1963 = vmatpush.msra.mxu0 %v1944_v47  ;;  %v2098_v7 = vld [vmem:[#allocation5 + $0x960] sm:$0xff] }
 0x1c1   :  { %v908_v51 = vpop.f32.mrf.mxu1  ;;  %2105 = vmatpush.msra.mxu2 %v2098_v7  ;;  %2178 = vmatpush.msra.mxu3 %v2173_v4  ;;  %v2172_v47 = vld [vmem:[#allocation5 + $0x9e0] sm:$0xff]  ;;  %v2096_v4 = vld [vmem:[#allocation5 + $0x950] sm:$0xff] }
 0x1c2   :  { %v909_v45 = vadd.f32 %v908_v51, %v4181_v24  ;;  %2029 = vmatpush.msrb.mxu1 %v2026_v48  ;;  %v1646_v24 = vmul.f32 %v4262_v39, %v3589_v43  ;;  %1964 = vmatpush.msra.mxu0 %v1943_v29  ;;  %v2024_v48 = vld [vmem:[#allocation5 + $0x8e0] sm:$0xff]  ;;  %v2171_v29 = vld [vmem:[#allocation5 + $0x9d8] sm:$0xff] }
 0x1c3   :  { %2429 = vmatmul.msk.f32.gmra.mxu2 %vm505_vm1, %v4970_v26  ;;  %v1119_v26 = vpop.f32.mrf.mxu0  ;;  %2179 = vmatpush.msra.mxu3 %v2172_v47  ;;  %v1940_v47 = vld [vmem:[#allocation5 + $0x810] sm:$0xff] }
 0x1c4   :  { %v4312_v46 = vadd.f32 %v1119_v26, %v1061_v33  ;;  %v988_v13 = vadd.f32 %v4273_v41, %v909_v45  ;;  %2030 = vmatpush.msrb.mxu1 %v2025_v8  ;;  %v1942_v41 = vld [vmem:[#allocation5 + $0x820] sm:$0xff] }
 0x1c5   :  { %1965 = vmatpush.msra.mxu0 %v1942_v41  ;;  %2180 = vmatpush.msra.mxu3 %v2171_v29  ;;  %v2093_v29 = vld [vmem:[#allocation5 + $0x938] sm:$0xff] }
 0x1c6   :  { %1694 = vmatmul.f32.gmra.mxu0 %v4973_v15  ;;  %2430 = vmatmul.msk.f32.vlgmr.msrb.gmra.mxu3 %vm498_vm3, %v4975_v32  ;;  %v4324_v26 = vpop.f32.mrf.mxu3  ;;  %v2097_v15 = vld [vmem:[#allocation5 + $0x958] sm:$0xff]  ;;  %v1062_v51 = vadd.f32 %v4277_v42, %v988_v13 }
 0x1c7   :  { %1483 = vmatmul.f32.gmra.mxu1 %v4976_v25  ;;  %2106 = vmatpush.msra.mxu2 %v2097_v15  ;;  %v4977_v32 = vld [vmem:[#allocation82_spill] sm:$0xff]  ;;  %v4978_v25 = vld [vmem:[#allocation60_spill] sm:$0xff] }
 0x1c8   :  { %2031 = vmatpush.msrb.mxu1 %v2024_v48  ;;  %v2170_v15 = vld [vmem:[#allocation5 + $0x9d0] sm:$0xff] }
 0x1c9   :  { %v4320_v14 = vpop.f32.mrf.mxu2  ;;  %2107 = vmatpush.msra.mxu2 %v2096_v4  ;;  %2181 = vmatpush.msra.mxu3 %v2170_v15 }
 0x1ca   :  { %2032 = vmatpush.msrb.mxu1 %v2023_v31  ;;  %v4981_v31 = vld [vmem:[#allocation58_spill] sm:$0xff] }
 0x1cb   :  { %1830 = vmatmul.f32.vlgmr.msrb.gmra.mxu2 %v4974_v27  ;;  %v1122_v33 = vpop.f32.mrf.mxu0  ;;  %v911_v45 = vpop.f32.mrf.mxu1 }
 0x1cc   :  { %v4329_v27 = vadd.f32 %v1122_v33, %v1062_v51  ;;  %v912_v42 = vadd.f32 %v911_v45, %v4199_v58  ;;  %v1941_v33 = vld [vmem:[#allocation5 + $0x818] sm:$0xff]  ;;  %v4980_v45 = vld [vmem:[#allocation65_spill] sm:$0xff] }
 0x1cd   :  { %1966 = vmatpush.msra.mxu0 %v1941_v33  ;;  %v2020_v33 = vld [vmem:[#allocation5 + $0x8c0] sm:$0xff] }
 0x1ce   :  { %1697 = vmatmul.f32.gmra.mxu0 %v1646_v24  ;;  %2431 = vmatmul.msk.f32.gmra.mxu3 %vm499_vm8, %v3938_v23  ;;  %v989_v13 = vadd.f32 %v4289_v19, %v912_v42  ;;  %v2095_v23 = vld [vmem:[#allocation5 + $0x948] sm:$0xff]  ;;  %v2022_v19 = vld [vmem:[#allocation5 + $0x8d0] sm:$0xff]  ;;  %v4979_v24 = vld [vmem:[#allocation23_spill] sm:$0xff] }
 0x1cf   :  { %1486 = vmatmul.f32.gmra.mxu1 %v4978_v25  ;;  %v4340_v7 = vpop.f32.mrf.mxu3  ;;  %2108 = vmatpush.msra.mxu2 %v2095_v23  ;;  %v2094_v25 = vld [vmem:[#allocation5 + $0x940] sm:$0xff]  ;;  %v4982_v23 = vld [vmem:[#allocation54_spill] sm:$0xff] }
 0x1d0   :  { %v1063_v58 = vadd.f32 %v4293_v35, %v989_v13  ;;  %1967 = vmatpush.msra.mxu0 %v1940_v47  ;;  %2033 = vmatpush.msrb.mxu1 %v2022_v19  ;;  %v1939_v13 = vld [vmem:[#allocation5 + $0x808] sm:$0xff] }
 0x1d1   :  { %2109 = vmatpush.msra.mxu2 %v2094_v25 }
 0x1d2   :  { %1968 = vmatpush.msra.mxu0 %v1939_v13  ;;  %v1929_v13 = vmul.f32 %v3943_v40, %v4918_v52  ;;  %v1716_v52 = vmul.f32 %v3958_v44, %v4937_v17  ;;  %v1794_v44 = vmul.f32 %v4262_v39, %v4915_v10  ;;  %v1717_v10 = vmul.f32 %v3973_v60, %v4940_v1 }
 0x1d3   :  { %1833 = vmatmul.f32.gmra.mxu2 %v4977_v32  ;;  %v1125_v8 = vpop.f32.mrf.mxu0  ;;  %v914_v41 = vpop.f32.mrf.mxu1  ;;  %v1931_v60 = vmul.f32 %v4014_v56, %v3452_v2 }
 0x1d4   :  { %v4343_v51 = vadd.f32 %v1125_v8, %v1063_v58  ;;  %v915_v35 = vadd.f32 %v914_v41, %v4219_v12  ;;  %1969 = vmatpush.msra.mxu0 %v1938_v54  ;;  %2110 = vmatpush.msra.mxu2 %v2093_v29  ;;  %v1715_v58 = vmul.f32 %v4947_v0, %v4933_v16  ;;  %v2092_v41 = vld [vmem:[#allocation5 + $0x930] sm:$0xff] }
 0x1d5   :  { %v4995_v16 = vld [vmem:[#allocation33_spill] sm:$0xff] }
 0x1d6   :  { %v4336_v43 = vpop.f32.mrf.mxu2  ;;  %1700 = vmatmul.f32.gmra.mxu0 %v4979_v24  ;;  %2432 = vmatmul.msk.f32.gmra.mxu3 %vm500_vm5, %v3992_v55  ;;  %v990_v32 = vadd.f32 %v4305_v5, %v915_v35  ;;  %v2021_v55 = vld [vmem:[#allocation5 + $0x8c8] sm:$0xff]  ;;  %v2168_v5 = vld [vmem:[#allocation5 + $0x9c0] sm:$0xff]  ;;  %v2167_v35 = vld [vmem:[#allocation5 + $0x9b8] sm:$0xff] }
 0x1d7   :  { %1489 = vmatmul.f32.gmra.mxu1 %v4980_v45  ;;  %v4355_v42 = vpop.f32.mrf.mxu3  ;;  %2111 = vmatpush.msra.mxu2 %v2092_v41  ;;  %v2088_v41 = vld [vmem:[#allocation5 + $0x910] sm:$0xff] }
 0x1d8   :  { %v1064_v12 = vadd.f32 %v4309_v49, %v990_v32  ;;  %2034 = vmatpush.msrb.mxu1 %v2021_v55  ;;  %v2019_v32 = vld [vmem:[#allocation5 + $0x8b8] sm:$0xff]  ;;  %2309 = vmatpush.msrb.mxu0 %v4373_v6 }
 0x1da   :  { %2035 = vmatpush.msrb.mxu1 %v2020_v33  ;;  %v2165_v33 = vld [vmem:[#allocation5 + $0x9a8] sm:$0xff] }
 0x1db   :  { %1836 = vmatmul.f32.gmra.mxu2 %v4005_v9  ;;  %v2169_v9 = vld [vmem:[#allocation5 + $0x9c8] sm:$0xff]  ;;  %v1128_v4 = vpop.f32.mrf.mxu0  ;;  %v1173_v15 = vpop.f32.mrf.mxu1 }
 0x1dc   :  { %2182 = vmatpush.msra.mxu3 %v2169_v9  ;;  %v4358_v8 = vadd.f32 %v1128_v4, %v1064_v12  ;;  %v1197_v49 = vadd.f32 %v1173_v15, %v4247_v36  ;;  %v2166_v36 = vld [vmem:[#allocation5 + $0x9b0] sm:$0xff]  ;;  %2036 = vmatpush.msrb.mxu1 %v2019_v32  ;;  %v4983_v9 = vld [vmem:[#allocation76_spill] sm:$0xff]  ;;  %v2015_v32 = vld [vmem:[#allocation5 + $0x898] sm:$0xff] }
 0x1dd   :  { %v2090_v12 = vld [vmem:[#allocation5 + $0x920] sm:$0xff] }
 0x1de   :  { %v4351_v48 = vpop.f32.mrf.mxu2  ;;  %1703 = vmatmul.f32.gmra.mxu0 %v4981_v31  ;;  %2433 = vmatmul.msk.f32.gmra.mxu3 %vm501_vm2, %v4007_v38  ;;  %v1271_v19 = vadd.f32 %v4320_v14, %v1197_v49  ;;  %v2091_v38 = vld [vmem:[#allocation5 + $0x928] sm:$0xff]  ;;  %v2018_v14 = vld [vmem:[#allocation5 + $0x8b0] sm:$0xff] }
 0x1df   :  { %2183 = vmatpush.msra.mxu3 %v2168_v5  ;;  %1756 = vmatmul.f32.vlgmr.msra.gmra.mxu1 %v1715_v58  ;;  %v4371_v24 = vpop.f32.mrf.mxu3  ;;  %v2017_v5 = vld [vmem:[#allocation5 + $0x8a8] sm:$0xff] }
 0x1e0   :  { %v1345_v0 = vadd.f32 %v4324_v26, %v1271_v19  ;;  %2112 = vmatpush.msra.mxu2 %v2091_v38  ;;  %2037 = vmatpush.msrb.mxu1 %v2018_v14  ;;  %v2014_v38 = vld [vmem:[#allocation5 + $0x890] sm:$0xff]  ;;  %v4986_v14 = vld [vmem:[#allocation55_spill] sm:$0xff] }
 0x1e1   :  { %2184 = vmatpush.msra.mxu3 %v2167_v35  ;;  %v2163_v35 = vld [vmem:[#allocation5 + $0x998] sm:$0xff] }
 0x1e2   :  { %2113 = vmatpush.msra.mxu2 %v2090_v12  ;;  %2038 = vmatpush.msrb.mxu1 %v2017_v5  ;;  %v2269_v12 = vld [vmem:[#allocation7 + $0x8] sm:$0xff] }
 0x1e3   :  { %1839 = vmatmul.f32.gmra.mxu2 %v4982_v23  ;;  %v1395_v45 = vpop.f32.mrf.mxu0  ;;  %2185 = vmatpush.msra.mxu3 %v2166_v36  ;;  %v1176_v4 = vpop.f32.mrf.mxu1  ;;  %v1930_v23 = vmul.f32 %v3997_v53, %v4925_v22  ;;  %v4984_v36 = vld [vmem:[#allocation80_spill] sm:$0xff] }
 0x1e4   :  { %v4379_v25 = vadd.f32 %v1395_v45, %v1345_v0  ;;  %v1198_v26 = vadd.f32 %v1176_v4, %v4267_v62  ;;  %2114 = vmatpush.msra.mxu2 %v2089_v59  ;;  %2310 = vmatpush.msrb.mxu0 %v2269_v12 }
 0x1e5   :  { %2186 = vmatpush.msra.mxu3 %v2165_v33 }
 0x1e6   :  { %v4368_v47 = vpop.f32.mrf.mxu2  ;;  %1970 = vmatmul.f32.vlgmr.msra.gmra.mxu0 %v1929_v13  ;;  %2434 = vmatmul.msk.f32.gmra.mxu3 %vm502_vm4, %v3984_v57  ;;  %v1272_v55 = vadd.f32 %v4336_v43, %v1198_v26  ;;  %v2164_v57 = vld [vmem:[#allocation5 + $0x9a0] sm:$0xff] }
 0x1e7   :  { %1759 = vmatmul.f32.gmra.mxu1 %v1716_v52  ;;  %v4391_v29 = vpop.f32.mrf.mxu3  ;;  %v2016_v43 = vld [vmem:[#allocation5 + $0x8a0] sm:$0xff]  ;;  %2187 = vmatpush.msra.mxu3 %v2164_v57  ;;  %v2161_v52 = vld [vmem:[#allocation5 + $0x988] sm:$0xff] }
 0x1e8   :  { %v1346_v62 = vadd.f32 %v4340_v7, %v1272_v55  ;;  %2039 = vmatpush.msrb.mxu1 %v2016_v43  ;;  %2115 = vmatpush.msra.mxu2 %v2088_v41  ;;  %v4985_v13 = vld [vmem:[#allocation67_spill] sm:$0xff]  ;;  %v4991_v43 = vld [vmem:[#allocation29_spill] sm:$0xff] }
 0x1e9   :  { %2188 = vmatpush.msra.mxu3 %v2163_v35  ;;  %v1718_v2 = vmul.f32 %v4986_v14, %v4985_v13  ;;  %v2086_v55 = vld [vmem:[#allocation5 + $0x900] sm:$0xff]  ;;  %v4997_v14 = vld [vmem:[#allocation17_spill] sm:$0xff] }
 0x1ea   :  { %2040 = vmatpush.msrb.mxu1 %v2015_v32  ;;  %v2012_v57 = vld [vmem:[#allocation5 + $0x880] sm:$0xff] }
 0x1eb   :  { %1842 = vmatmul.f32.gmra.mxu2 %v4983_v9  ;;  %v1398_v31 = vpop.f32.mrf.mxu0  ;;  %v1179_v49 = vpop.f32.mrf.mxu1  ;;  %2189 = vmatpush.msra.mxu3 %v2162_v20  ;;  %v4992_v35 = vld [vmem:[#allocation87_spill] sm:$0xff] }
 0x1ec   :  { %v4398_v15 = vadd.f32 %v1398_v31, %v1346_v62  ;;  %v1199_v7 = vadd.f32 %v1179_v49, %v4282_v63  ;;  %2041 = vmatpush.msrb.mxu1 %v2014_v38  ;;  %v4988_v31 = vld [vmem:[#allocation86_spill] sm:$0xff]  ;;  %v4989_v62 = vld [vmem:[#allocation81_spill] sm:$0xff]  ;;  %v1719_v49 = vmul.f32 %v4959_v28, %v4991_v43  ;;  %v1933_v32 = vmul.f32 %v4992_v35, %v4931_v18 }
 0x1ed   :  { %2190 = vmatpush.msra.mxu3 %v2161_v52 }
 0x1ee   :  { %v4388_v54 = vpop.f32.mrf.mxu2  ;;  %1973 = vmatmul.f32.gmra.mxu0 %v1930_v23  ;;  %2435 = vmatmul.msk.f32.gmra.mxu3 %vm503_vm15, %v3961_v11  ;;  %v1273_v58 = vadd.f32 %v4351_v48, %v1199_v7  ;;  %v2087_v11 = vld [vmem:[#allocation5 + $0x908] sm:$0xff]  ;;  %v4990_v23 = vld [vmem:[#allocation90_spill] sm:$0xff] }
 0x1ef   :  { %1762 = vmatmul.f32.gmra.mxu1 %v1717_v10  ;;  %v4409_v19 = vpop.f32.mrf.mxu3  ;;  %2116 = vmatpush.msra.mxu2 %v2087_v11  ;;  %v4994_v11 = vld [vmem:[#allocation26_spill] sm:$0xff] }
 0x1f0   :  { %v1347_v63 = vadd.f32 %v4355_v42, %v1273_v58  ;;  %2191 = vmatpush.msra.mxu3 %v2160_v3  ;;  %v1720_v20 = vmul.f32 %v4262_v39, %v4994_v11 }
 0x1f1   :  { %2117 = vmatpush.msra.mxu2 %v2086_v55 }
 0x1f3   :  { %1845 = vmatmul.f32.gmra.mxu2 %v1794_v44  ;;  %v1401_v45 = vpop.f32.mrf.mxu0  ;;  %v1182_v0 = vpop.f32.mrf.mxu1 }
 0x1f4   :  { %v4414_v48 = vadd.f32 %v1401_v45, %v1347_v63  ;;  %v1200_v42 = vadd.f32 %v1182_v0, %v4298_v37  ;;  %v4987_v37 = vld [vmem:[#allocation66_spill] sm:$0xff]  ;;  %2462 = vmatpush.msrb.mxu2 %v4373_v6 }
 0x1f5   :  { %v1932_v59 = vmul.f32 %v4988_v31, %v4987_v37 }
 0x1f6   :  { %v4406_v22 = vpop.f32.mrf.mxu2  ;;  %1976 = vmatmul.f32.gmra.mxu0 %v1931_v60  ;;  %2436 = vmatmul.msk.f32.gmra.mxu3 %vm504_vm7, %v4009_v34  ;;  %v1274_v4 = vadd.f32 %v4368_v47, %v1200_v42  ;;  %v2013_v34 = vld [vmem:[#allocation5 + $0x888] sm:$0xff]  ;;  %v2268_v60 = vld [vmem:[#allocation7] sm:$0xff] }
 0x1f7   :  { %1765 = vmatmul.f32.gmra.mxu1 %v1718_v2  ;;  %v4424_v26 = vpop.f32.mrf.mxu3  ;;  %2463 = vmatpush.msrb.mxu2 %v2269_v12  ;;  %v1721_v2 = vmul.f32 %v4965_v21, %v4997_v14 }
 0x1f8   :  { %v1348_v5 = vadd.f32 %v4371_v24, %v1274_v4  ;;  %2042 = vmatpush.msrb.mxu1 %v2013_v34  ;;  %2311 = vmatpush.msrb.mxu0 %v2268_v60  ;;  %v5000_v34 = vld [vmem:[#allocation91_spill] sm:$0xff] }
 0x1f9   :  { %2464 = vmatpush.msrb.mxu2 %v2268_v60 }
 0x1fa   :  { %2043 = vmatpush.msrb.mxu1 %v2012_v57 }
 0x1fb   :  { %1848 = vmatmul.f32.gmra.mxu2 %v4984_v36  ;;  %v1404_v33 = vpop.f32.mrf.mxu0  ;;  %v1185_v44 = vpop.f32.mrf.mxu1  ;;  %v1934_v36 = vmul.f32 %v4995_v16, %v4935_v61 }
 0x1fc   :  { %v4430_v47 = vadd.f32 %v1404_v33, %v1348_v5  ;;  %v1201_v24 = vadd.f32 %v1185_v44, %v4312_v46  ;;  %v4993_v46 = vld [vmem:[#allocation84_spill] sm:$0xff]  ;;  %v2079_v33 = vmul.f32 %v4014_v56, %v4940_v1  ;;  %v5002_v44 = vld [vmem:[#allocation37_spill] sm:$0xff]  ;;  %v5003_v56 = vld [vmem:[#allocation59_spill] sm:$0xff] }
 0x1fd   :  { %v1936_v1 = vmul.f32 %v5003_v56, %v5002_v44 }
 0x1fe   :  { %v1265_v9 = vpop.f32.mrf.mxu2  ;;  %1979 = vmatmul.f32.gmra.mxu0 %v1932_v59  ;;  %2437 = vmatmul.msk.f32.gmra.mxu3 %vm505_vm1, %v4990_v23  ;;  %v1275_v6 = vadd.f32 %v4388_v54, %v1201_v24  ;;  %v2080_v23 = vmul.f32 %v4988_v31, %v4985_v13  ;;  %v2081_v31 = vmul.f32 %v4992_v35, %v4991_v43  ;;  %v2261_v43 = vld [vmem:[%s4617_s3 + $0x8] sm:$0xff] }
 0x1ff   :  { %1768 = vmatmul.f32.gmra.mxu1 %v1719_v49  ;;  %v1342_v10 = vpop.f32.mrf.mxu3  ;;  %v5004_v49 = vld [vmem:[#allocation94_spill] sm:$0xff] }
 0x200   :  { %v1349_v41 = vadd.f32 %v4391_v29, %v1275_v6 }
 0x203   :  { %1851 = vmatmul.f32.gmra.mxu2 %v4989_v62  ;;  %v1407_v58 = vpop.f32.mrf.mxu0  ;;  %v1188_v28 = vpop.f32.mrf.mxu1 }
 0x204   :  { %v4445_v45 = vadd.f32 %v1407_v58, %v1349_v41  ;;  %v1202_v54 = vadd.f32 %v1188_v28, %v4329_v27  ;;  %v2078_v27 = vmul.f32 %v3997_v53, %v4937_v17  ;;  %v4998_v53 = vld [vmem:[#allocation19_spill] sm:$0xff]  ;;  %v4999_v17 = vld [vmem:[#allocation93_spill] sm:$0xff]  ;;  %v5006_v28 = vld [vmem:[#allocation96_spill] sm:$0xff] }
 0x205   :  { %v1935_v12 = vmul.f32 %v4999_v17, %v4998_v53  ;;  %v5005_v58 = vld [vmem:[#allocation85_spill] sm:$0xff] }
 0x206   :  { %v1268_v7 = vpop.f32.mrf.mxu2  ;;  %1982 = vmatmul.f32.gmra.mxu0 %v1933_v32  ;;  %2192 = vmatmul.f32.vlgmr.msra.gmra.mxu3 %v4993_v46  ;;  %v1276_v29 = vadd.f32 %v4406_v22, %v1202_v54  ;;  %v4996_v22 = vld [vmem:[#allocation88_spill] sm:$0xff] }
 0x207   :  { %1771 = vmatmul.f32.gmra.mxu1 %v1720_v20  ;;  %v1609_v18 = vpop.f32.mrf.mxu3  ;;  %v2260_v32 = vld [vmem:[%s4617_s3] sm:$0xff] }
 0x208   :  { %v1350_v40 = vadd.f32 %v4409_v19, %v1276_v29 }
 0x20b   :  { %2118 = vmatmul.f32.vlgmr.msra.gmra.mxu2 %v2077_v50  ;;  %v1410_v38 = vpop.f32.mrf.mxu0 }
 0x20c   :  { %v4457_v0 = vadd.f32 %v1410_v38, %v1350_v40  ;;  %v1191_v39 = vpop.f32.mrf.mxu1  ;;  %v5008_v40 = vld [vmem:[#allocation22_spill] sm:$0xff] }
 0x20d   :  { %v1203_v42 = vadd.f32 %v1191_v39, %v4343_v51 }
 0x20e   :  { %v1535_v63 = vpop.f32.mrf.mxu2  ;;  %1985 = vmatmul.f32.gmra.mxu0 %v1934_v36  ;;  %2195 = vmatmul.f32.gmra.mxu3 %v4996_v22  ;;  %v5009_v22 = vld [vmem:[#allocation92_spill] sm:$0xff] }
 0x20f   :  { %v1277_v19 = vadd.f32 %v1265_v9, %v1203_v42  ;;  %1774 = vmatmul.f32.gmra.mxu1 %v1721_v2  ;;  %v1612_v52 = vpop.f32.mrf.mxu3  ;;  %v5001_v9 = vld [vmem:[#allocation38_spill] sm:$0xff] }
 0x210   :  { %v1722_v5 = vmul.f32 %v4969_v30, %v5001_v9 }
 0x211   :  { %v1351_v55 = vadd.f32 %v4424_v26, %v1277_v19 }
 0x213   :  { %2121 = vmatmul.f32.gmra.mxu2 %v2078_v27  ;;  %v1413_v61 = vpop.f32.mrf.mxu0 }
 0x214   :  { %v4468_v3 = vadd.f32 %v1413_v61, %v1351_v55  ;;  %v1194_v51 = vpop.f32.mrf.mxu1 }
 0x215   :  { %v1204_v21 = vadd.f32 %v1194_v51, %v4358_v8 }
 0x216   :  { %v1538_v4 = vpop.f32.mrf.mxu2  ;;  %1988 = vmatmul.f32.gmra.mxu0 %v1935_v12  ;;  %2198 = vmatmul.f32.gmra.mxu3 %v5000_v34  ;;  %v5011_v12 = vld [vmem:[#allocation95_spill] sm:$0xff]  ;;  %v2084_v34 = vmul.f32 %v5003_v56, %v5001_v9  ;;  %v2266_v56 = vld [vmem:[%s4617_s3 + $0x30] sm:$0xff] }
 0x217   :  { %v1278_v26 = vadd.f32 %v1268_v7, %v1204_v21  ;;  %1777 = vmatmul.f32.gmra.mxu1 %v1722_v5  ;;  %v1615_v59 = vpop.f32.mrf.mxu3  ;;  %v5012_v5 = vld [vmem:[#allocation100_spill] sm:$0xff] }
 0x218   :  { %v2264_v9 = vld [vmem:[%s4617_s3 + $0x20] sm:$0xff] }
 0x219   :  { %v1352_v62 = vadd.f32 %v1342_v10, %v1278_v26 }
 0x21b   :  { %2124 = vmatmul.f32.gmra.mxu2 %v2079_v33  ;;  %v1416_v57 = vpop.f32.mrf.mxu0 }
 0x21c   :  { %v4478_v24 = vadd.f32 %v1416_v57, %v1352_v62  ;;  %v1469_v8 = vpop.f32.mrf.mxu1  ;;  %v5013_v57 = vld [vmem:[#allocation97_spill] sm:$0xff] }
 0x21d   :  { %v1493_v30 = vadd.f32 %v1469_v8, %v4379_v25 }
 0x21e   :  { %v1541_v37 = vpop.f32.mrf.mxu2  ;;  %1991 = vmatmul.f32.gmra.mxu0 %v1936_v1  ;;  %2201 = vmatmul.f32.gmra.mxu3 %v5004_v49 }
 0x21f   :  { %v1559_v6 = vadd.f32 %v1535_v63, %v1493_v30  ;;  %2044 = vmatmul.f32.vlgmr.msrb.gmra.mxu1 %v5005_v58  ;;  %v1618_v10 = vpop.f32.mrf.mxu3  ;;  %v5007_v63 = vld [vmem:[#allocation89_spill] sm:$0xff] }
 0x221   :  { %v1633_v13 = vadd.f32 %v1609_v18, %v1559_v6  ;;  %v2082_v18 = vmul.f32 %v4995_v16, %v4994_v11  ;;  %v2262_v11 = vld [vmem:[%s4617_s3 + $0x10] sm:$0xff] }
 0x223   :  { %2127 = vmatmul.f32.gmra.mxu2 %v2080_v23  ;;  %v1683_v41 = vpop.f32.mrf.mxu0 }
 0x224   :  { %v4488_v50 = vadd.f32 %v1683_v41, %v1633_v13  ;;  %v1472_v25 = vpop.f32.mrf.mxu1  ;;  %v2267_v41 = vld [vmem:[%s4617_s3 + $0x38] sm:$0xff] }
 0x225   :  { %v1494_v46 = vadd.f32 %v1472_v25, %v4398_v15 }
 0x226   :  { %v1544_v7 = vpop.f32.mrf.mxu2  ;;  %2438 = vmatmul.msk.f32.vlgmr.msrb.gmra.mxu0 %vm2271_vm9, %v2260_v32  ;;  %2204 = vmatmul.f32.gmra.mxu3 %v5006_v28 }
 0x227   :  { %v1560_v20 = vadd.f32 %v1538_v4, %v1494_v46  ;;  %2047 = vmatmul.f32.gmra.mxu1 %v5007_v63  ;;  %v1621_v29 = vpop.f32.mrf.mxu3  ;;  %v2083_v4 = vmul.f32 %v4999_v17, %v4997_v14  ;;  %v2263_v14 = vld [vmem:[%s4617_s3 + $0x18] sm:$0xff] }
 0x228   :  { %v5015_v46 = vld [vmem:[#allocation99_spill] sm:$0xff] }
 0x229   :  { %v1634_v35 = vadd.f32 %v1612_v52, %v1560_v20  ;;  %v5010_v52 = vld [vmem:[#allocation43_spill] sm:$0xff] }
 0x22b   :  { %2130 = vmatmul.f32.gmra.mxu2 %v2081_v31  ;;  %v1686_v60 = vpop.f32.mrf.mxu0 }
 0x22c   :  { %v4499_v38 = vadd.f32 %v1686_v60, %v1634_v35  ;;  %v1475_v15 = vpop.f32.mrf.mxu1 }
 0x22d   :  { %v1495_v36 = vadd.f32 %v1475_v15, %v4414_v48  ;;  %v5016_v15 = vld [vmem:[#allocation101_spill] sm:$0xff] }
 0x22e   :  { %v1547_v54 = vpop.f32.mrf.mxu2  ;;  %2439 = vmatmul.msk.f32.gmra.mxu0 %vm2271_vm9, %v2261_v43  ;;  %2207 = vmatmul.f32.gmra.mxu3 %v5008_v40 }
 0x22f   :  { %v1561_v39 = vadd.f32 %v1541_v37, %v1495_v36  ;;  %2050 = vmatmul.f32.gmra.mxu1 %v5009_v22 }
 0x231   :  { %v1624_v42 = vpop.f32.mrf.mxu3  ;;  %v1635_v16 = vadd.f32 %v1615_v59, %v1561_v39 }
 0x233   :  { %2133 = vmatmul.f32.gmra.mxu2 %v2082_v18  ;;  %v1689_v2 = vpop.f32.mrf.mxu0 }
 0x234   :  { %v4510_v19 = vadd.f32 %v1689_v2, %v1635_v16  ;;  %v1478_v48 = vpop.f32.mrf.mxu1 }
 0x235   :  { %v1496_v61 = vadd.f32 %v1478_v48, %v4430_v47 }
 0x236   :  { %v1550_v27 = vpop.f32.mrf.mxu2  ;;  %2440 = vmatmul.msk.f32.gmra.mxu0 %vm2271_vm9, %v2262_v11  ;;  %2210 = vmatmul.f32.gmra.mxu3 %v5010_v52 }
 0x237   :  { %v1562_v53 = vadd.f32 %v1544_v7, %v1496_v61  ;;  %2053 = vmatmul.f32.gmra.mxu1 %v5011_v12  ;;  %v5014_v7 = vld [vmem:[#allocation98_spill] sm:$0xff] }
 0x239   :  { %v1627_v33 = vpop.f32.mrf.mxu3  ;;  %v1636_v17 = vadd.f32 %v1618_v10, %v1562_v53  ;;  %v2265_v10 = vld [vmem:[%s4617_s3 + $0x28] sm:$0xff]  ;;  %s2714_s3 = smov [#allocation10]  }
 0x23a   :  { %s2357_s20 = sshll.u32 %s2714_s3, 4  ;;  %s2358_s20 = int_to_ptr.vmem [resolvable:$true] %s2357_s20 }
 0x23b   :  { %2136 = vmatmul.f32.gmra.mxu2 %v2083_v4  ;;  %v1692_v51 = vpop.f32.mrf.mxu0 }
 0x23c   :  { %v4521_v21 = vadd.f32 %v1692_v51, %v1636_v17  ;;  %v1481_v47 = vpop.f32.mrf.mxu1 }
 0x23d   :  { %v1497_v37 = vadd.f32 %v1481_v47, %v4445_v45 }
 0x23e   :  { %v1553_v55 = vpop.f32.mrf.mxu2  ;;  %2441 = vmatmul.msk.f32.gmra.mxu0 %vm2271_vm9, %v2263_v14  ;;  %2213 = vmatmul.f32.gmra.mxu3 %v5012_v5 }
 0x23f   :  { %v1563_v59 = vadd.f32 %v1547_v54, %v1497_v37  ;;  %2056 = vmatmul.f32.gmra.mxu1 %v5013_v57 }
 0x241   :  { %v1630_v62 = vpop.f32.mrf.mxu3  ;;  %v1637_v1 = vadd.f32 %v1621_v29, %v1563_v59 }
 0x243   :  { %2139 = vmatmul.f32.gmra.mxu2 %v2084_v34  ;;  %v1695_v44 = vpop.f32.mrf.mxu0 }
 0x244   :  { %v1711_v23 = vadd.f32 %v1695_v44, %v1637_v1  ;;  %v1484_v45 = vpop.f32.mrf.mxu1 }
 0x245   :  { %v1498_v8 = vadd.f32 %v1484_v45, %v4457_v0 }
 0x246   :  { %v1556_v26 = vpop.f32.mrf.mxu2  ;;  %2442 = vmatmul.msk.f32.gmra.mxu0 %vm2271_vm9, %v2264_v9 }
 0x247   :  { %v1564_v30 = vadd.f32 %v1550_v27, %v1498_v8  ;;  %2059 = vmatmul.f32.gmra.mxu1 %v5014_v7 }
 0x249   :  { %v4537_v6 = vpop.f32.mrf.mxu3  ;;  %v1638_v32 = vadd.f32 %v1624_v42, %v1564_v30 }
 0x24b   :  { %2444 = vmatmul.msk.f32.vlgmr.msrb.gmra.mxu2 %vm2271_vm9, %v2266_v56  ;;  %v1698_v58 = vpop.f32.mrf.mxu0 }
 0x24c   :  { %v1712_v13 = vadd.f32 %v1698_v58, %v1638_v32  ;;  %v1487_v0 = vpop.f32.mrf.mxu1 }
 0x24d   :  { %v1499_v31 = vadd.f32 %v1487_v0, %v4468_v3 }
 0x24e   :  { %v1831_v49 = vpop.f32.mrf.mxu2  ;;  %2443 = vmatmul.msk.f32.gmra.mxu0 %vm2271_vm9, %v2265_v10 }
 0x24f   :  { %v1565_v28 = vadd.f32 %v1553_v55, %v1499_v31  ;;  %2062 = vmatmul.f32.gmra.mxu1 %v5015_v46 }
 0x251   :  { %v4549_v54 = vpop.f32.mrf.mxu3  ;;  %v1639_v63 = vadd.f32 %v1627_v33, %v1565_v28 }
 0x253   :  { %2445 = vmatmul.msk.f32.gmra.mxu2 %vm2271_vm9, %v2267_v41  ;;  %v1701_v20 = vpop.f32.mrf.mxu0 }
 0x254   :  { %v1713_v29 = vadd.f32 %v1701_v20, %v1639_v63  ;;  %v1490_v60 = vpop.f32.mrf.mxu1 }
 0x255   :  { %v1500_v43 = vadd.f32 %v1490_v60, %v4478_v24 }
 0x256   :  { %v1834_v25 = vpop.f32.mrf.mxu2 }
 0x257   :  { %v1566_v18 = vadd.f32 %v1556_v26, %v1500_v43  ;;  %2065 = vmatmul.f32.gmra.mxu1 %v5016_v15 }
 0x259   :  { %v4553_v40 = vpop.f32.mrf.mxu3  ;;  %v1640_v3 = vadd.f32 %v1630_v62, %v1566_v18 }
 0x25b   :  { %v1704_v36 = vpop.f32.mrf.mxu0 }
 0x25c   :  { %v1714_v27 = vadd.f32 %v1704_v36, %v1640_v3  ;;  %v1757_v39 = vpop.f32.mrf.mxu1 }
 0x25d   :  { %v1781_v22 = vadd.f32 %v1757_v39, %v4488_v50 }
 0x25e   :  { %v1837_v35 = vpop.f32.mrf.mxu2 }
 0x25f   :  { %v1855_v2 = vadd.f32 %v1831_v49, %v1781_v22 }
 0x261   :  { %v4556_v11 = vpop.f32.mrf.mxu3  ;;  %v1921_v31 = vadd.f32 %v4537_v6, %v1855_v2 }
 0x263   :  { %v1971_v16 = vpop.f32.mrf.mxu0 }
 0x264   :  { %v1760_v4 = vpop.f32.mrf.mxu1 }
 0x265   :  { %v1782_v24 = vadd.f32 %v1760_v4, %v4499_v38 }
 0x266   :  { %v1840_v42 = vpop.f32.mrf.mxu2 }
 0x267   :  { %v1856_v52 = vadd.f32 %v1834_v25, %v1782_v24  ;;  %v1995_v25 = vadd.f32 %v1971_v16, %v1921_v31 }
 0x269   :  { %v4559_v55 = vpop.f32.mrf.mxu3 }
 0x26b   :  { %v1974_v61 = vpop.f32.mrf.mxu0 }
 0x26c   :  { %v1763_v53 = vpop.f32.mrf.mxu1 }
 0x26d   :  { %v1783_v12 = vadd.f32 %v1763_v53, %v4510_v19 }
 0x26e   :  { %v1843_v48 = vpop.f32.mrf.mxu2 }
 0x26f   :  { %v1857_v51 = vadd.f32 %v1837_v35, %v1783_v12  ;;  %v1922_v35 = vadd.f32 %v4549_v54, %v1856_v52 }
 0x271   :  { %v4562_v17 = vpop.f32.mrf.mxu3  ;;  %v1996_v15 = vadd.f32 %v1974_v61, %v1922_v35  ;;  %v1923_v16 = vadd.f32 %v4553_v40, %v1857_v51 }
 0x273   :  { %v1977_v14 = vpop.f32.mrf.mxu0 }
 0x274   :  { %v1766_v50 = vpop.f32.mrf.mxu1  ;;  %v1997_v24 = vadd.f32 %v1977_v14, %v1923_v16 }
 0x275   :  { %v1784_v34 = vadd.f32 %v1766_v50, %v4521_v21 }
 0x276   :  { %v1846_v33 = vpop.f32.mrf.mxu2 }
 0x277   :  { %v1858_v5 = vadd.f32 %v1840_v42, %v1784_v34 }
 0x279   :  { %v4565_v59 = vpop.f32.mrf.mxu3  ;;  %v1924_v50 = vadd.f32 %v4556_v11, %v1858_v5 }
 0x27b   :  { %v1980_v37 = vpop.f32.mrf.mxu0 }
 0x27c   :  { %v1769_v38 = vpop.f32.mrf.mxu1 }
 0x27d   :  { %v1785_v26 = vadd.f32 %v1769_v38, %v1711_v23  ;;  %v1998_v38 = vadd.f32 %v1980_v37, %v1924_v50 }
 0x27e   :  { %v1849_v47 = vpop.f32.mrf.mxu2 }
 0x27f   :  { %v1859_v62 = vadd.f32 %v1843_v48, %v1785_v26 }
 0x281   :  { %v4571_v45 = vpop.f32.mrf.mxu3 }
 0x283   :  { %v4567_v44 = vpop.f32.mrf.mxu0 }
 0x284   :  { %v1772_v19 = vpop.f32.mrf.mxu1 }
 0x285   :  { %v1786_v9 = vadd.f32 %v1772_v19, %v1712_v13 }
 0x286   :  { %v1852_v57 = vpop.f32.mrf.mxu2 }
 0x287   :  { %v4569_v1 = vadd.f32 %v1846_v33, %v1786_v9  ;;  %v1925_v9 = vadd.f32 %v4559_v55, %v1859_v62 }
 0x289   :  { %v2193_v58 = vpop.f32.mrf.mxu3 }
 0x28b   :  { %v4573_v8 = vpop.f32.mrf.mxu0 }
 0x28c   :  { %v1775_v21 = vpop.f32.mrf.mxu1 }
 0x28d   :  { %v1787_v49 = vadd.f32 %v1775_v21, %v1713_v29  ;;  %v4584_v29 = vld [vmem:[#allocation8] ss:$0 sm:$0xff] }
 0x28e   :  { %v2119_v56 = vpop.f32.mrf.mxu2 }
 0x28f   :  { %v4575_v7 = vadd.f32 %v1849_v47, %v1787_v49  ;;  %v1999_v49 = vadd.f32 %v4567_v44, %v1925_v9 }
 0x291   :  { %v2196_v46 = vpop.f32.mrf.mxu3 }
 0x293   :  { %v4577_v23 = vpop.f32.mrf.mxu0 }
 0x294   :  { %v1778_v10 = vpop.f32.mrf.mxu1 }
 0x295   :  { %v1788_v41 = vadd.f32 %v1778_v10, %v1714_v27 }
 0x296   :  { %v2122_v30 = vpop.f32.mrf.mxu2 }
 0x297   :  { %v4579_v0 = vadd.f32 %v1852_v57, %v1788_v41 }
 0x299   :  { %v2199_v22 = vpop.f32.mrf.mxu3 }
 0x29b   :  { %v4581_v13 = vpop.f32.mrf.mxu0 }
 0x29c   :  { %v2045_v28 = vpop.f32.mrf.mxu1 }
 0x29d   :  { %v2069_v20 = vadd.f32 %v2045_v28, %v1995_v25 }
 0x29e   :  { %v2125_v32 = vpop.f32.mrf.mxu2 }
 0x29f   :  { %v2143_v60 = vadd.f32 %v2119_v56, %v2069_v20 }
 0x2a1   :  { %v2217_v18 = vadd.f32 %v2193_v58, %v2143_v60  ;;  %v2202_v12 = vpop.f32.mrf.mxu3  ;;  %v1927_v60 = vadd.f32 %v4565_v59, %v4575_v7 }
 0x2a3   :  { %v2313_v43 = vpop.f32.mrf.mxu0  ;;  %v2233_v36 = vadd.f32 %v4584_v29, %v2217_v18  ;;  %v2001_v18 = vadd.f32 %v4577_v23, %v1927_v60 }
 0x2a4   :  { %v2048_v3 = vpop.f32.mrf.mxu1 }
 0x2a5   :  { %v2070_v27 = vadd.f32 %v2048_v3, %v1996_v15  ;;  %v2337_v39 = vadd.f32 %v2313_v43, %v2233_v36 }
 0x2a6   :  { %v2128_v63 = vpop.f32.mrf.mxu2 }
 0x2a7   :  { %v2144_v6 = vadd.f32 %v2122_v30, %v2070_v27  ;;  %2345 = vst [vmem:[#allocation10] sm:$0xff] %v2337_v39  ;;  %v1928_v39 = vadd.f32 %v4571_v45, %v4579_v0 }
 0x2a9   :  { %v2218_v4 = vadd.f32 %v2196_v46, %v2144_v6  ;;  %v2205_v21 = vpop.f32.mrf.mxu3  ;;  %v2002_v6 = vadd.f32 %v4581_v13, %v1928_v39 }
 0x2ab   :  { %v2316_v2 = vpop.f32.mrf.mxu0  ;;  %v2234_v48 = vadd.f32 %v4584_v29, %v2218_v4 }
 0x2ac   :  { %v2051_v53 = vpop.f32.mrf.mxu1 }
 0x2ad   :  { %v2071_v54 = vadd.f32 %v2051_v53, %v1997_v24  ;;  %v2338_v52 = vadd.f32 %v2316_v2, %v2234_v48 }
 0x2ae   :  { %v2131_v42 = vpop.f32.mrf.mxu2 }
 0x2af   :  { %v2145_v61 = vadd.f32 %v2125_v32, %v2071_v54  ;;  %2346 = vst [vmem:[#allocation10 + $0x8] sm:$0xff] %v2338_v52  ;;  %v1926_v32 = vadd.f32 %v4562_v17, %v4569_v1 }
 0x2b1   :  { %v2219_v34 = vadd.f32 %v2199_v22, %v2145_v61  ;;  %v2000_v25 = vadd.f32 %v4573_v8, %v1926_v32  ;;  %v2208_v62 = vpop.f32.mrf.mxu3 }
 0x2b3   :  { %v2319_v33 = vpop.f32.mrf.mxu0  ;;  %v2235_v26 = vadd.f32 %v4584_v29, %v2219_v34 }
 0x2b4   :  { %v2054_v57 = vpop.f32.mrf.mxu1 }
 0x2b5   :  { %v2072_v40 = vadd.f32 %v2054_v57, %v1998_v38  ;;  %v2339_v51 = vadd.f32 %v2319_v33, %v2235_v26 }
 0x2b6   :  { %v2134_v47 = vpop.f32.mrf.mxu2 }
 0x2b7   :  { %v2146_v14 = vadd.f32 %v2128_v63, %v2072_v40  ;;  %2347 = vst [vmem:[#allocation10 + $0x10] sm:$0xff] %v2339_v51 }
 0x2b9   :  { %v2220_v56 = vadd.f32 %v2202_v12, %v2146_v14  ;;  %v2211_v36 = vpop.f32.mrf.mxu3 }
 0x2bb   :  { %v2322_v19 = vpop.f32.mrf.mxu0  ;;  %v2236_v30 = vadd.f32 %v4584_v29, %v2220_v56 }
 0x2bc   :  { %v2057_v11 = vpop.f32.mrf.mxu1 }
 0x2bd   :  { %v2073_v58 = vadd.f32 %v2057_v11, %v1999_v49  ;;  %v2340_v37 = vadd.f32 %v2322_v19, %v2236_v30 }
 0x2be   :  { %v2137_v5 = vpop.f32.mrf.mxu2 }
 0x2bf   :  { %v2147_v10 = vadd.f32 %v2131_v42, %v2073_v58  ;;  %2348 = vst [vmem:[#allocation10 + $0x18] sm:$0xff] %v2340_v37 }
 0x2c1   :  { %v2221_v31 = vadd.f32 %v2205_v21, %v2147_v10  ;;  %v2214_v16 = vpop.f32.mrf.mxu3 }
 0x2c3   :  { %v2325_v41 = vpop.f32.mrf.mxu0  ;;  %v2237_v55 = vadd.f32 %v4584_v29, %v2221_v31 }
 0x2c4   :  { %v2060_v28 = vpop.f32.mrf.mxu1 }
 0x2c5   :  { %v2074_v44 = vadd.f32 %v2060_v28, %v2000_v25  ;;  %v2341_v46 = vadd.f32 %v2325_v41, %v2237_v55 }
 0x2c6   :  { %v2140_v20 = vpop.f32.mrf.mxu2 }
 0x2c7   :  { %v2148_v63 = vadd.f32 %v2134_v47, %v2074_v44  ;;  %2349 = vst [vmem:[#allocation10 + $0x20] sm:$0xff] %v2341_v46 }
 0x2c9   :  { %v2222_v43 = vadd.f32 %v2208_v62, %v2148_v63 }
 0x2cb   :  { %v2328_v35 = vpop.f32.mrf.mxu0  ;;  %v2238_v17 = vadd.f32 %v4584_v29, %v2222_v43 }
 0x2cc   :  { %v2063_v1 = vpop.f32.mrf.mxu1 }
 0x2cd   :  { %v2075_v8 = vadd.f32 %v2063_v1, %v2001_v18  ;;  %v2342_v15 = vadd.f32 %v2328_v35, %v2238_v17 }
 0x2ce   :  { %v2331_v27 = vpop.f32.mrf.mxu2 }
 0x2cf   :  { %v2149_v3 = vadd.f32 %v2137_v5, %v2075_v8  ;;  %2350 = vst [vmem:[#allocation10 + $0x28] sm:$0xff] %v2342_v15 }
 0x2d1   :  { %v2223_v22 = vadd.f32 %v2211_v36, %v2149_v3 }
 0x2d3   :  { %v2239_v59 = vadd.f32 %v4584_v29, %v2223_v22 }
 0x2d4   :  { %v2066_v7 = vpop.f32.mrf.mxu1 }
 0x2d5   :  { %v2076_v42 = vadd.f32 %v2066_v7, %v2002_v6  ;;  %v2343_v23 = vadd.f32 %v2331_v27, %v2239_v59 }
 0x2d6   :  { %v2334_v24 = vpop.f32.mrf.mxu2 }
 0x2d7   :  { %v2150_v2 = vadd.f32 %v2140_v20, %v2076_v42  ;;  %2351 = vst [vmem:[#allocation10 + $0x30] sm:$0xff] %v2343_v23 }
 0x2d9   :  { %v2224_v4 = vadd.f32 %v2214_v16, %v2150_v2 }
 0x2db   :  { %v2240_v45 = vadd.f32 %v4584_v29, %v2224_v4 }
 0x2dd   :  { %v2344_v0 = vadd.f32 %v2334_v24, %v2240_v45 }
 0x2df   :  { %2352 = vst [vmem:[#allocation10 + $0x38] sm:$0xff] %v2344_v0 }
 0x2e0   :  { %2365 = dma.vmem_to_hbm [thread:$0]  %s2358_s20, 1024, %s2360_s23, [#allocation4], %s2706_s29, %s2706_s29, %s2707_s30  }
 0x2e1   :  { %2703 = dma.done.wait [#allocation4], 1024  }
 0x2e2   :  { %2704 = vsyncadd [#allocation4], 4294966272 }
 0x2e3   :  { %2370 = vsyncpa [#allocation3], 1 }
 0x2e4   :  { %2371 = vsyncpa [#allocation6], 1 }
 0x2e5   :  { %2372 = vsyncpa [#allocation9], 1 }
 0x2e6   :  { %2373 = vsyncpa [#allocation4], 1 }

</bundles_post_ra>
